<compile_context>
chip_gen: v7x
topology: tpu7x:2x2x1
jax: 0.10.0
libtpu: 0.0.40
codegen_flags: <defaults>
</compile_context>

<pallas_src>
import functools

import jax
import jax.numpy as jnp
from jax.experimental import pallas as pl
from jax.experimental.pallas import tpu as pltpu


_VMEM_LIMIT = 32 * 1024 * 1024   # safe on v5e/v6e (128 MiB) and v7x (64 MiB)
_LRELU_SLOPE = 0.2
_IN_EPS = 1e-5


def _round_up(x, m):
    return (x + m - 1) // m * m


# ----------------------------- Pallas kernels ------------------------------

def _mm_kernel(*refs, fuse_act, has_bias, slope):
    """Tiled matmul with f32 accumulation; optional fused bias + LeakyReLU."""
    if has_bias:
        a_ref, b_ref, bias_ref, o_ref, acc_ref = refs
    else:
        a_ref, b_ref, o_ref, acc_ref = refs
        bias_ref = None

    @pl.when(pl.program_id(2) == 0)
    def _():
        acc_ref[...] = jnp.zeros_like(acc_ref)

    acc_ref[...] += jnp.dot(a_ref[...], b_ref[...],
                            preferred_element_type=jnp.float32)

    @pl.when(pl.program_id(2) == pl.num_programs(2) - 1)
    def _():
        y = acc_ref[...]
        if has_bias:
            y = y + bias_ref[...]
        if fuse_act:
            y = jnp.where(y > 0, y, slope * y)
        o_ref[...] = y.astype(o_ref.dtype)


def _in_lrelu_kernel(x_ref, o_ref, *, slope, eps):
    """InstanceNorm (biased var, no affine) + LeakyReLU on a (1, HW, 128) tile.
    Single pass: sum and sum-of-squares over the spatial (HW) axis."""
    x = x_ref[...]                                   # (1, HW, 128) float32
    inv_hw = 1.0 / x.shape[1]
    s = jnp.sum(x, axis=1, keepdims=True)
    ss = jnp.sum(x * x, axis=1, keepdims=True)
    mean = s * inv_hw
    var = jnp.maximum(ss * inv_hw - mean * mean, 0.0)
    y = (x - mean) * jax.lax.rsqrt(var + eps)
    o_ref[...] = jnp.where(y > 0, y, slope * y)


# ------------------------------ Pallas wrappers -----------------------------

def pallas_matmul(a, b, bias=None, fuse_lrelu=False, tm=512, tn=256, tk=512):
    """a:(M,K), b:(K,N) -> (M,N) float32.  bf16 MXU inputs, f32 accumulate.
    Pads M to a multiple of 8 / tile, K and N to lane multiples of 128."""
    M, K = a.shape
    K2, N = b.shape
    assert K == K2

    Mp = _round_up(M, 8)
    tm = min(tm, Mp)
    Mp = _round_up(M, tm)

    Np = _round_up(N, 128)
    tn = min(tn, Np)
    Np = _round_up(Np, tn)

    Kp = _round_up(K, 128)
    tk = min(tk, Kp)
    Kp = _round_up(Kp, tk)

    a_p = jnp.pad(a, ((0, Mp - M), (0, Kp - K))).astype(jnp.bfloat16)
    b_p = jnp.pad(b, ((0, Kp - K), (0, Np - N))).astype(jnp.bfloat16)

    has_bias = bias is not None
    inputs = [a_p, b_p]
    in_specs = [
        pl.BlockSpec((tm, tk), lambda i, j, k: (i, k)),
        pl.BlockSpec((tk, tn), lambda i, j, k: (k, j)),
    ]
    if has_bias:
        bias_p = jnp.pad(bias.reshape(1, N).astype(jnp.float32),
                         ((0, 0), (0, Np - N)))
        inputs.append(bias_p)
        in_specs.append(pl.BlockSpec((1, tn), lambda i, j, k: (0, j)))

    kernel = functools.partial(_mm_kernel, fuse_act=fuse_lrelu,
                               has_bias=has_bias, slope=_LRELU_SLOPE)

    out = pl.pallas_call(
        kernel,
        out_shape=jax.ShapeDtypeStruct((Mp, Np), jnp.float32),
        grid_spec=pltpu.PrefetchScalarGridSpec(
            num_scalar_prefetch=0,
            grid=(Mp // tm, Np // tn, Kp // tk),
            in_specs=in_specs,
            out_specs=pl.BlockSpec((tm, tn), lambda i, j, k: (i, j)),
            scratch_shapes=[pltpu.VMEM((tm, tn), jnp.float32)],
        ),
        compiler_params=pltpu.CompilerParams(
            dimension_semantics=("parallel", "parallel", "arbitrary"),
            vmem_limit_bytes=_VMEM_LIMIT,
        ),
    )(*inputs)
    return out[:M, :N]


def pallas_instnorm_lrelu(x):
    """x: (N, HW, C) float32 -> InstanceNorm(eps=1e-5, biased var, no affine)
    followed by LeakyReLU(0.2).  Tiled over (N, C/128); reduction over HW stays
    in-block."""
    n, hw, c = x.shape
    cp = _round_up(c, 128)
    xp = x if cp == c else jnp.pad(x, ((0, 0), (0, 0), (0, cp - c)))

    kernel = functools.partial(_in_lrelu_kernel, slope=_LRELU_SLOPE, eps=_IN_EPS)
    out = pl.pallas_call(
        kernel,
        out_shape=jax.ShapeDtypeStruct((n, hw, cp), jnp.float32),
        grid_spec=pltpu.PrefetchScalarGridSpec(
            num_scalar_prefetch=0,
            grid=(n, cp // 128),
            in_specs=[pl.BlockSpec((1, hw, 128), lambda b, cj: (b, 0, cj))],
            out_specs=pl.BlockSpec((1, hw, 128), lambda b, cj: (b, 0, cj)),
        ),
        compiler_params=pltpu.CompilerParams(
            dimension_semantics=("parallel", "parallel"),
            vmem_limit_bytes=_VMEM_LIMIT,
        ),
    )(xp.astype(jnp.float32))
    return out if cp == c else out[:, :, :c]


# ------------------------------- glue (JAX) ---------------------------------

def im2col_nhwc(x, kh, kw, stride, pad):
    """x: (N, H, W, C) NHWC -> patches (N*OH*OW, KH*KW*C), row layout (kh,kw,c).
    Zero padding (MUNIT Conv2dBlock default pad_type='zero')."""
    n, h, w, c = x.shape
    xp = jnp.pad(x, ((0, 0), (pad, pad), (pad, pad), (0, 0)))
    oh = (h + 2 * pad - kh) // stride + 1
    ow = (w + 2 * pad - kw) // stride + 1
    taps = []
    for i in range(kh):
        for j in range(kw):
            taps.append(
                xp[:, i:i + stride * oh:stride, j:j + stride * ow:stride, :])
    patches = jnp.concatenate(taps, axis=-1)            # (N, OH, OW, KH*KW*C)
    return patches.reshape(n * oh * ow, kh * kw * c), oh, ow


def conv_block(x, w, b, stride, pad, norm, act):
    """x: (N, H, W, C) NHWC; w: (O, C, KH, KW) (PyTorch layout); b: (O,) or None.
    conv -> [instance norm] -> [lrelu(0.2)].  Returns (N, OH, OW, O) NHWC."""
    n = x.shape[0]
    o, cin, kh, kw = w.shape
    patches, oh, ow = im2col_nhwc(x, kh, kw, stride, pad)       # (M, KH*KW*C)
    w_mat = jnp.transpose(w, (2, 3, 1, 0)).reshape(kh * kw * cin, o)

    fuse = act and (norm != "in")          # fuse LeakyReLU into matmul epilogue
    y = pallas_matmul(patches, w_mat, bias=b, fuse_lrelu=fuse)  # (M, O) f32
    y = y.reshape(n, oh * ow, o)

    if norm == "in":                       # IN layers all use lrelu in this model
        y = pallas_instnorm_lrelu(y)

    return y.reshape(n, oh, ow, o)


# ------------------------------ Discriminator -------------------------------

def init_params(key):
    def conv_w(key, o, c, k):
        fan_in = c * k * k
        return (jax.random.normal(key, (o, c, k, k), jnp.float32)
                * jnp.sqrt(2.0 / fan_in))

    keys = jax.random.split(key, 6)
    return {
        "w1": conv_w(keys[0], 64, 3, 6),
        "w2": conv_w(keys[1], 128, 64, 4),
        "w3": conv_w(keys[2], 256, 128, 4),
        "w4": conv_w(keys[3], 512, 256, 4),
        "w5": conv_w(keys[4], 1, 512, 1),
        "b5": jax.random.normal(keys[5], (1,), jnp.float32) * 0.01,
    }


def discriminator_forward(params, x_nchw):
    # External interface is NCHW (matches PyTorch); internally NHWC end-to-end.
    x = jnp.transpose(x_nchw, (0, 2, 3, 1))
    x = conv_block(x, params["w1"], None, stride=2, pad=2, norm="none", act=True)
    x = conv_block(x, params["w2"], None, stride=2, pad=1, norm="in", act=True)
    x = conv_block(x, params["w3"], None, stride=2, pad=1, norm="in", act=True)
    x = conv_block(x, params["w4"], None, stride=2, pad=1, norm="in", act=True)
    x = conv_block(x, params["w5"], params["b5"], stride=1, pad=0, norm="none",
                   act=False)
    return jnp.transpose(x, (0, 3, 1, 2))   # (N, 1, H/16, W/16) NCHW


if __name__ == "__main__":
    key = jax.random.PRNGKey(0)
    pkey, xkey = jax.random.split(key)
    params = init_params(pkey)

    # Small deterministic input: batch=2, 3 channels, 32x32 spatial (NCHW).
    x = jax.random.normal(xkey, (2, 3, 32, 32), jnp.float32)

    fwd = jax.jit(discriminator_forward)
    out = jax.block_until_ready(fwd(params, x))

    assert out.shape == (2, 1, 2, 2), out.shape
    assert out.dtype == jnp.float32
    assert bool(jnp.all(jnp.isfinite(out)))
    print("KERNEL_OK")
</pallas_src>

<mosaic_0001>
module attributes {stable_mosaic.version = 11 : i64} {
  func.func @_mm_kernel(%arg0: i32, %arg1: i32, %arg2: i32, %arg3: memref<512x128xbf16, #tpu.memory_space<vmem>>, %arg4: memref<128x128xbf16, #tpu.memory_space<vmem>>, %arg5: memref<512x128xf32, #tpu.memory_space<vmem>>, %arg6: memref<512x128xf32, #tpu.memory_space<vmem>>) attributes {dimension_semantics = [#tpu.dimension_semantics<parallel>, #tpu.dimension_semantics<parallel>, #tpu.dimension_semantics<arbitrary>], iteration_bounds = array<i64: 1, 1, 1>, scalar_prefetch = 0 : i64, scratch_operands = 1 : i64, tpu.core_type = #tpu.core_type<tc>, window_params = [{transform_indices = @transform_0, window_bounds = array<i64: 512, 128>}, {transform_indices = @transform_1, window_bounds = array<i64: 128, 128>}, {transform_indices = @transform_2, window_bounds = array<i64: 512, 128>}]} {
    %c0_i32 = arith.constant 0 : i32
    %0 = arith.cmpi eq, %arg2, %c0_i32 : i32
    %1 = arith.extui %0 : i1 to i32
    %c0_i32_0 = arith.constant 0 : i32
    %2 = arith.cmpi ne, %1, %c0_i32_0 : i32
    scf.if %2 {
      %cst_10 = arith.constant 0.000000e+00 : f32
      %12 = vector.broadcast %cst_10 : f32 to vector<512x128xf32>
      %c0_11 = arith.constant 0 : index
      %c0_12 = arith.constant 0 : index
      %13 = vector.load %arg6[%c0_11, %c0_12] : memref<512x128xf32, #tpu.memory_space<vmem>>, vector<512x128xf32>
      tpu.vector_store %arg6[%c0_11, %c0_12], %12 {strides = array<i32>} : memref<512x128xf32, #tpu.memory_space<vmem>>, vector<512x128xf32>,
    } else {
    }
    %c0 = arith.constant 0 : index
    %c0_1 = arith.constant 0 : index
    %3 = vector.load %arg6[%c0, %c0_1] : memref<512x128xf32, #tpu.memory_space<vmem>>, vector<512x128xf32>
    %c0_2 = arith.constant 0 : index
    %c0_3 = arith.constant 0 : index
    %4 = vector.load %arg3[%c0_2, %c0_3] : memref<512x128xbf16, #tpu.memory_space<vmem>>, vector<512x128xbf16>
    %c0_4 = arith.constant 0 : index
    %c0_5 = arith.constant 0 : index
    %5 = vector.load %arg4[%c0_4, %c0_5] : memref<128x128xbf16, #tpu.memory_space<vmem>>, vector<128x128xbf16>
    %cst = arith.constant dense<0.000000e+00> : vector<512x128xf32>
    %6 = tpu.matmul %4, %5, %cst {dimension_numbers = #tpu.dot_dimension_numbers<[1], [0], [0], [1], [0, 0, 1, 1], [], []>} : vector<512x128xbf16>, vector<128x128xbf16>, vector<512x128xf32> -> vector<512x128xf32>
    %7 = arith.addf %3, %6 : vector<512x128xf32>
    %c0_6 = arith.constant 0 : index
    %c0_7 = arith.constant 0 : index
    %8 = vector.load %arg6[%c0_6, %c0_7] : memref<512x128xf32, #tpu.memory_space<vmem>>, vector<512x128xf32>
    tpu.vector_store %arg6[%c0_6, %c0_7], %7 {strides = array<i32>} : memref<512x128xf32, #tpu.memory_space<vmem>>, vector<512x128xf32>,
    %c0_i32_8 = arith.constant 0 : i32
    %9 = arith.cmpi eq, %arg2, %c0_i32_8 : i32
    %10 = arith.extui %9 : i1 to i32
    %c0_i32_9 = arith.constant 0 : i32
    %11 = arith.cmpi ne, %10, %c0_i32_9 : i32
    scf.if %11 {
      %c0_10 = arith.constant 0 : index
      %c0_11 = arith.constant 0 : index
      %12 = vector.load %arg6[%c0_10, %c0_11] : memref<512x128xf32, #tpu.memory_space<vmem>>, vector<512x128xf32>
      %cst_12 = arith.constant 0.000000e+00 : f32
      %13 = vector.broadcast %cst_12 : f32 to vector<512x128xf32>
      %14 = arith.cmpf ogt, %12, %13 : vector<512x128xf32>
      %cst_13 = arith.constant 2.000000e-01 : f32
      %15 = vector.broadcast %cst_13 : f32 to vector<512x128xf32>
      %16 = arith.mulf %15, %12 : vector<512x128xf32>
      %17 = arith.select %14, %12, %16 : vector<512x128xi1>, vector<512x128xf32>
      %c0_14 = arith.constant 0 : index
      %c0_15 = arith.constant 0 : index
      %18 = vector.load %arg5[%c0_14, %c0_15] : memref<512x128xf32, #tpu.memory_space<vmem>>, vector<512x128xf32>
      tpu.vector_store %arg5[%c0_14, %c0_15], %17 {strides = array<i32>} : memref<512x128xf32, #tpu.memory_space<vmem>>, vector<512x128xf32>,
    } else {
    }
    return
  }
  func.func @transform_0(%arg0: i32, %arg1: i32, %arg2: i32) -> (i32, i32) {
    %c0_i32 = arith.constant 0 : i32
    return %arg0, %arg2 : i32, i32
  }
  func.func @transform_1(%arg0: i32, %arg1: i32, %arg2: i32) -> (i32, i32) {
    %c0_i32 = arith.constant 0 : i32
    return %arg2, %arg1 : i32, i32
  }
  func.func @transform_2(%arg0: i32, %arg1: i32, %arg2: i32) -> (i32, i32) {
    %c0_i32 = arith.constant 0 : i32
    return %arg0, %arg1 : i32, i32
  }
}

module attributes {stable_mosaic.version = 11 : i64} {
  func.func @_mm_kernel(%arg0: i32, %arg1: i32, %arg2: i32, %arg3: memref<128x512xbf16, #tpu.memory_space<vmem>>, %arg4: memref<512x128xbf16, #tpu.memory_space<vmem>>, %arg5: memref<128x128xf32, #tpu.memory_space<vmem>>, %arg6: memref<128x128xf32, #tpu.memory_space<vmem>>) attributes {dimension_semantics = [#tpu.dimension_semantics<parallel>, #tpu.dimension_semantics<parallel>, #tpu.dimension_semantics<arbitrary>], iteration_bounds = array<i64: 1, 1, 2>, scalar_prefetch = 0 : i64, scratch_operands = 1 : i64, tpu.core_type = #tpu.core_type<tc>, window_params = [{transform_indices = @transform_0, window_bounds = array<i64: 128, 512>}, {transform_indices = @transform_1, window_bounds = array<i64: 512, 128>}, {transform_indices = @transform_2, window_bounds = array<i64: 128, 128>}]} {
    %c0_i32 = arith.constant 0 : i32
    %0 = arith.cmpi eq, %arg2, %c0_i32 : i32
    %1 = arith.extui %0 : i1 to i32
    %c0_i32_0 = arith.constant 0 : i32
    %2 = arith.cmpi ne, %1, %c0_i32_0 : i32
    scf.if %2 {
      %cst_9 = arith.constant 0.000000e+00 : f32
      %12 = vector.broadcast %cst_9 : f32 to vector<128x128xf32>
      %c0_10 = arith.constant 0 : index
      %c0_11 = arith.constant 0 : index
      %13 = vector.load %arg6[%c0_10, %c0_11] : memref<128x128xf32, #tpu.memory_space<vmem>>, vector<128x128xf32>
      tpu.vector_store %arg6[%c0_10, %c0_11], %12 {strides = array<i32>} : memref<128x128xf32, #tpu.memory_space<vmem>>, vector<128x128xf32>,
    } else {
    }
    %c0 = arith.constant 0 : index
    %c0_1 = arith.constant 0 : index
    %3 = vector.load %arg6[%c0, %c0_1] : memref<128x128xf32, #tpu.memory_space<vmem>>, vector<128x128xf32>
    %c0_2 = arith.constant 0 : index
    %c0_3 = arith.constant 0 : index
    %4 = vector.load %arg3[%c0_2, %c0_3] : memref<128x512xbf16, #tpu.memory_space<vmem>>, vector<128x512xbf16>
    %c0_4 = arith.constant 0 : index
    %c0_5 = arith.constant 0 : index
    %5 = vector.load %arg4[%c0_4, %c0_5] : memref<512x128xbf16, #tpu.memory_space<vmem>>, vector<512x128xbf16>
    %cst = arith.constant dense<0.000000e+00> : vector<128x128xf32>
    %6 = tpu.matmul %4, %5, %cst {dimension_numbers = #tpu.dot_dimension_numbers<[1], [0], [0], [1], [0, 0, 1, 1], [], []>} : vector<128x512xbf16>, vector<512x128xbf16>, vector<128x128xf32> -> vector<128x128xf32>
    %7 = arith.addf %3, %6 : vector<128x128xf32>
    %c0_6 = arith.constant 0 : index
    %c0_7 = arith.constant 0 : index
    %8 = vector.load %arg6[%c0_6, %c0_7] : memref<128x128xf32, #tpu.memory_space<vmem>>, vector<128x128xf32>
    tpu.vector_store %arg6[%c0_6, %c0_7], %7 {strides = array<i32>} : memref<128x128xf32, #tpu.memory_space<vmem>>, vector<128x128xf32>,
    %c1_i32 = arith.constant 1 : i32
    %9 = arith.cmpi eq, %arg2, %c1_i32 : i32
    %10 = arith.extui %9 : i1 to i32
    %c0_i32_8 = arith.constant 0 : i32
    %11 = arith.cmpi ne, %10, %c0_i32_8 : i32
    scf.if %11 {
      %c0_9 = arith.constant 0 : index
      %c0_10 = arith.constant 0 : index
      %12 = vector.load %arg6[%c0_9, %c0_10] : memref<128x128xf32, #tpu.memory_space<vmem>>, vector<128x128xf32>
      %c0_11 = arith.constant 0 : index
      %c0_12 = arith.constant 0 : index
      %13 = vector.load %arg5[%c0_11, %c0_12] : memref<128x128xf32, #tpu.memory_space<vmem>>, vector<128x128xf32>
      tpu.vector_store %arg5[%c0_11, %c0_12], %12 {strides = array<i32>} : memref<128x128xf32, #tpu.memory_space<vmem>>, vector<128x128xf32>,
    } else {
    }
    return
  }
  func.func @transform_0(%arg0: i32, %arg1: i32, %arg2: i32) -> (i32, i32) {
    %c0_i32 = arith.constant 0 : i32
    return %arg0, %arg2 : i32, i32
  }
  func.func @transform_1(%arg0: i32, %arg1: i32, %arg2: i32) -> (i32, i32) {
    %c0_i32 = arith.constant 0 : i32
    return %arg2, %arg1 : i32, i32
  }
  func.func @transform_2(%arg0: i32, %arg1: i32, %arg2: i32) -> (i32, i32) {
    %c0_i32 = arith.constant 0 : i32
    return %arg0, %arg1 : i32, i32
  }
}

module attributes {stable_mosaic.version = 11 : i64} {
  func.func @_in_lrelu_kernel(%arg0: i32, %arg1: i32, %arg2: memref<1x64x128xf32, #tpu.memory_space<vmem>>, %arg3: memref<1x64x128xf32, #tpu.memory_space<vmem>>) attributes {dimension_semantics = [#tpu.dimension_semantics<parallel>, #tpu.dimension_semantics<parallel>], iteration_bounds = array<i64: 2, 1>, scalar_prefetch = 0 : i64, scratch_operands = 0 : i64, tpu.core_type = #tpu.core_type<tc>, window_params = [{transform_indices = @transform_0, window_bounds = array<i64: 1, 64, 128>}, {transform_indices = @transform_1, window_bounds = array<i64: 1, 64, 128>}]} {
    %c0 = arith.constant 0 : index
    %c0_0 = arith.constant 0 : index
    %c0_1 = arith.constant 0 : index
    %0 = vector.load %arg2[%c0, %c0_0, %c0_1] : memref<1x64x128xf32, #tpu.memory_space<vmem>>, vector<1x64x128xf32>
    %cst = arith.constant dense<0.000000e+00> : vector<1x128xf32>
    %1 = vector.multi_reduction <add>, %0, %cst [1] : vector<1x64x128xf32> to vector<1x128xf32>
    %2 = vector.shape_cast %1 : vector<1x128xf32> to vector<1x1x128xf32>
    %3 = arith.mulf %0, %0 : vector<1x64x128xf32>
    %cst_2 = arith.constant dense<0.000000e+00> : vector<1x128xf32>
    %4 = vector.multi_reduction <add>, %3, %cst_2 [1] : vector<1x64x128xf32> to vector<1x128xf32>
    %5 = vector.shape_cast %4 : vector<1x128xf32> to vector<1x1x128xf32>
    %cst_3 = arith.constant 1.562500e-02 : f32
    %6 = vector.broadcast %cst_3 : f32 to vector<1x1x128xf32>
    %7 = arith.mulf %2, %6 : vector<1x1x128xf32>
    %cst_4 = arith.constant 1.562500e-02 : f32
    %8 = vector.broadcast %cst_4 : f32 to vector<1x1x128xf32>
    %9 = arith.mulf %5, %8 : vector<1x1x128xf32>
    %10 = arith.mulf %7, %7 : vector<1x1x128xf32>
    %11 = arith.subf %9, %10 : vector<1x1x128xf32>
    %cst_5 = arith.constant 0.000000e+00 : f32
    %12 = vector.broadcast %cst_5 : f32 to vector<1x1x128xf32>
    %13 = arith.maximumf %11, %12 : vector<1x1x128xf32>
    %14 = vector.broadcast %7 : vector<1x1x128xf32> to vector<1x64x128xf32>
    %15 = arith.subf %0, %14 : vector<1x64x128xf32>
    %cst_6 = arith.constant 9.99999974E-6 : f32
    %16 = vector.broadcast %cst_6 : f32 to vector<1x1x128xf32>
    %17 = arith.addf %13, %16 : vector<1x1x128xf32>
    %18 = math.rsqrt %17 : vector<1x1x128xf32>
    %19 = vector.broadcast %18 : vector<1x1x128xf32> to vector<1x64x128xf32>
    %20 = arith.mulf %15, %19 : vector<1x64x128xf32>
    %cst_7 = arith.constant 0.000000e+00 : f32
    %21 = vector.broadcast %cst_7 : f32 to vector<1x64x128xf32>
    %22 = arith.cmpf ogt, %20, %21 : vector<1x64x128xf32>
    %cst_8 = arith.constant 2.000000e-01 : f32
    %23 = vector.broadcast %cst_8 : f32 to vector<1x64x128xf32>
    %24 = arith.mulf %23, %20 : vector<1x64x128xf32>
    %25 = arith.select %22, %20, %24 : vector<1x64x128xi1>, vector<1x64x128xf32>
    %c0_9 = arith.constant 0 : index
    %c0_10 = arith.constant 0 : index
    %c0_11 = arith.constant 0 : index
    %26 = vector.load %arg3[%c0_9, %c0_10, %c0_11] : memref<1x64x128xf32, #tpu.memory_space<vmem>>, vector<1x64x128xf32>
    tpu.vector_store %arg3[%c0_9, %c0_10, %c0_11], %25 {strides = array<i32>} : memref<1x64x128xf32, #tpu.memory_space<vmem>>, vector<1x64x128xf32>,
    return
  }
  func.func @transform_0(%arg0: i32, %arg1: i32) -> (i32, i32, i32) {
    %c0_i32 = arith.constant 0 : i32
    %c0_i32_0 = arith.constant 0 : i32
    return %arg0, %c0_i32, %arg1 : i32, i32, i32
  }
  func.func @transform_1(%arg0: i32, %arg1: i32) -> (i32, i32, i32) {
    %c0_i32 = arith.constant 0 : i32
    %c0_i32_0 = arith.constant 0 : i32
    return %arg0, %c0_i32, %arg1 : i32, i32, i32
  }
}

module attributes {stable_mosaic.version = 11 : i64} {
  func.func @_mm_kernel(%arg0: i32, %arg1: i32, %arg2: i32, %arg3: memref<32x512xbf16, #tpu.memory_space<vmem>>, %arg4: memref<512x256xbf16, #tpu.memory_space<vmem>>, %arg5: memref<32x256xf32, #tpu.memory_space<vmem>>, %arg6: memref<32x256xf32, #tpu.memory_space<vmem>>) attributes {dimension_semantics = [#tpu.dimension_semantics<parallel>, #tpu.dimension_semantics<parallel>, #tpu.dimension_semantics<arbitrary>], iteration_bounds = array<i64: 1, 1, 4>, scalar_prefetch = 0 : i64, scratch_operands = 1 : i64, tpu.core_type = #tpu.core_type<tc>, window_params = [{transform_indices = @transform_0, window_bounds = array<i64: 32, 512>}, {transform_indices = @transform_1, window_bounds = array<i64: 512, 256>}, {transform_indices = @transform_2, window_bounds = array<i64: 32, 256>}]} {
    %c0_i32 = arith.constant 0 : i32
    %0 = arith.cmpi eq, %arg2, %c0_i32 : i32
    %1 = arith.extui %0 : i1 to i32
    %c0_i32_0 = arith.constant 0 : i32
    %2 = arith.cmpi ne, %1, %c0_i32_0 : i32
    scf.if %2 {
      %cst_9 = arith.constant 0.000000e+00 : f32
      %12 = vector.broadcast %cst_9 : f32 to vector<32x256xf32>
      %c0_10 = arith.constant 0 : index
      %c0_11 = arith.constant 0 : index
      %13 = vector.load %arg6[%c0_10, %c0_11] : memref<32x256xf32, #tpu.memory_space<vmem>>, vector<32x256xf32>
      tpu.vector_store %arg6[%c0_10, %c0_11], %12 {strides = array<i32>} : memref<32x256xf32, #tpu.memory_space<vmem>>, vector<32x256xf32>,
    } else {
    }
    %c0 = arith.constant 0 : index
    %c0_1 = arith.constant 0 : index
    %3 = vector.load %arg6[%c0, %c0_1] : memref<32x256xf32, #tpu.memory_space<vmem>>, vector<32x256xf32>
    %c0_2 = arith.constant 0 : index
    %c0_3 = arith.constant 0 : index
    %4 = vector.load %arg3[%c0_2, %c0_3] : memref<32x512xbf16, #tpu.memory_space<vmem>>, vector<32x512xbf16>
    %c0_4 = arith.constant 0 : index
    %c0_5 = arith.constant 0 : index
    %5 = vector.load %arg4[%c0_4, %c0_5] : memref<512x256xbf16, #tpu.memory_space<vmem>>, vector<512x256xbf16>
    %cst = arith.constant dense<0.000000e+00> : vector<32x256xf32>
    %6 = tpu.matmul %4, %5, %cst {dimension_numbers = #tpu.dot_dimension_numbers<[1], [0], [0], [1], [0, 0, 1, 1], [], []>} : vector<32x512xbf16>, vector<512x256xbf16>, vector<32x256xf32> -> vector<32x256xf32>
    %7 = arith.addf %3, %6 : vector<32x256xf32>
    %c0_6 = arith.constant 0 : index
    %c0_7 = arith.constant 0 : index
    %8 = vector.load %arg6[%c0_6, %c0_7] : memref<32x256xf32, #tpu.memory_space<vmem>>, vector<32x256xf32>
    tpu.vector_store %arg6[%c0_6, %c0_7], %7 {strides = array<i32>} : memref<32x256xf32, #tpu.memory_space<vmem>>, vector<32x256xf32>,
    %c3_i32 = arith.constant 3 : i32
    %9 = arith.cmpi eq, %arg2, %c3_i32 : i32
    %10 = arith.extui %9 : i1 to i32
    %c0_i32_8 = arith.constant 0 : i32
    %11 = arith.cmpi ne, %10, %c0_i32_8 : i32
    scf.if %11 {
      %c0_9 = arith.constant 0 : index
      %c0_10 = arith.constant 0 : index
      %12 = vector.load %arg6[%c0_9, %c0_10] : memref<32x256xf32, #tpu.memory_space<vmem>>, vector<32x256xf32>
      %c0_11 = arith.constant 0 : index
      %c0_12 = arith.constant 0 : index
      %13 = vector.load %arg5[%c0_11, %c0_12] : memref<32x256xf32, #tpu.memory_space<vmem>>, vector<32x256xf32>
      tpu.vector_store %arg5[%c0_11, %c0_12], %12 {strides = array<i32>} : memref<32x256xf32, #tpu.memory_space<vmem>>, vector<32x256xf32>,
    } else {
    }
    return
  }
  func.func @transform_0(%arg0: i32, %arg1: i32, %arg2: i32) -> (i32, i32) {
    %c0_i32 = arith.constant 0 : i32
    return %arg0, %arg2 : i32, i32
  }
  func.func @transform_1(%arg0: i32, %arg1: i32, %arg2: i32) -> (i32, i32) {
    %c0_i32 = arith.constant 0 : i32
    return %arg2, %arg1 : i32, i32
  }
  func.func @transform_2(%arg0: i32, %arg1: i32, %arg2: i32) -> (i32, i32) {
    %c0_i32 = arith.constant 0 : i32
    return %arg0, %arg1 : i32, i32
  }
}

module attributes {stable_mosaic.version = 11 : i64} {
  func.func @_in_lrelu_kernel(%arg0: i32, %arg1: i32, %arg2: memref<1x16x128xf32, #tpu.memory_space<vmem>>, %arg3: memref<1x16x128xf32, #tpu.memory_space<vmem>>) attributes {dimension_semantics = [#tpu.dimension_semantics<parallel>, #tpu.dimension_semantics<parallel>], iteration_bounds = array<i64: 2, 2>, scalar_prefetch = 0 : i64, scratch_operands = 0 : i64, tpu.core_type = #tpu.core_type<tc>, window_params = [{transform_indices = @transform_0, window_bounds = array<i64: 1, 16, 128>}, {transform_indices = @transform_1, window_bounds = array<i64: 1, 16, 128>}]} {
    %c0 = arith.constant 0 : index
    %c0_0 = arith.constant 0 : index
    %c0_1 = arith.constant 0 : index
    %0 = vector.load %arg2[%c0, %c0_0, %c0_1] : memref<1x16x128xf32, #tpu.memory_space<vmem>>, vector<1x16x128xf32>
    %cst = arith.constant dense<0.000000e+00> : vector<1x128xf32>
    %1 = vector.multi_reduction <add>, %0, %cst [1] : vector<1x16x128xf32> to vector<1x128xf32>
    %2 = vector.shape_cast %1 : vector<1x128xf32> to vector<1x1x128xf32>
    %3 = arith.mulf %0, %0 : vector<1x16x128xf32>
    %cst_2 = arith.constant dense<0.000000e+00> : vector<1x128xf32>
    %4 = vector.multi_reduction <add>, %3, %cst_2 [1] : vector<1x16x128xf32> to vector<1x128xf32>
    %5 = vector.shape_cast %4 : vector<1x128xf32> to vector<1x1x128xf32>
    %cst_3 = arith.constant 6.250000e-02 : f32
    %6 = vector.broadcast %cst_3 : f32 to vector<1x1x128xf32>
    %7 = arith.mulf %2, %6 : vector<1x1x128xf32>
    %cst_4 = arith.constant 6.250000e-02 : f32
    %8 = vector.broadcast %cst_4 : f32 to vector<1x1x128xf32>
    %9 = arith.mulf %5, %8 : vector<1x1x128xf32>
    %10 = arith.mulf %7, %7 : vector<1x1x128xf32>
    %11 = arith.subf %9, %10 : vector<1x1x128xf32>
    %cst_5 = arith.constant 0.000000e+00 : f32
    %12 = vector.broadcast %cst_5 : f32 to vector<1x1x128xf32>
    %13 = arith.maximumf %11, %12 : vector<1x1x128xf32>
    %14 = vector.broadcast %7 : vector<1x1x128xf32> to vector<1x16x128xf32>
    %15 = arith.subf %0, %14 : vector<1x16x128xf32>
    %cst_6 = arith.constant 9.99999974E-6 : f32
    %16 = vector.broadcast %cst_6 : f32 to vector<1x1x128xf32>
    %17 = arith.addf %13, %16 : vector<1x1x128xf32>
    %18 = math.rsqrt %17 : vector<1x1x128xf32>
    %19 = vector.broadcast %18 : vector<1x1x128xf32> to vector<1x16x128xf32>
    %20 = arith.mulf %15, %19 : vector<1x16x128xf32>
    %cst_7 = arith.constant 0.000000e+00 : f32
    %21 = vector.broadcast %cst_7 : f32 to vector<1x16x128xf32>
    %22 = arith.cmpf ogt, %20, %21 : vector<1x16x128xf32>
    %cst_8 = arith.constant 2.000000e-01 : f32
    %23 = vector.broadcast %cst_8 : f32 to vector<1x16x128xf32>
    %24 = arith.mulf %23, %20 : vector<1x16x128xf32>
    %25 = arith.select %22, %20, %24 : vector<1x16x128xi1>, vector<1x16x128xf32>
    %c0_9 = arith.constant 0 : index
    %c0_10 = arith.constant 0 : index
    %c0_11 = arith.constant 0 : index
    %26 = vector.load %arg3[%c0_9, %c0_10, %c0_11] : memref<1x16x128xf32, #tpu.memory_space<vmem>>, vector<1x16x128xf32>
    tpu.vector_store %arg3[%c0_9, %c0_10, %c0_11], %25 {strides = array<i32>} : memref<1x16x128xf32, #tpu.memory_space<vmem>>, vector<1x16x128xf32>,
    return
  }
  func.func @transform_0(%arg0: i32, %arg1: i32) -> (i32, i32, i32) {
    %c0_i32 = arith.constant 0 : i32
    %c0_i32_0 = arith.constant 0 : i32
    return %arg0, %c0_i32, %arg1 : i32, i32, i32
  }
  func.func @transform_1(%arg0: i32, %arg1: i32) -> (i32, i32, i32) {
    %c0_i32 = arith.constant 0 : i32
    %c0_i32_0 = arith.constant 0 : i32
    return %arg0, %c0_i32, %arg1 : i32, i32, i32
  }
}

module attributes {stable_mosaic.version = 11 : i64} {
  func.func @_mm_kernel(%arg0: i32, %arg1: i32, %arg2: i32, %arg3: memref<8x512xbf16, #tpu.memory_space<vmem>>, %arg4: memref<512x256xbf16, #tpu.memory_space<vmem>>, %arg5: memref<8x256xf32, #tpu.memory_space<vmem>>, %arg6: memref<8x256xf32, #tpu.memory_space<vmem>>) attributes {dimension_semantics = [#tpu.dimension_semantics<parallel>, #tpu.dimension_semantics<parallel>, #tpu.dimension_semantics<arbitrary>], iteration_bounds = array<i64: 1, 2, 8>, scalar_prefetch = 0 : i64, scratch_operands = 1 : i64, tpu.core_type = #tpu.core_type<tc>, window_params = [{transform_indices = @transform_0, window_bounds = array<i64: 8, 512>}, {transform_indices = @transform_1, window_bounds = array<i64: 512, 256>}, {transform_indices = @transform_2, window_bounds = array<i64: 8, 256>}]} {
    %c0_i32 = arith.constant 0 : i32
    %0 = arith.cmpi eq, %arg2, %c0_i32 : i32
    %1 = arith.extui %0 : i1 to i32
    %c0_i32_0 = arith.constant 0 : i32
    %2 = arith.cmpi ne, %1, %c0_i32_0 : i32
    scf.if %2 {
      %cst_9 = arith.constant 0.000000e+00 : f32
      %12 = vector.broadcast %cst_9 : f32 to vector<8x256xf32>
      %c0_10 = arith.constant 0 : index
      %c0_11 = arith.constant 0 : index
      %13 = vector.load %arg6[%c0_10, %c0_11] : memref<8x256xf32, #tpu.memory_space<vmem>>, vector<8x256xf32>
      tpu.vector_store %arg6[%c0_10, %c0_11], %12 {strides = array<i32>} : memref<8x256xf32, #tpu.memory_space<vmem>>, vector<8x256xf32>,
    } else {
    }
    %c0 = arith.constant 0 : index
    %c0_1 = arith.constant 0 : index
    %3 = vector.load %arg6[%c0, %c0_1] : memref<8x256xf32, #tpu.memory_space<vmem>>, vector<8x256xf32>
    %c0_2 = arith.constant 0 : index
    %c0_3 = arith.constant 0 : index
    %4 = vector.load %arg3[%c0_2, %c0_3] : memref<8x512xbf16, #tpu.memory_space<vmem>>, vector<8x512xbf16>
    %c0_4 = arith.constant 0 : index
    %c0_5 = arith.constant 0 : index
    %5 = vector.load %arg4[%c0_4, %c0_5] : memref<512x256xbf16, #tpu.memory_space<vmem>>, vector<512x256xbf16>
    %cst = arith.constant dense<0.000000e+00> : vector<8x256xf32>
    %6 = tpu.matmul %4, %5, %cst {dimension_numbers = #tpu.dot_dimension_numbers<[1], [0], [0], [1], [0, 0, 1, 1], [], []>} : vector<8x512xbf16>, vector<512x256xbf16>, vector<8x256xf32> -> vector<8x256xf32>
    %7 = arith.addf %3, %6 : vector<8x256xf32>
    %c0_6 = arith.constant 0 : index
    %c0_7 = arith.constant 0 : index
    %8 = vector.load %arg6[%c0_6, %c0_7] : memref<8x256xf32, #tpu.memory_space<vmem>>, vector<8x256xf32>
    tpu.vector_store %arg6[%c0_6, %c0_7], %7 {strides = array<i32>} : memref<8x256xf32, #tpu.memory_space<vmem>>, vector<8x256xf32>,
    %c7_i32 = arith.constant 7 : i32
    %9 = arith.cmpi eq, %arg2, %c7_i32 : i32
    %10 = arith.extui %9 : i1 to i32
    %c0_i32_8 = arith.constant 0 : i32
    %11 = arith.cmpi ne, %10, %c0_i32_8 : i32
    scf.if %11 {
      %c0_9 = arith.constant 0 : index
      %c0_10 = arith.constant 0 : index
      %12 = vector.load %arg6[%c0_9, %c0_10] : memref<8x256xf32, #tpu.memory_space<vmem>>, vector<8x256xf32>
      %c0_11 = arith.constant 0 : index
      %c0_12 = arith.constant 0 : index
      %13 = vector.load %arg5[%c0_11, %c0_12] : memref<8x256xf32, #tpu.memory_space<vmem>>, vector<8x256xf32>
      tpu.vector_store %arg5[%c0_11, %c0_12], %12 {strides = array<i32>} : memref<8x256xf32, #tpu.memory_space<vmem>>, vector<8x256xf32>,
    } else {
    }
    return
  }
  func.func @transform_0(%arg0: i32, %arg1: i32, %arg2: i32) -> (i32, i32) {
    %c0_i32 = arith.constant 0 : i32
    return %arg0, %arg2 : i32, i32
  }
  func.func @transform_1(%arg0: i32, %arg1: i32, %arg2: i32) -> (i32, i32) {
    %c0_i32 = arith.constant 0 : i32
    return %arg2, %arg1 : i32, i32
  }
  func.func @transform_2(%arg0: i32, %arg1: i32, %arg2: i32) -> (i32, i32) {
    %c0_i32 = arith.constant 0 : i32
    return %arg0, %arg1 : i32, i32
  }
}

module attributes {stable_mosaic.version = 11 : i64} {
  func.func @_in_lrelu_kernel(%arg0: i32, %arg1: i32, %arg2: memref<1x4x128xf32, #tpu.memory_space<vmem>>, %arg3: memref<1x4x128xf32, #tpu.memory_space<vmem>>) attributes {dimension_semantics = [#tpu.dimension_semantics<parallel>, #tpu.dimension_semantics<parallel>], iteration_bounds = array<i64: 2, 4>, scalar_prefetch = 0 : i64, scratch_operands = 0 : i64, tpu.core_type = #tpu.core_type<tc>, window_params = [{transform_indices = @transform_0, window_bounds = array<i64: 1, 4, 128>}, {transform_indices = @transform_1, window_bounds = array<i64: 1, 4, 128>}]} {
    %c0 = arith.constant 0 : index
    %c0_0 = arith.constant 0 : index
    %c0_1 = arith.constant 0 : index
    %0 = vector.load %arg2[%c0, %c0_0, %c0_1] : memref<1x4x128xf32, #tpu.memory_space<vmem>>, vector<1x4x128xf32>
    %cst = arith.constant dense<0.000000e+00> : vector<1x128xf32>
    %1 = vector.multi_reduction <add>, %0, %cst [1] : vector<1x4x128xf32> to vector<1x128xf32>
    %2 = vector.shape_cast %1 : vector<1x128xf32> to vector<1x1x128xf32>
    %3 = arith.mulf %0, %0 : vector<1x4x128xf32>
    %cst_2 = arith.constant dense<0.000000e+00> : vector<1x128xf32>
    %4 = vector.multi_reduction <add>, %3, %cst_2 [1] : vector<1x4x128xf32> to vector<1x128xf32>
    %5 = vector.shape_cast %4 : vector<1x128xf32> to vector<1x1x128xf32>
    %cst_3 = arith.constant 2.500000e-01 : f32
    %6 = vector.broadcast %cst_3 : f32 to vector<1x1x128xf32>
    %7 = arith.mulf %2, %6 : vector<1x1x128xf32>
    %cst_4 = arith.constant 2.500000e-01 : f32
    %8 = vector.broadcast %cst_4 : f32 to vector<1x1x128xf32>
    %9 = arith.mulf %5, %8 : vector<1x1x128xf32>
    %10 = arith.mulf %7, %7 : vector<1x1x128xf32>
    %11 = arith.subf %9, %10 : vector<1x1x128xf32>
    %cst_5 = arith.constant 0.000000e+00 : f32
    %12 = vector.broadcast %cst_5 : f32 to vector<1x1x128xf32>
    %13 = arith.maximumf %11, %12 : vector<1x1x128xf32>
    %14 = vector.broadcast %7 : vector<1x1x128xf32> to vector<1x4x128xf32>
    %15 = arith.subf %0, %14 : vector<1x4x128xf32>
    %cst_6 = arith.constant 9.99999974E-6 : f32
    %16 = vector.broadcast %cst_6 : f32 to vector<1x1x128xf32>
    %17 = arith.addf %13, %16 : vector<1x1x128xf32>
    %18 = math.rsqrt %17 : vector<1x1x128xf32>
    %19 = vector.broadcast %18 : vector<1x1x128xf32> to vector<1x4x128xf32>
    %20 = arith.mulf %15, %19 : vector<1x4x128xf32>
    %cst_7 = arith.constant 0.000000e+00 : f32
    %21 = vector.broadcast %cst_7 : f32 to vector<1x4x128xf32>
    %22 = arith.cmpf ogt, %20, %21 : vector<1x4x128xf32>
    %cst_8 = arith.constant 2.000000e-01 : f32
    %23 = vector.broadcast %cst_8 : f32 to vector<1x4x128xf32>
    %24 = arith.mulf %23, %20 : vector<1x4x128xf32>
    %25 = arith.select %22, %20, %24 : vector<1x4x128xi1>, vector<1x4x128xf32>
    %c0_9 = arith.constant 0 : index
    %c0_10 = arith.constant 0 : index
    %c0_11 = arith.constant 0 : index
    %26 = vector.load %arg3[%c0_9, %c0_10, %c0_11] : memref<1x4x128xf32, #tpu.memory_space<vmem>>, vector<1x4x128xf32>
    tpu.vector_store %arg3[%c0_9, %c0_10, %c0_11], %25 {strides = array<i32>} : memref<1x4x128xf32, #tpu.memory_space<vmem>>, vector<1x4x128xf32>,
    return
  }
  func.func @transform_0(%arg0: i32, %arg1: i32) -> (i32, i32, i32) {
    %c0_i32 = arith.constant 0 : i32
    %c0_i32_0 = arith.constant 0 : i32
    return %arg0, %c0_i32, %arg1 : i32, i32, i32
  }
  func.func @transform_1(%arg0: i32, %arg1: i32) -> (i32, i32, i32) {
    %c0_i32 = arith.constant 0 : i32
    %c0_i32_0 = arith.constant 0 : i32
    return %arg0, %c0_i32, %arg1 : i32, i32, i32
  }
}

module attributes {stable_mosaic.version = 11 : i64} {
  func.func @_mm_kernel(%arg0: i32, %arg1: i32, %arg2: i32, %arg3: memref<8x512xbf16, #tpu.memory_space<vmem>>, %arg4: memref<512x128xbf16, #tpu.memory_space<vmem>>, %arg5: memref<1x128xf32, #tpu.memory_space<vmem>>, %arg6: memref<8x128xf32, #tpu.memory_space<vmem>>, %arg7: memref<8x128xf32, #tpu.memory_space<vmem>>) attributes {dimension_semantics = [#tpu.dimension_semantics<parallel>, #tpu.dimension_semantics<parallel>, #tpu.dimension_semantics<arbitrary>], iteration_bounds = array<i64: 1, 1, 1>, scalar_prefetch = 0 : i64, scratch_operands = 1 : i64, tpu.core_type = #tpu.core_type<tc>, window_params = [{transform_indices = @transform_0, window_bounds = array<i64: 8, 512>}, {transform_indices = @transform_1, window_bounds = array<i64: 512, 128>}, {transform_indices = @transform_2, window_bounds = array<i64: 1, 128>}, {transform_indices = @transform_3, window_bounds = array<i64: 8, 128>}]} {
    %c0_i32 = arith.constant 0 : i32
    %0 = arith.cmpi eq, %arg2, %c0_i32 : i32
    %1 = arith.extui %0 : i1 to i32
    %c0_i32_0 = arith.constant 0 : i32
    %2 = arith.cmpi ne, %1, %c0_i32_0 : i32
    scf.if %2 {
      %cst_10 = arith.constant 0.000000e+00 : f32
      %12 = vector.broadcast %cst_10 : f32 to vector<8x128xf32>
      %c0_11 = arith.constant 0 : index
      %c0_12 = arith.constant 0 : index
      %13 = vector.load %arg7[%c0_11, %c0_12] : memref<8x128xf32, #tpu.memory_space<vmem>>, vector<8x128xf32>
      tpu.vector_store %arg7[%c0_11, %c0_12], %12 {strides = array<i32>} : memref<8x128xf32, #tpu.memory_space<vmem>>, vector<8x128xf32>,
    } else {
    }
    %c0 = arith.constant 0 : index
    %c0_1 = arith.constant 0 : index
    %3 = vector.load %arg7[%c0, %c0_1] : memref<8x128xf32, #tpu.memory_space<vmem>>, vector<8x128xf32>
    %c0_2 = arith.constant 0 : index
    %c0_3 = arith.constant 0 : index
    %4 = vector.load %arg3[%c0_2, %c0_3] : memref<8x512xbf16, #tpu.memory_space<vmem>>, vector<8x512xbf16>
    %c0_4 = arith.constant 0 : index
    %c0_5 = arith.constant 0 : index
    %5 = vector.load %arg4[%c0_4, %c0_5] : memref<512x128xbf16, #tpu.memory_space<vmem>>, vector<512x128xbf16>
    %cst = arith.constant dense<0.000000e+00> : vector<8x128xf32>
    %6 = tpu.matmul %4, %5, %cst {dimension_numbers = #tpu.dot_dimension_numbers<[1], [0], [0], [1], [0, 0, 1, 1], [], []>} : vector<8x512xbf16>, vector<512x128xbf16>, vector<8x128xf32> -> vector<8x128xf32>
    %7 = arith.addf %3, %6 : vector<8x128xf32>
    %c0_6 = arith.constant 0 : index
    %c0_7 = arith.constant 0 : index
    %8 = vector.load %arg7[%c0_6, %c0_7] : memref<8x128xf32, #tpu.memory_space<vmem>>, vector<8x128xf32>
    tpu.vector_store %arg7[%c0_6, %c0_7], %7 {strides = array<i32>} : memref<8x128xf32, #tpu.memory_space<vmem>>, vector<8x128xf32>,
    %c0_i32_8 = arith.constant 0 : i32
    %9 = arith.cmpi eq, %arg2, %c0_i32_8 : i32
    %10 = arith.extui %9 : i1 to i32
    %c0_i32_9 = arith.constant 0 : i32
    %11 = arith.cmpi ne, %10, %c0_i32_9 : i32
    scf.if %11 {
      %c0_10 = arith.constant 0 : index
      %c0_11 = arith.constant 0 : index
      %12 = vector.load %arg7[%c0_10, %c0_11] : memref<8x128xf32, #tpu.memory_space<vmem>>, vector<8x128xf32>
      %c0_12 = arith.constant 0 : index
      %c0_13 = arith.constant 0 : index
      %13 = vector.load %arg5[%c0_12, %c0_13] : memref<1x128xf32, #tpu.memory_space<vmem>>, vector<1x128xf32>
      %14 = vector.broadcast %13 : vector<1x128xf32> to vector<8x128xf32>
      %15 = arith.addf %12, %14 : vector<8x128xf32>
      %c0_14 = arith.constant 0 : index
      %c0_15 = arith.constant 0 : index
      %16 = vector.load %arg6[%c0_14, %c0_15] : memref<8x128xf32, #tpu.memory_space<vmem>>, vector<8x128xf32>
      tpu.vector_store %arg6[%c0_14, %c0_15], %15 {strides = array<i32>} : memref<8x128xf32, #tpu.memory_space<vmem>>, vector<8x128xf32>,
    } else {
    }
    return
  }
  func.func @transform_0(%arg0: i32, %arg1: i32, %arg2: i32) -> (i32, i32) {
    %c0_i32 = arith.constant 0 : i32
    return %arg0, %arg2 : i32, i32
  }
  func.func @transform_1(%arg0: i32, %arg1: i32, %arg2: i32) -> (i32, i32) {
    %c0_i32 = arith.constant 0 : i32
    return %arg2, %arg1 : i32, i32
  }
  func.func @transform_2(%arg0: i32, %arg1: i32, %arg2: i32) -> (i32, i32) {
    %c0_i32 = arith.constant 0 : i32
    %c0_i32_0 = arith.constant 0 : i32
    return %c0_i32, %arg1 : i32, i32
  }
  func.func @transform_3(%arg0: i32, %arg1: i32, %arg2: i32) -> (i32, i32) {
    %c0_i32 = arith.constant 0 : i32
    return %arg0, %arg1 : i32, i32
  }
}

</mosaic_0001>

<bundles_post_ra>
// kernel: discriminator_forward.8
= control target key start
LH: loop header
LB: loop body
LE: loop exit
PB: predicated region body
PF: predicated region fallthrough
CT: control target
= control target key end

     0   :  { %s1751_s1 = inlined_call_operand.vmem [shape: bf16[128,128], index: 1, kind: input, shape index: {}]   ;;  %s1752_s0 = inlined_call_operand.vmem [shape: bf16[512,128], index: 0, kind: input, shape index: {}]   ;;  %s1753_s2 = inlined_call_operand.vmem [shape: f32[512,128], index: 2, kind: output, shape index: {}]  }
   0x1   :  { %v1384_v0 = vld [vmem:[%s1751_s1] sm:$0xff]   ;;  %v1385_v1 = vld [vmem:[%s1751_s1 + $0x8] sm:$0xff]   ;;  %v1386_v2 = vld [vmem:[%s1751_s1 + $0x10] sm:$0xff]  }
   0x2   :  { %1288 = vmatprep.subr.bf16.mxu0 %v1384_v0  ;;  %1368 = vmatprep.subr.bf16.mxu1 %v1384_v0  ;;  %v1387_v3 = vld [vmem:[%s1751_s1 + $0x18] sm:$0xff]   ;;  %v1392_v4 = vld [vmem:[%s1752_s0] sm:$0xff]   ;;  %v1389_v7 = vld [vmem:[%s1751_s1 + $0x28] sm:$0xff]  }
   0x3   :  { %1289 = vmatpush3.bf16.msra.mxu0 %v1384_v0  ;;  %1376 = vmatpush3.bf16.msra.mxu1 %v1384_v0  ;;  %v1393_v5 = vld [vmem:[%s1752_s0 + $0x80] sm:$0xff]   ;;  %v1390_v8 = vld [vmem:[%s1751_s1 + $0x30] sm:$0xff]   ;;  %v1391_v9 = vld [vmem:[%s1751_s1 + $0x38] sm:$0xff]  }
   0x4   :  { %1290 = vmatprep.subr.bf16.mxu0 %v1385_v1  ;;  %1369 = vmatprep.subr.bf16.mxu1 %v1385_v1  ;;  %v1388_v6 = vld [vmem:[%s1751_s1 + $0x20] sm:$0xff]   ;;  %v1394_v10 = vld [vmem:[%s1752_s0 + $0x8] sm:$0xff]   ;;  %v1396_v12 = vld [vmem:[%s1752_s0 + $0x10] sm:$0xff]  }
   0x5   :  { %1304 = vmatprep.mubr.bf16.mxu0 %v1392_v4  ;;  %1336 = vmatprep.mubr.bf16.mxu1 %v1393_v5  ;;  %v1395_v11 = vld [vmem:[%s1752_s0 + $0x88] sm:$0xff]   ;;  %v1397_v13 = vld [vmem:[%s1752_s0 + $0x90] sm:$0xff]   ;;  %v1398_v14 = vld [vmem:[%s1752_s0 + $0x18] sm:$0xff]  }
   0x6   :  { %v1399_v15 = vld [vmem:[%s1752_s0 + $0x98] sm:$0xff]   ;;  %v1400_v16 = vld [vmem:[%s1752_s0 + $0x20] sm:$0xff]   ;;  %v1402_v18 = vld [vmem:[%s1752_s0 + $0x28] sm:$0xff]  }
   0x7   :  { %1291 = vmatpush3.bf16.msra.mxu0 %v1385_v1  ;;  %1377 = vmatpush3.bf16.msra.mxu1 %v1385_v1  ;;  %v1401_v17 = vld [vmem:[%s1752_s0 + $0xa0] sm:$0xff]   ;;  %v1403_v19 = vld [vmem:[%s1752_s0 + $0xa8] sm:$0xff]   ;;  %v1404_v20 = vld [vmem:[%s1752_s0 + $0x30] sm:$0xff]  }
   0x8   :  { %1292 = vmatprep.subr.bf16.mxu0 %v1386_v2  ;;  %1370 = vmatprep.subr.bf16.mxu1 %v1386_v2  ;;  %v1405_v21 = vld [vmem:[%s1752_s0 + $0xb0] sm:$0xff]   ;;  %v1406_v22 = vld [vmem:[%s1752_s0 + $0x38] sm:$0xff]   ;;  %v1408_v24 = vld [vmem:[%s1752_s0 + $0x40] sm:$0xff]  }
   0x9   :  { %v1407_v23 = vld [vmem:[%s1752_s0 + $0xb8] sm:$0xff]   ;;  %v1409_v25 = vld [vmem:[%s1752_s0 + $0xc0] sm:$0xff]   ;;  %v1410_v26 = vld [vmem:[%s1752_s0 + $0x48] sm:$0xff]  }
   0xa   :  { %v1411_v27 = vld [vmem:[%s1752_s0 + $0xc8] sm:$0xff]   ;;  %v1412_v28 = vld [vmem:[%s1752_s0 + $0x50] sm:$0xff]   ;;  %v1414_v30 = vld [vmem:[%s1752_s0 + $0x58] sm:$0xff]  }
   0xb   :  { %1293 = vmatpush3.bf16.msra.mxu0 %v1386_v2  ;;  %1378 = vmatpush3.bf16.msra.mxu1 %v1386_v2  ;;  %v1413_v29 = vld [vmem:[%s1752_s0 + $0xd0] sm:$0xff]   ;;  %v1415_v31 = vld [vmem:[%s1752_s0 + $0xd8] sm:$0xff]   ;;  %v1416_v32 = vld [vmem:[%s1752_s0 + $0x60] sm:$0xff]  }
   0xc   :  { %1294 = vmatprep.subr.bf16.mxu0 %v1387_v3  ;;  %1371 = vmatprep.subr.bf16.mxu1 %v1387_v3  ;;  %v1417_v33 = vld [vmem:[%s1752_s0 + $0xe0] sm:$0xff]   ;;  %v1418_v34 = vld [vmem:[%s1752_s0 + $0x68] sm:$0xff]   ;;  %v1420_v36 = vld [vmem:[%s1752_s0 + $0x70] sm:$0xff]  }
   0xd   :  { %v1419_v35 = vld [vmem:[%s1752_s0 + $0xe8] sm:$0xff]   ;;  %v1421_v37 = vld [vmem:[%s1752_s0 + $0xf0] sm:$0xff]   ;;  %v1422_v38 = vld [vmem:[%s1752_s0 + $0x78] sm:$0xff]  }
   0xe   :  { %v1423_v39 = vld [vmem:[%s1752_s0 + $0xf8] sm:$0xff]  }
   0xf   :  { %1295 = vmatpush3.bf16.msra.mxu0 %v1387_v3  ;;  %1379 = vmatpush3.bf16.msra.mxu1 %v1387_v3 }
  0x10   :  { %1296 = vmatprep.subr.bf16.mxu0 %v1388_v6  ;;  %1372 = vmatprep.subr.bf16.mxu1 %v1388_v6 }
  0x13   :  { %1297 = vmatpush3.bf16.msra.mxu0 %v1388_v6  ;;  %1380 = vmatpush3.bf16.msra.mxu1 %v1388_v6 }
  0x14   :  { %1298 = vmatprep.subr.bf16.mxu0 %v1389_v7  ;;  %1373 = vmatprep.subr.bf16.mxu1 %v1389_v7 }
  0x17   :  { %1299 = vmatpush3.bf16.msra.mxu0 %v1389_v7  ;;  %1381 = vmatpush3.bf16.msra.mxu1 %v1389_v7 }
  0x18   :  { %1300 = vmatprep.subr.bf16.mxu0 %v1390_v8  ;;  %1374 = vmatprep.subr.bf16.mxu1 %v1390_v8 }
  0x1b   :  { %1301 = vmatpush3.bf16.msra.mxu0 %v1390_v8  ;;  %1382 = vmatpush3.bf16.msra.mxu1 %v1390_v8 }
  0x1c   :  { %1302 = vmatprep.subr.bf16.mxu0 %v1391_v9  ;;  %1375 = vmatprep.subr.bf16.mxu1 %v1391_v9 }
  0x1f   :  { %1303 = vmatpush3.bf16.msra.mxu0 %v1391_v9  ;;  %1383 = vmatpush3.bf16.msra.mxu1 %v1391_v9 }
  0x22   :  { %1305 = vmatmul.mubr.bf16.vlgmr.msra.gmra.mrb[0].mxu0 %v1394_v10  ;;  %1337 = vmatmul.mubr.bf16.vlgmr.msra.gmra.mrb[0].mxu1 %v1395_v11 }
  0x23   :  { %1308 = vmatprep.mubr.bf16.mxu0 %v1396_v12  ;;  %1340 = vmatprep.mubr.bf16.mxu1 %v1397_v13 }
  0x2a   :  { %1309 = vmatmul.mubr.bf16.gmra.mrb[4].mxu0 %v1398_v14  ;;  %1341 = vmatmul.mubr.bf16.gmra.mrb[4].mxu1 %v1399_v15 }
  0x2b   :  { %1312 = vmatprep.mubr.bf16.mxu0 %v1400_v16  ;;  %1344 = vmatprep.mubr.bf16.mxu1 %v1401_v17 }
  0x32   :  { %1313 = vmatmul.mubr.bf16.gmra.mrb[8].mxu0 %v1402_v18  ;;  %1345 = vmatmul.mubr.bf16.gmra.mrb[8].mxu1 %v1403_v19 }
  0x33   :  { %1316 = vmatprep.mubr.bf16.mxu0 %v1404_v20  ;;  %1348 = vmatprep.mubr.bf16.mxu1 %v1405_v21 }
  0x3a   :  { %1317 = vmatmul.mubr.bf16.gmra.mrb[12].mxu0 %v1406_v22  ;;  %1349 = vmatmul.mubr.bf16.gmra.mrb[12].mxu1 %v1407_v23 }
  0x3b   :  { %1320 = vmatprep.mubr.bf16.mxu0 %v1408_v24  ;;  %1352 = vmatprep.mubr.bf16.mxu1 %v1409_v25 }
  0x42   :  { %1321 = vmatmul.mubr.bf16.gmra.mrb[16].mxu0 %v1410_v26  ;;  %1353 = vmatmul.mubr.bf16.gmra.mrb[16].mxu1 %v1411_v27 }
  0x43   :  { %1324 = vmatprep.mubr.bf16.mxu0 %v1412_v28  ;;  %1356 = vmatprep.mubr.bf16.mxu1 %v1413_v29 }
  0x4a   :  { %1325 = vmatmul.mubr.bf16.gmra.mrb[20].mxu0 %v1414_v30  ;;  %1357 = vmatmul.mubr.bf16.gmra.mrb[20].mxu1 %v1415_v31 }
  0x4b   :  { %1328 = vmatprep.mubr.bf16.mxu0 %v1416_v32  ;;  %1360 = vmatprep.mubr.bf16.mxu1 %v1417_v33 }
  0x52   :  { %1329 = vmatmul.mubr.bf16.gmra.mrb[24].mxu0 %v1418_v34  ;;  %1361 = vmatmul.mubr.bf16.gmra.mrb[24].mxu1 %v1419_v35 }
  0x53   :  { %1332 = vmatprep.mubr.bf16.mxu0 %v1420_v36  ;;  %1364 = vmatprep.mubr.bf16.mxu1 %v1421_v37 }
  0x5a   :  { %1333 = vmatmul.mubr.bf16.gmra.mrb[28].mxu0 %v1422_v38  ;;  %1365 = vmatmul.mubr.bf16.gmra.mrb[28].mxu1 %v1423_v39 }
  0xf5   :  { %v1306_v40 = vpop.f32.mrb[0].mxu0  ;;  %v1338_v41 = vpop.f32.mrb[0].mxu1 }
  0xf6   :  { %vm950_vm0 = vcmp.gt.f32.partialorder %v1306_v40, 0.0  ;;  %v1014_v42 = vmul.f32 0.2, %v1306_v40  ;;  %vm982_vm1 = vcmp.gt.f32.partialorder %v1338_v41, 0.0  ;;  %v1046_v43 = vmul.f32 0.2, %v1338_v41 }
  0xf7   :  { %v498_v44 = vpop.f32.mrb[1].mxu0  ;;  %v626_v45 = vpop.f32.mrb[1].mxu1 }
  0xf8   :  { %v1078_v46 = vsel %vm950_vm0, %v1306_v40, %v1014_v42  ;;  %v1110_v47 = vsel %vm982_vm1, %v1338_v41, %v1046_v43  ;;  %vm948_vm2 = vcmp.gt.f32.partialorder %v498_v44, 0.0  ;;  %v1012_v48 = vmul.f32 0.2, %v498_v44  ;;  %v1307_v49 = vpop.f32.mrb[2].mxu0  ;;  %v1339_v50 = vpop.f32.mrb[2].mxu1 }
  0xf9   :  { %1142 = vst [vmem:[%s1753_s2 + $0x10] sm:$0xff] %v1078_v46  ;;  %1174 = vst [vmem:[%s1753_s2 + $0x110] sm:$0xff] %v1110_v47  ;;  %vm980_vm3 = vcmp.gt.f32.partialorder %v626_v45, 0.0  ;;  %v1044_v51 = vmul.f32 0.2, %v626_v45  ;;  %vm951_vm4 = vcmp.gt.f32.partialorder %v1307_v49, 0.0 }
  0xfa   :  { %v1015_v52 = vmul.f32 0.2, %v1307_v49  ;;  %v1076_v53 = vsel %vm948_vm2, %v498_v44, %v1012_v48  ;;  %vm983_vm5 = vcmp.gt.f32.partialorder %v1339_v50, 0.0  ;;  %v1047_v54 = vmul.f32 0.2, %v1339_v50  ;;  %v501_v55 = vpop.f32.mrb[3].mxu0 }
  0xfb   :  { %v629_v56 = vpop.f32.mrb[3].mxu1  ;;  %1140 = vst [vmem:[%s1753_s2] sm:$0xff] %v1076_v53  ;;  %v1108_v57 = vsel %vm980_vm3, %v626_v45, %v1044_v51  ;;  %vm949_vm6 = vcmp.gt.f32.partialorder %v501_v55, 0.0  ;;  %v1013_v59 = vmul.f32 0.2, %v501_v55 }
  0xfc   :  { %v1079_v58 = vsel %vm951_vm4, %v1307_v49, %v1015_v52  ;;  %1172 = vst [vmem:[%s1753_s2 + $0x100] sm:$0xff] %v1108_v57  ;;  %v1111_v60 = vsel %vm983_vm5, %v1339_v50, %v1047_v54  ;;  %vm981_vm7 = vcmp.gt.f32.partialorder %v629_v56, 0.0  ;;  %v1045_v61 = vmul.f32 0.2, %v629_v56 }
  0xfd   :  { %1143 = vst [vmem:[%s1753_s2 + $0x18] sm:$0xff] %v1079_v58  ;;  %1175 = vst [vmem:[%s1753_s2 + $0x118] sm:$0xff] %v1111_v60  ;;  %v1077_v62 = vsel %vm949_vm6, %v501_v55, %v1013_v59  ;;  %v1310_v63 = vpop.f32.mrb[4].mxu0  ;;  %v1342_v0 = vpop.f32.mrb[4].mxu1 }
  0xfe   :  { %1141 = vst [vmem:[%s1753_s2 + $0x8] sm:$0xff] %v1077_v62  ;;  %v1109_v1 = vsel %vm981_vm7, %v629_v56, %v1045_v61  ;;  %vm954_vm8 = vcmp.gt.f32.partialorder %v1310_v63, 0.0  ;;  %v1018_v2 = vmul.f32 0.2, %v1310_v63  ;;  %vm986_vm9 = vcmp.gt.f32.partialorder %v1342_v0, 0.0  ;;  %v514_v3 = vpop.f32.mrb[5].mxu0 }
  0xff   :  { %v642_v4 = vpop.f32.mrb[5].mxu1  ;;  %1173 = vst [vmem:[%s1753_s2 + $0x108] sm:$0xff] %v1109_v1  ;;  %v1050_v5 = vmul.f32 0.2, %v1342_v0  ;;  %vm952_vm10 = vcmp.gt.f32.partialorder %v514_v3, 0.0  ;;  %v1311_v9 = vpop.f32.mrb[6].mxu0 }
 0x100   :  { %v1016_v6 = vmul.f32 0.2, %v514_v3  ;;  %vm984_vm11 = vcmp.gt.f32.partialorder %v642_v4, 0.0  ;;  %v1082_v7 = vsel %vm954_vm8, %v1310_v63, %v1018_v2  ;;  %v1048_v8 = vmul.f32 0.2, %v642_v4  ;;  %v1343_v10 = vpop.f32.mrb[6].mxu1 }
 0x101   :  { %1146 = vst [vmem:[%s1753_s2 + $0x30] sm:$0xff] %v1082_v7  ;;  %v1114_v11 = vsel %vm986_vm9, %v1342_v0, %v1050_v5  ;;  %vm955_vm12 = vcmp.gt.f32.partialorder %v1311_v9, 0.0  ;;  %v1019_v13 = vmul.f32 0.2, %v1311_v9  ;;  %v517_v14 = vpop.f32.mrb[7].mxu0  ;;  %v645_v15 = vpop.f32.mrb[7].mxu1 }
 0x102   :  { %v1080_v12 = vsel %vm952_vm10, %v514_v3, %v1016_v6  ;;  %1178 = vst [vmem:[%s1753_s2 + $0x130] sm:$0xff] %v1114_v11  ;;  %v1112_v16 = vsel %vm984_vm11, %v642_v4, %v1048_v8  ;;  %vm987_vm13 = vcmp.gt.f32.partialorder %v1343_v10, 0.0  ;;  %v1051_v17 = vmul.f32 0.2, %v1343_v10 }
 0x103   :  { %1144 = vst [vmem:[%s1753_s2 + $0x20] sm:$0xff] %v1080_v12  ;;  %vm953_vm14 = vcmp.gt.f32.partialorder %v517_v14, 0.0  ;;  %1176 = vst [vmem:[%s1753_s2 + $0x120] sm:$0xff] %v1112_v16  ;;  %v1083_v18 = vsel %vm955_vm12, %v1311_v9, %v1019_v13  ;;  %v1017_v19 = vmul.f32 0.2, %v517_v14  ;;  %vm985_vm15 = vcmp.gt.f32.partialorder %v645_v15, 0.0 }
 0x104   :  { %v1049_v20 = vmul.f32 0.2, %v645_v15  ;;  %1147 = vst [vmem:[%s1753_s2 + $0x38] sm:$0xff] %v1083_v18  ;;  %v1115_v21 = vsel %vm987_vm13, %v1343_v10, %v1051_v17 }
 0x105   :  { %1179 = vst [vmem:[%s1753_s2 + $0x138] sm:$0xff] %v1115_v21  ;;  %v1081_v22 = vsel %vm953_vm14, %v517_v14, %v1017_v19  ;;  %v1314_v24 = vpop.f32.mrb[8].mxu0  ;;  %v1346_v25 = vpop.f32.mrb[8].mxu1 }
 0x106   :  { %v1113_v23 = vsel %vm985_vm15, %v645_v15, %v1049_v20  ;;  %1145 = vst [vmem:[%s1753_s2 + $0x28] sm:$0xff] %v1081_v22  ;;  %vm958_vm0 = vcmp.gt.f32.partialorder %v1314_v24, 0.0  ;;  %v1022_v26 = vmul.f32 0.2, %v1314_v24  ;;  %vm990_vm1 = vcmp.gt.f32.partialorder %v1346_v25, 0.0  ;;  %v530_v28 = vpop.f32.mrb[9].mxu0 }
 0x107   :  { %1177 = vst [vmem:[%s1753_s2 + $0x128] sm:$0xff] %v1113_v23  ;;  %v1054_v27 = vmul.f32 0.2, %v1346_v25  ;;  %v658_v29 = vpop.f32.mrb[9].mxu1  ;;  %vm956_vm2 = vcmp.gt.f32.partialorder %v530_v28, 0.0  ;;  %v1315_v33 = vpop.f32.mrb[10].mxu0 }
 0x108   :  { %v1086_v30 = vsel %vm958_vm0, %v1314_v24, %v1022_v26  ;;  %v1020_v32 = vmul.f32 0.2, %v530_v28  ;;  %v1347_v34 = vpop.f32.mrb[10].mxu1  ;;  %vm988_vm3 = vcmp.gt.f32.partialorder %v658_v29, 0.0  ;;  %v1052_v35 = vmul.f32 0.2, %v658_v29 }
 0x109   :  { %v1118_v31 = vsel %vm990_vm1, %v1346_v25, %v1054_v27  ;;  %1150 = vst [vmem:[%s1753_s2 + $0x50] sm:$0xff] %v1086_v30  ;;  %vm959_vm4 = vcmp.gt.f32.partialorder %v1315_v33, 0.0  ;;  %v1023_v36 = vmul.f32 0.2, %v1315_v33  ;;  %vm991_vm5 = vcmp.gt.f32.partialorder %v1347_v34, 0.0  ;;  %v533_v39 = vpop.f32.mrb[11].mxu0 }
 0x10a   :  { %1182 = vst [vmem:[%s1753_s2 + $0x150] sm:$0xff] %v1118_v31  ;;  %v1084_v37 = vsel %vm956_vm2, %v530_v28, %v1020_v32  ;;  %v1055_v38 = vmul.f32 0.2, %v1347_v34  ;;  %v661_v40 = vpop.f32.mrb[11].mxu1  ;;  %v1116_v41 = vsel %vm988_vm3, %v658_v29, %v1052_v35  ;;  %vm957_vm6 = vcmp.gt.f32.partialorder %v533_v39, 0.0 }
 0x10b   :  { %1148 = vst [vmem:[%s1753_s2 + $0x40] sm:$0xff] %v1084_v37  ;;  %v1087_v42 = vsel %vm959_vm4, %v1315_v33, %v1023_v36  ;;  %v1021_v43 = vmul.f32 0.2, %v533_v39  ;;  %1180 = vst [vmem:[%s1753_s2 + $0x140] sm:$0xff] %v1116_v41  ;;  %vm989_vm7 = vcmp.gt.f32.partialorder %v661_v40, 0.0 }
 0x10c   :  { %1151 = vst [vmem:[%s1753_s2 + $0x58] sm:$0xff] %v1087_v42  ;;  %v1119_v44 = vsel %vm991_vm5, %v1347_v34, %v1055_v38  ;;  %v1053_v45 = vmul.f32 0.2, %v661_v40 }
 0x10d   :  { %1183 = vst [vmem:[%s1753_s2 + $0x158] sm:$0xff] %v1119_v44  ;;  %v1085_v46 = vsel %vm957_vm6, %v533_v39, %v1021_v43  ;;  %v1318_v47 = vpop.f32.mrb[12].mxu0  ;;  %v1350_v48 = vpop.f32.mrb[12].mxu1 }
 0x10e   :  { %1149 = vst [vmem:[%s1753_s2 + $0x48] sm:$0xff] %v1085_v46  ;;  %v1117_v49 = vsel %vm989_vm7, %v661_v40, %v1053_v45  ;;  %vm962_vm8 = vcmp.gt.f32.partialorder %v1318_v47, 0.0  ;;  %v1026_v50 = vmul.f32 0.2, %v1318_v47  ;;  %vm994_vm9 = vcmp.gt.f32.partialorder %v1350_v48, 0.0  ;;  %v546_v51 = vpop.f32.mrb[13].mxu0 }
 0x10f   :  { %v674_v52 = vpop.f32.mrb[13].mxu1  ;;  %1181 = vst [vmem:[%s1753_s2 + $0x148] sm:$0xff] %v1117_v49  ;;  %v1058_v53 = vmul.f32 0.2, %v1350_v48  ;;  %vm960_vm10 = vcmp.gt.f32.partialorder %v546_v51, 0.0  ;;  %v1319_v57 = vpop.f32.mrb[14].mxu0 }
 0x110   :  { %v1024_v54 = vmul.f32 0.2, %v546_v51  ;;  %vm992_vm11 = vcmp.gt.f32.partialorder %v674_v52, 0.0  ;;  %v1090_v55 = vsel %vm962_vm8, %v1318_v47, %v1026_v50  ;;  %v1056_v56 = vmul.f32 0.2, %v674_v52  ;;  %v1351_v58 = vpop.f32.mrb[14].mxu1 }
 0x111   :  { %1154 = vst [vmem:[%s1753_s2 + $0x70] sm:$0xff] %v1090_v55  ;;  %v1122_v59 = vsel %vm994_vm9, %v1350_v48, %v1058_v53  ;;  %vm963_vm12 = vcmp.gt.f32.partialorder %v1319_v57, 0.0  ;;  %v1027_v61 = vmul.f32 0.2, %v1319_v57  ;;  %v549_v62 = vpop.f32.mrb[15].mxu0  ;;  %v677_v63 = vpop.f32.mrb[15].mxu1 }
 0x112   :  { %v1088_v60 = vsel %vm960_vm10, %v546_v51, %v1024_v54  ;;  %1186 = vst [vmem:[%s1753_s2 + $0x170] sm:$0xff] %v1122_v59  ;;  %v1120_v0 = vsel %vm992_vm11, %v674_v52, %v1056_v56  ;;  %vm995_vm13 = vcmp.gt.f32.partialorder %v1351_v58, 0.0  ;;  %v1059_v1 = vmul.f32 0.2, %v1351_v58 }
 0x113   :  { %1152 = vst [vmem:[%s1753_s2 + $0x60] sm:$0xff] %v1088_v60  ;;  %vm961_vm14 = vcmp.gt.f32.partialorder %v549_v62, 0.0  ;;  %1184 = vst [vmem:[%s1753_s2 + $0x160] sm:$0xff] %v1120_v0  ;;  %v1091_v2 = vsel %vm963_vm12, %v1319_v57, %v1027_v61  ;;  %v1025_v3 = vmul.f32 0.2, %v549_v62  ;;  %vm993_vm15 = vcmp.gt.f32.partialorder %v677_v63, 0.0 }
 0x114   :  { %v1057_v4 = vmul.f32 0.2, %v677_v63  ;;  %1155 = vst [vmem:[%s1753_s2 + $0x78] sm:$0xff] %v1091_v2  ;;  %v1123_v5 = vsel %vm995_vm13, %v1351_v58, %v1059_v1 }
 0x115   :  { %1187 = vst [vmem:[%s1753_s2 + $0x178] sm:$0xff] %v1123_v5  ;;  %v1089_v6 = vsel %vm961_vm14, %v549_v62, %v1025_v3  ;;  %v1322_v8 = vpop.f32.mrb[16].mxu0  ;;  %v1354_v9 = vpop.f32.mrb[16].mxu1 }
 0x116   :  { %v1121_v7 = vsel %vm993_vm15, %v677_v63, %v1057_v4  ;;  %1153 = vst [vmem:[%s1753_s2 + $0x68] sm:$0xff] %v1089_v6  ;;  %vm966_vm0 = vcmp.gt.f32.partialorder %v1322_v8, 0.0  ;;  %v1030_v10 = vmul.f32 0.2, %v1322_v8  ;;  %vm998_vm1 = vcmp.gt.f32.partialorder %v1354_v9, 0.0  ;;  %v562_v12 = vpop.f32.mrb[17].mxu0 }
 0x117   :  { %1185 = vst [vmem:[%s1753_s2 + $0x168] sm:$0xff] %v1121_v7  ;;  %v1062_v11 = vmul.f32 0.2, %v1354_v9  ;;  %v690_v13 = vpop.f32.mrb[17].mxu1  ;;  %vm964_vm2 = vcmp.gt.f32.partialorder %v562_v12, 0.0  ;;  %v1323_v17 = vpop.f32.mrb[18].mxu0 }
 0x118   :  { %v1094_v14 = vsel %vm966_vm0, %v1322_v8, %v1030_v10  ;;  %v1028_v16 = vmul.f32 0.2, %v562_v12  ;;  %v1355_v18 = vpop.f32.mrb[18].mxu1  ;;  %vm996_vm3 = vcmp.gt.f32.partialorder %v690_v13, 0.0  ;;  %v1060_v19 = vmul.f32 0.2, %v690_v13 }
 0x119   :  { %v1126_v15 = vsel %vm998_vm1, %v1354_v9, %v1062_v11  ;;  %1158 = vst [vmem:[%s1753_s2 + $0x90] sm:$0xff] %v1094_v14  ;;  %vm967_vm4 = vcmp.gt.f32.partialorder %v1323_v17, 0.0  ;;  %v1031_v20 = vmul.f32 0.2, %v1323_v17  ;;  %vm999_vm5 = vcmp.gt.f32.partialorder %v1355_v18, 0.0  ;;  %v565_v23 = vpop.f32.mrb[19].mxu0 }
 0x11a   :  { %1190 = vst [vmem:[%s1753_s2 + $0x190] sm:$0xff] %v1126_v15  ;;  %v1092_v21 = vsel %vm964_vm2, %v562_v12, %v1028_v16  ;;  %v1063_v22 = vmul.f32 0.2, %v1355_v18  ;;  %v693_v24 = vpop.f32.mrb[19].mxu1  ;;  %v1124_v25 = vsel %vm996_vm3, %v690_v13, %v1060_v19  ;;  %vm965_vm6 = vcmp.gt.f32.partialorder %v565_v23, 0.0 }
 0x11b   :  { %1156 = vst [vmem:[%s1753_s2 + $0x80] sm:$0xff] %v1092_v21  ;;  %v1095_v26 = vsel %vm967_vm4, %v1323_v17, %v1031_v20  ;;  %v1029_v27 = vmul.f32 0.2, %v565_v23  ;;  %1188 = vst [vmem:[%s1753_s2 + $0x180] sm:$0xff] %v1124_v25  ;;  %vm997_vm7 = vcmp.gt.f32.partialorder %v693_v24, 0.0 }
 0x11c   :  { %1159 = vst [vmem:[%s1753_s2 + $0x98] sm:$0xff] %v1095_v26  ;;  %v1127_v28 = vsel %vm999_vm5, %v1355_v18, %v1063_v22  ;;  %v1061_v29 = vmul.f32 0.2, %v693_v24 }
 0x11d   :  { %1191 = vst [vmem:[%s1753_s2 + $0x198] sm:$0xff] %v1127_v28  ;;  %v1093_v30 = vsel %vm965_vm6, %v565_v23, %v1029_v27  ;;  %v1326_v31 = vpop.f32.mrb[20].mxu0  ;;  %v1358_v32 = vpop.f32.mrb[20].mxu1 }
 0x11e   :  { %1157 = vst [vmem:[%s1753_s2 + $0x88] sm:$0xff] %v1093_v30  ;;  %v1125_v33 = vsel %vm997_vm7, %v693_v24, %v1061_v29  ;;  %vm970_vm8 = vcmp.gt.f32.partialorder %v1326_v31, 0.0  ;;  %v1034_v34 = vmul.f32 0.2, %v1326_v31  ;;  %vm1002_vm9 = vcmp.gt.f32.partialorder %v1358_v32, 0.0  ;;  %v578_v35 = vpop.f32.mrb[21].mxu0 }
 0x11f   :  { %v706_v36 = vpop.f32.mrb[21].mxu1  ;;  %1189 = vst [vmem:[%s1753_s2 + $0x188] sm:$0xff] %v1125_v33  ;;  %v1066_v37 = vmul.f32 0.2, %v1358_v32  ;;  %vm968_vm10 = vcmp.gt.f32.partialorder %v578_v35, 0.0  ;;  %v1327_v41 = vpop.f32.mrb[22].mxu0 }
 0x120   :  { %v1032_v38 = vmul.f32 0.2, %v578_v35  ;;  %vm1000_vm11 = vcmp.gt.f32.partialorder %v706_v36, 0.0  ;;  %v1098_v39 = vsel %vm970_vm8, %v1326_v31, %v1034_v34  ;;  %v1064_v40 = vmul.f32 0.2, %v706_v36  ;;  %v1359_v42 = vpop.f32.mrb[22].mxu1 }
 0x121   :  { %1162 = vst [vmem:[%s1753_s2 + $0xb0] sm:$0xff] %v1098_v39  ;;  %v1130_v43 = vsel %vm1002_vm9, %v1358_v32, %v1066_v37  ;;  %vm971_vm12 = vcmp.gt.f32.partialorder %v1327_v41, 0.0  ;;  %v1035_v45 = vmul.f32 0.2, %v1327_v41  ;;  %v581_v46 = vpop.f32.mrb[23].mxu0  ;;  %v709_v47 = vpop.f32.mrb[23].mxu1 }
 0x122   :  { %v1096_v44 = vsel %vm968_vm10, %v578_v35, %v1032_v38  ;;  %1194 = vst [vmem:[%s1753_s2 + $0x1b0] sm:$0xff] %v1130_v43  ;;  %v1128_v48 = vsel %vm1000_vm11, %v706_v36, %v1064_v40  ;;  %vm1003_vm13 = vcmp.gt.f32.partialorder %v1359_v42, 0.0  ;;  %v1067_v49 = vmul.f32 0.2, %v1359_v42 }
 0x123   :  { %1160 = vst [vmem:[%s1753_s2 + $0xa0] sm:$0xff] %v1096_v44  ;;  %vm969_vm14 = vcmp.gt.f32.partialorder %v581_v46, 0.0  ;;  %1192 = vst [vmem:[%s1753_s2 + $0x1a0] sm:$0xff] %v1128_v48  ;;  %v1099_v50 = vsel %vm971_vm12, %v1327_v41, %v1035_v45  ;;  %v1033_v51 = vmul.f32 0.2, %v581_v46  ;;  %vm1001_vm15 = vcmp.gt.f32.partialorder %v709_v47, 0.0 }
 0x124   :  { %v1065_v52 = vmul.f32 0.2, %v709_v47  ;;  %1163 = vst [vmem:[%s1753_s2 + $0xb8] sm:$0xff] %v1099_v50  ;;  %v1131_v53 = vsel %vm1003_vm13, %v1359_v42, %v1067_v49 }
 0x125   :  { %1195 = vst [vmem:[%s1753_s2 + $0x1b8] sm:$0xff] %v1131_v53  ;;  %v1097_v54 = vsel %vm969_vm14, %v581_v46, %v1033_v51  ;;  %v1330_v56 = vpop.f32.mrb[24].mxu0  ;;  %v1362_v57 = vpop.f32.mrb[24].mxu1 }
 0x126   :  { %v1129_v55 = vsel %vm1001_vm15, %v709_v47, %v1065_v52  ;;  %1161 = vst [vmem:[%s1753_s2 + $0xa8] sm:$0xff] %v1097_v54  ;;  %vm974_vm0 = vcmp.gt.f32.partialorder %v1330_v56, 0.0  ;;  %v1038_v58 = vmul.f32 0.2, %v1330_v56  ;;  %vm1006_vm1 = vcmp.gt.f32.partialorder %v1362_v57, 0.0  ;;  %v594_v60 = vpop.f32.mrb[25].mxu0 }
 0x127   :  { %1193 = vst [vmem:[%s1753_s2 + $0x1a8] sm:$0xff] %v1129_v55  ;;  %v1070_v59 = vmul.f32 0.2, %v1362_v57  ;;  %v722_v61 = vpop.f32.mrb[25].mxu1  ;;  %vm972_vm2 = vcmp.gt.f32.partialorder %v594_v60, 0.0  ;;  %v1331_v1 = vpop.f32.mrb[26].mxu0 }
 0x128   :  { %v1102_v62 = vsel %vm974_vm0, %v1330_v56, %v1038_v58  ;;  %v1036_v0 = vmul.f32 0.2, %v594_v60  ;;  %v1363_v2 = vpop.f32.mrb[26].mxu1  ;;  %vm1004_vm3 = vcmp.gt.f32.partialorder %v722_v61, 0.0  ;;  %v1068_v3 = vmul.f32 0.2, %v722_v61 }
 0x129   :  { %v1134_v63 = vsel %vm1006_vm1, %v1362_v57, %v1070_v59  ;;  %1166 = vst [vmem:[%s1753_s2 + $0xd0] sm:$0xff] %v1102_v62  ;;  %vm975_vm4 = vcmp.gt.f32.partialorder %v1331_v1, 0.0  ;;  %v1039_v4 = vmul.f32 0.2, %v1331_v1  ;;  %vm1007_vm5 = vcmp.gt.f32.partialorder %v1363_v2, 0.0  ;;  %v597_v7 = vpop.f32.mrb[27].mxu0 }
 0x12a   :  { %1198 = vst [vmem:[%s1753_s2 + $0x1d0] sm:$0xff] %v1134_v63  ;;  %v1100_v5 = vsel %vm972_vm2, %v594_v60, %v1036_v0  ;;  %v1071_v6 = vmul.f32 0.2, %v1363_v2  ;;  %v725_v8 = vpop.f32.mrb[27].mxu1  ;;  %v1132_v9 = vsel %vm1004_vm3, %v722_v61, %v1068_v3  ;;  %vm973_vm6 = vcmp.gt.f32.partialorder %v597_v7, 0.0 }
 0x12b   :  { %1164 = vst [vmem:[%s1753_s2 + $0xc0] sm:$0xff] %v1100_v5  ;;  %v1103_v10 = vsel %vm975_vm4, %v1331_v1, %v1039_v4  ;;  %v1037_v11 = vmul.f32 0.2, %v597_v7  ;;  %1196 = vst [vmem:[%s1753_s2 + $0x1c0] sm:$0xff] %v1132_v9  ;;  %vm1005_vm7 = vcmp.gt.f32.partialorder %v725_v8, 0.0 }
 0x12c   :  { %1167 = vst [vmem:[%s1753_s2 + $0xd8] sm:$0xff] %v1103_v10  ;;  %v1135_v12 = vsel %vm1007_vm5, %v1363_v2, %v1071_v6  ;;  %v1069_v13 = vmul.f32 0.2, %v725_v8 }
 0x12d   :  { %1199 = vst [vmem:[%s1753_s2 + $0x1d8] sm:$0xff] %v1135_v12  ;;  %v1101_v14 = vsel %vm973_vm6, %v597_v7, %v1037_v11  ;;  %v1334_v15 = vpop.f32.mrb[28].mxu0  ;;  %v1366_v16 = vpop.f32.mrb[28].mxu1 }
 0x12e   :  { %1165 = vst [vmem:[%s1753_s2 + $0xc8] sm:$0xff] %v1101_v14  ;;  %v1133_v17 = vsel %vm1005_vm7, %v725_v8, %v1069_v13  ;;  %vm978_vm8 = vcmp.gt.f32.partialorder %v1334_v15, 0.0  ;;  %v1042_v18 = vmul.f32 0.2, %v1334_v15  ;;  %vm1010_vm9 = vcmp.gt.f32.partialorder %v1366_v16, 0.0  ;;  %v610_v19 = vpop.f32.mrb[29].mxu0 }
 0x12f   :  { %v738_v20 = vpop.f32.mrb[29].mxu1  ;;  %1197 = vst [vmem:[%s1753_s2 + $0x1c8] sm:$0xff] %v1133_v17  ;;  %v1074_v21 = vmul.f32 0.2, %v1366_v16  ;;  %vm976_vm10 = vcmp.gt.f32.partialorder %v610_v19, 0.0  ;;  %v1335_v25 = vpop.f32.mrb[30].mxu0 }
 0x130   :  { %v1040_v22 = vmul.f32 0.2, %v610_v19  ;;  %vm1008_vm11 = vcmp.gt.f32.partialorder %v738_v20, 0.0  ;;  %v1106_v23 = vsel %vm978_vm8, %v1334_v15, %v1042_v18  ;;  %v1072_v24 = vmul.f32 0.2, %v738_v20  ;;  %v1367_v26 = vpop.f32.mrb[30].mxu1 }
 0x131   :  { %1170 = vst [vmem:[%s1753_s2 + $0xf0] sm:$0xff] %v1106_v23  ;;  %v1138_v27 = vsel %vm1010_vm9, %v1366_v16, %v1074_v21  ;;  %vm979_vm12 = vcmp.gt.f32.partialorder %v1335_v25, 0.0  ;;  %v1043_v29 = vmul.f32 0.2, %v1335_v25  ;;  %v613_v30 = vpop.f32.mrb[31].mxu0  ;;  %v741_v31 = vpop.f32.mrb[31].mxu1 }
 0x132   :  { %v1104_v28 = vsel %vm976_vm10, %v610_v19, %v1040_v22  ;;  %1202 = vst [vmem:[%s1753_s2 + $0x1f0] sm:$0xff] %v1138_v27  ;;  %v1136_v32 = vsel %vm1008_vm11, %v738_v20, %v1072_v24  ;;  %vm1011_vm13 = vcmp.gt.f32.partialorder %v1367_v26, 0.0  ;;  %v1075_v33 = vmul.f32 0.2, %v1367_v26 }
 0x133   :  { %1168 = vst [vmem:[%s1753_s2 + $0xe0] sm:$0xff] %v1104_v28  ;;  %vm977_vm14 = vcmp.gt.f32.partialorder %v613_v30, 0.0  ;;  %1200 = vst [vmem:[%s1753_s2 + $0x1e0] sm:$0xff] %v1136_v32  ;;  %v1107_v34 = vsel %vm979_vm12, %v1335_v25, %v1043_v29  ;;  %v1041_v35 = vmul.f32 0.2, %v613_v30  ;;  %vm1009_vm15 = vcmp.gt.f32.partialorder %v741_v31, 0.0 }
 0x134   :  { %v1073_v36 = vmul.f32 0.2, %v741_v31  ;;  %1171 = vst [vmem:[%s1753_s2 + $0xf8] sm:$0xff] %v1107_v34  ;;  %v1139_v37 = vsel %vm1011_vm13, %v1367_v26, %v1075_v33 }
 0x135   :  { %1203 = vst [vmem:[%s1753_s2 + $0x1f8] sm:$0xff] %v1139_v37  ;;  %v1105_v38 = vsel %vm977_vm14, %v613_v30, %v1041_v35 }
 0x136   :  { %v1137_v39 = vsel %vm1009_vm15, %v741_v31, %v1073_v36  ;;  %1169 = vst [vmem:[%s1753_s2 + $0xe8] sm:$0xff] %v1105_v38 }
 0x137   :  { %1201 = vst [vmem:[%s1753_s2 + $0x1e8] sm:$0xff] %v1137_v39 }

// kernel: discriminator_forward.10
= control target key start
LH: loop header
LB: loop body
LE: loop exit
PB: predicated region body
PF: predicated region fallthrough
CT: control target
= control target key end

     0   :  { %s401_s6 = smov 0   ;;  %s403_s7 = smov 0   ;;  %s451_s0 = inlined_call_operand.vmem [shape: f32[2,64,128], index: 0, kind: input, shape index: {}]   ;;  %s452_s1 = inlined_call_operand.vmem [shape: f32[2,64,128], index: 1, kind: output, shape index: {}]  }
   0x1   :  { %s405_s8 = smov 0  }
   0x2 LB: > { %s23_s9 = sadd.s32 1, %s385_s7  ;;  %p332_p0 = scmp.ge.s32.totalorder %s389_s8, 1  ;;  %s389_s8 = sphi %s405_s8, %s11_s8   ;;  %s385_s7 = sphi %s403_s7, %s454_s7   ;;  %s381_s6 = sphi %s401_s6, %s453_s6  }
   0x3   : > { %p25_p1 = scmp.ge.s32.totalorder %s23_s9, 2  ;;  %p106_p2 = scmp.lt.s32.totalorder %s389_s8, 3 }
   0x5   : > { %s456_s9 = smov (%p25_p1, %s23_s9), 0  ;;  %p107_p3 = pnand %p332_p0, %p106_p2 }
   0x6   : > { %p132_p4 = scmp.lt.s32.totalorder (!%p107_p3), %s381_s6, 1 }
   0x7   : > { %110 = sbr.rel (%p107_p3) target bundleno = 76 (0x4c), region = 24 }
   0xe   : > { %s458_s6 = smov (!%p132_p4, %s381_s6), 1 }
   0xf   : > { %s339_s10 = sshll.u32 %s458_s6, 6 }
  0x10   : > { %s139_s13 = scalar_lea.vmem %s451_s0, %s339_s10  ;;  %s432_s16 = scalar_lea.vmem %s452_s1, %s339_s10 }
  0x11   : > { %v148_v0 = vld [vmem:[%s139_s13] sm:$0xff]  ;;  %v149_v1 = vld [vmem:[%s139_s13 + $0x8] sm:$0xff]  ;;  %v150_v2 = vld [vmem:[%s139_s13 + $0x10] sm:$0xff] }
  0x12   : > { %v151_v3 = vld [vmem:[%s139_s13 + $0x18] sm:$0xff]  ;;  %v156_v4 = vadd.f32 %v149_v1, %v148_v0  ;;  %v169_v5 = vmul.f32 %v148_v0, %v148_v0  ;;  %v170_v6 = vmul.f32 %v149_v1, %v149_v1  ;;  %v171_v7 = vmul.f32 %v150_v2, %v150_v2  ;;  %v152_v8 = vld [vmem:[%s139_s13 + $0x20] sm:$0xff]  ;;  %v153_v12 = vld [vmem:[%s139_s13 + $0x28] sm:$0xff] }
  0x13   : > { %v172_v10 = vmul.f32 %v151_v3, %v151_v3  ;;  %v173_v14 = vmul.f32 %v152_v8, %v152_v8  ;;  %v154_v16 = vld [vmem:[%s139_s13 + $0x30] sm:$0xff]  ;;  %v174_v18 = vmul.f32 %v153_v12, %v153_v12  ;;  %v155_v20 = vld [vmem:[%s139_s13 + $0x38] sm:$0xff] }
  0x14   : > { %v157_v9 = vadd.f32 %v156_v4, %v150_v2  ;;  %v177_v11 = vadd.f32 %v170_v6, %v169_v5  ;;  %v175_v22 = vmul.f32 %v154_v16, %v154_v16  ;;  %v176_v25 = vmul.f32 %v155_v20, %v155_v20 }
  0x16   : > { %v158_v13 = vadd.f32 %v157_v9, %v151_v3  ;;  %v178_v15 = vadd.f32 %v177_v11, %v171_v7 }
  0x18   : > { %v159_v17 = vadd.f32 %v158_v13, %v152_v8  ;;  %v179_v19 = vadd.f32 %v178_v15, %v172_v10 }
  0x1a   : > { %v160_v21 = vadd.f32 %v159_v17, %v153_v12  ;;  %v180_v23 = vadd.f32 %v179_v19, %v173_v14 }
  0x1c   : > { %v161_v24 = vadd.f32 %v160_v21, %v154_v16  ;;  %v181_v26 = vadd.f32 %v180_v23, %v174_v18 }
  0x1e   : > { %v162_v27 = vadd.f32 %v161_v24, %v155_v20  ;;  %v182_v28 = vadd.f32 %v181_v26, %v175_v22 }
  0x20   : > { %v163_v29 = vrot.slane %v162_v27, 4  ;;  %v183_v30 = vadd.f32 %v182_v28, %v176_v25 }
  0x22   : > { %v164_v31 = vadd.f32 %v163_v29, %v162_v27  ;;  %v184_v32 = vrot.slane %v183_v30, 4 }
  0x24   : > { %v165_v33 = vrot.slane %v164_v31, 2  ;;  %v185_v34 = vadd.f32 %v184_v32, %v183_v30 }
  0x26   : > { %v166_v35 = vadd.f32 %v165_v33, %v164_v31  ;;  %v186_v36 = vrot.slane %v185_v34, 2 }
  0x28   : > { %v167_v37 = vrot.slane %v166_v35, 1  ;;  %v187_v38 = vadd.f32 %v186_v36, %v185_v34 }
  0x2a   : > { %v168_v39 = vadd.f32 %v167_v37, %v166_v35  ;;  %v188_v40 = vrot.slane %v187_v38, 1 }
  0x2c   : > { %v189_v41 = vadd.f32 %v188_v40, %v187_v38  ;;  %v190_v42 = vmul.f32 0.015625, %v168_v39 }
  0x2e   : > { %v191_v43 = vmul.f32 0.015625, %v189_v41  ;;  %v192_v44 = vmul.f32 %v190_v42, %v190_v42  ;;  %v195_v48 = vsub.f32 %v148_v0, %v190_v42  ;;  %v196_v49 = vsub.f32 %v149_v1, %v190_v42 }
  0x2f   : > { %v197_v50 = vsub.f32 %v150_v2, %v190_v42  ;;  %v198_v51 = vsub.f32 %v151_v3, %v190_v42  ;;  %v199_v52 = vsub.f32 %v152_v8, %v190_v42  ;;  %v200_v53 = vsub.f32 %v153_v12, %v190_v42 }
  0x30   : > { %v193_v45 = vsub.f32 %v191_v43, %v192_v44  ;;  %v201_v54 = vsub.f32 %v154_v16, %v190_v42  ;;  %v202_v55 = vsub.f32 %v155_v20, %v190_v42 }
  0x32   : > { %v194_v46 = vmax.f32 %v193_v45, 0.0 }
  0x34   : > { %v203_v47 = vadd.f32 1e-05, %v194_v46 }
  0x36   : > { %365 = vrsqrt.f32 %v203_v47 }
  0x40   : > { %v366_v56 = vpop.eup %365 }
  0x41   : > { %v205_v57 = vmul.f32 %v366_v56, %v195_v48  ;;  %v206_v58 = vmul.f32 %v366_v56, %v196_v49  ;;  %v207_v59 = vmul.f32 %v366_v56, %v197_v50  ;;  %v208_v60 = vmul.f32 %v366_v56, %v198_v51 }
  0x42   : > { %v209_v61 = vmul.f32 %v366_v56, %v199_v52  ;;  %v210_v62 = vmul.f32 %v366_v56, %v200_v53  ;;  %v211_v63 = vmul.f32 %v366_v56, %v201_v54  ;;  %v212_v4 = vmul.f32 %v366_v56, %v202_v55 }
  0x43   : > { %vm213_vm0 = vcmp.gt.f32.partialorder %v205_v57, 0.0  ;;  %v221_v0 = vmul.f32 0.2, %v205_v57  ;;  %vm214_vm1 = vcmp.gt.f32.partialorder %v206_v58, 0.0  ;;  %v222_v1 = vmul.f32 0.2, %v206_v58 }
  0x44   : > { %vm215_vm2 = vcmp.gt.f32.partialorder %v207_v59, 0.0  ;;  %v223_v2 = vmul.f32 0.2, %v207_v59  ;;  %vm216_vm3 = vcmp.gt.f32.partialorder %v208_v60, 0.0  ;;  %v224_v3 = vmul.f32 0.2, %v208_v60 }
  0x45   : > { %v229_v5 = vsel %vm213_vm0, %v205_v57, %v221_v0  ;;  %v230_v6 = vsel %vm214_vm1, %v206_v58, %v222_v1  ;;  %vm217_vm4 = vcmp.gt.f32.partialorder %v209_v61, 0.0  ;;  %v225_v7 = vmul.f32 0.2, %v209_v61 }
  0x46   : > { %237 = vst [vmem:[%s432_s16] sm:$0xff] %v229_v5  ;;  %238 = vst [vmem:[%s432_s16 + $0x8] sm:$0xff] %v230_v6  ;;  %v231_v8 = vsel %vm215_vm2, %v207_v59, %v223_v2  ;;  %v232_v9 = vsel %vm216_vm3, %v208_v60, %v224_v3  ;;  %vm218_vm5 = vcmp.gt.f32.partialorder %v210_v62, 0.0  ;;  %v226_v10 = vmul.f32 0.2, %v210_v62 }
  0x47   : > { %239 = vst [vmem:[%s432_s16 + $0x10] sm:$0xff] %v231_v8  ;;  %240 = vst [vmem:[%s432_s16 + $0x18] sm:$0xff] %v232_v9  ;;  %v233_v11 = vsel %vm217_vm4, %v209_v61, %v225_v7  ;;  %vm219_vm6 = vcmp.gt.f32.partialorder %v211_v63, 0.0  ;;  %v227_v12 = vmul.f32 0.2, %v211_v63  ;;  %vm220_vm7 = vcmp.gt.f32.partialorder %v212_v4, 0.0 }
  0x48   : > { %241 = vst [vmem:[%s432_s16 + $0x20] sm:$0xff] %v233_v11  ;;  %v234_v13 = vsel %vm218_vm5, %v210_v62, %v226_v10  ;;  %v228_v14 = vmul.f32 0.2, %v212_v4 }
  0x49   : > { %242 = vst [vmem:[%s432_s16 + $0x28] sm:$0xff] %v234_v13  ;;  %v235_v15 = vsel %vm219_vm6, %v211_v63, %v227_v12 }
  0x4a   : > { %243 = vst [vmem:[%s432_s16 + $0x30] sm:$0xff] %v235_v15  ;;  %v236_v16 = vsel %vm220_vm7, %v212_v4, %v228_v14 }
  0x4b   : > { %244 = vst [vmem:[%s432_s16 + $0x38] sm:$0xff] %v236_v16 }
  0x4c PF: > { %s11_s8 = sadd.s32 1, %s389_s8   ;;  %s453_s6 = smov %s385_s7 }
  0x4d   : > { %p8_p5 = scmp.ge.s32.totalorder %s11_s8, 4   ;;  %s454_s7 = smov %s456_s9 }
  0x4f   :  { %10 = sbr.rel (!%p8_p5) target bundleno = 2 (0x2), region = 54 }

// kernel: discriminator_forward.9
= control target key start
LH: loop header
LB: loop body
LE: loop exit
PB: predicated region body
PF: predicated region fallthrough
CT: control target
= control target key end

     0   :  { %s1526_s9 = smov 0   ;;  %s1528_s10 = smov 0   ;;  %s1777_s0 = inlined_call_operand.vmem [shape: bf16[128,1024], index: 0, kind: input, shape index: {}]   ;;  %s1778_s1 = inlined_call_operand.vmem [shape: bf16[1024,128], index: 1, kind: input, shape index: {}]   ;;  %s1779_s2 = inlined_call_operand.vmem [shape: f32[128,128], index: 2, kind: output, shape index: {}]  }
   0x1   :  { %s1530_s11 = smov 0   ;;  %s1532_s12 = smov 0  }
   0x2   :  { %s1534_s13 = smov 0  }
   0x3 LB: > { %s24_s14 = sadd.s32 1, %s1504_s12  ;;  %p47_p1 = scmp.ne.s32.totalorder %s1496_s10, %s1492_s9  ;;  %s1508_s13 = sphi %s1534_s13, %s12_s13   ;;  %s1504_s12 = sphi %s1532_s12, %s1783_s12   ;;  %s1500_s11 = sphi %s1530_s11, %s1782_s11   ;;  %s1496_s10 = sphi %s1528_s10, %s1781_s10   ;;  %s1492_s9 = sphi %s1526_s9, %s1780_s9  }
   0x4   : > { %p25_p0 = scmp.ge.s32.totalorder %s24_s14, 2  ;;  %p48_p2 = scmp.eq.s32.totalorder %s1508_s13, 0 }
   0x5   : > { %s40_s16 = sadd.s32 1, %s1496_s10  ;;  %p1142_p5 = scmp.ge.s32.totalorder %s1508_s13, 2 }
   0x6   : > { %s1785_s14 = smov (%p25_p0, %s24_s14), 0  ;;  %p49_p3 = por %p48_p2, %p47_p1 }
   0x7   : > { %s36_s15 = ssub.s32 %s1504_s12, %s1785_s14  ;;  %129 = sbr.rel (%p1142_p5) target bundleno = 34 (0x22), region = 16 }
   0x8   : > { %p38_p4 = scmp.eq.s32.totalorder %s36_s15, 0 }
   0xa   : > { %s1561_s17 = scalar_select %p38_p4, %s1496_s10, %s40_s16  }
   0xe   : > { %132 = sbr.rel (!%p49_p3) target bundleno = 34 (0x22), region = 20  ;;  %s134_s18 = sand.u32 (%p49_p3), 1, %s1496_s10  }
   0xf   : > { %s1220_s19 = sshll.u32 (%p49_p3), %s1504_s12, 4  ;;  %s1143_s20 = sshll.u32 (%p49_p3), %s134_s18, 8 }
  0x10   : > { %s1569_s23 = scalar_lea.vmem (%p49_p3), %s1777_s0, %s1220_s19  ;;  %s1574_s24 = scalar_lea.vmem (%p49_p3), [#allocation3], %s1143_s20 }
  0x11   : > { %v155_v0 = vld [vmem:[%s1569_s23] sm:$0xff] (%p49_p3)  ;;  %v157_v1 = vld [vmem:[%s1569_s23 + $0x8] sm:$0xff] (%p49_p3) }
  0x12   : > { %v159_v2 = vld [vmem:[%s1569_s23 + $0x20] sm:$0xff] (%p49_p3)  ;;  %156 = vst [vmem:[%s1574_s24] sm:$0xff] (%p49_p3), %v155_v0  ;;  %158 = vst [vmem:[%s1574_s24 + $0x8] sm:$0xff] (%p49_p3), %v157_v1  ;;  %v161_v3 = vld [vmem:[%s1569_s23 + $0x28] sm:$0xff] (%p49_p3) }
  0x13   : > { %160 = vst [vmem:[%s1574_s24 + $0x10] sm:$0xff] (%p49_p3), %v159_v2  ;;  %v163_v4 = vld [vmem:[%s1569_s23 + $0x40] sm:$0xff] (%p49_p3)  ;;  %v165_v5 = vld [vmem:[%s1569_s23 + $0x48] sm:$0xff] (%p49_p3)  ;;  %162 = vst [vmem:[%s1574_s24 + $0x18] sm:$0xff] (%p49_p3), %v161_v3 }
  0x14   : > { %164 = vst [vmem:[%s1574_s24 + $0x20] sm:$0xff] (%p49_p3), %v163_v4  ;;  %166 = vst [vmem:[%s1574_s24 + $0x28] sm:$0xff] (%p49_p3), %v165_v5  ;;  %v167_v6 = vld [vmem:[%s1569_s23 + $0x60] sm:$0xff] (%p49_p3)  ;;  %v169_v7 = vld [vmem:[%s1569_s23 + $0x68] sm:$0xff] (%p49_p3) }
  0x15   : > { %v171_v8 = vld [vmem:[%s1569_s23 + $0x80] sm:$0xff]  ;;  %168 = vst [vmem:[%s1574_s24 + $0x30] sm:$0xff] %v167_v6  ;;  %170 = vst [vmem:[%s1574_s24 + $0x38] sm:$0xff] %v169_v7  ;;  %v173_v9 = vld [vmem:[%s1569_s23 + $0x88] sm:$0xff] }
  0x16   : > { %172 = vst [vmem:[%s1574_s24 + $0x40] sm:$0xff] %v171_v8  ;;  %v175_v10 = vld [vmem:[%s1569_s23 + $0xa0] sm:$0xff]  ;;  %v177_v11 = vld [vmem:[%s1569_s23 + $0xa8] sm:$0xff]  ;;  %174 = vst [vmem:[%s1574_s24 + $0x48] sm:$0xff] %v173_v9 }
  0x17   : > { %176 = vst [vmem:[%s1574_s24 + $0x50] sm:$0xff] %v175_v10  ;;  %178 = vst [vmem:[%s1574_s24 + $0x58] sm:$0xff] %v177_v11  ;;  %v179_v12 = vld [vmem:[%s1569_s23 + $0xc0] sm:$0xff]  ;;  %v181_v13 = vld [vmem:[%s1569_s23 + $0xc8] sm:$0xff] }
  0x18   : > { %v183_v14 = vld [vmem:[%s1569_s23 + $0xe0] sm:$0xff]  ;;  %180 = vst [vmem:[%s1574_s24 + $0x60] sm:$0xff] %v179_v12  ;;  %182 = vst [vmem:[%s1574_s24 + $0x68] sm:$0xff] %v181_v13  ;;  %v185_v15 = vld [vmem:[%s1569_s23 + $0xe8] sm:$0xff] }
  0x19   : > { %184 = vst [vmem:[%s1574_s24 + $0x70] sm:$0xff] %v183_v14  ;;  %v187_v16 = vld [vmem:[%s1569_s23 + $0x100] sm:$0xff]  ;;  %v189_v17 = vld [vmem:[%s1569_s23 + $0x108] sm:$0xff]  ;;  %186 = vst [vmem:[%s1574_s24 + $0x78] sm:$0xff] %v185_v15 }
  0x1a   : > { %188 = vst [vmem:[%s1574_s24 + $0x80] sm:$0xff] %v187_v16  ;;  %190 = vst [vmem:[%s1574_s24 + $0x88] sm:$0xff] %v189_v17  ;;  %v191_v18 = vld [vmem:[%s1569_s23 + $0x120] sm:$0xff]  ;;  %v193_v19 = vld [vmem:[%s1569_s23 + $0x128] sm:$0xff] }
  0x1b   : > { %v195_v20 = vld [vmem:[%s1569_s23 + $0x140] sm:$0xff]  ;;  %192 = vst [vmem:[%s1574_s24 + $0x90] sm:$0xff] %v191_v18  ;;  %194 = vst [vmem:[%s1574_s24 + $0x98] sm:$0xff] %v193_v19  ;;  %v197_v21 = vld [vmem:[%s1569_s23 + $0x148] sm:$0xff] }
  0x1c   : > { %196 = vst [vmem:[%s1574_s24 + $0xa0] sm:$0xff] %v195_v20  ;;  %v199_v22 = vld [vmem:[%s1569_s23 + $0x160] sm:$0xff]  ;;  %v201_v23 = vld [vmem:[%s1569_s23 + $0x168] sm:$0xff]  ;;  %198 = vst [vmem:[%s1574_s24 + $0xa8] sm:$0xff] %v197_v21 }
  0x1d   : > { %200 = vst [vmem:[%s1574_s24 + $0xb0] sm:$0xff] %v199_v22  ;;  %202 = vst [vmem:[%s1574_s24 + $0xb8] sm:$0xff] %v201_v23  ;;  %v203_v24 = vld [vmem:[%s1569_s23 + $0x180] sm:$0xff]  ;;  %v205_v25 = vld [vmem:[%s1569_s23 + $0x188] sm:$0xff] }
  0x1e   : > { %v207_v26 = vld [vmem:[%s1569_s23 + $0x1a0] sm:$0xff]  ;;  %204 = vst [vmem:[%s1574_s24 + $0xc0] sm:$0xff] %v203_v24  ;;  %206 = vst [vmem:[%s1574_s24 + $0xc8] sm:$0xff] %v205_v25  ;;  %v209_v27 = vld [vmem:[%s1569_s23 + $0x1a8] sm:$0xff] }
  0x1f   : > { %208 = vst [vmem:[%s1574_s24 + $0xd0] sm:$0xff] %v207_v26  ;;  %v211_v28 = vld [vmem:[%s1569_s23 + $0x1c0] sm:$0xff]  ;;  %v213_v29 = vld [vmem:[%s1569_s23 + $0x1c8] sm:$0xff]  ;;  %210 = vst [vmem:[%s1574_s24 + $0xd8] sm:$0xff] %v209_v27 }
  0x20   : > { %212 = vst [vmem:[%s1574_s24 + $0xe0] sm:$0xff] %v211_v28  ;;  %214 = vst [vmem:[%s1574_s24 + $0xe8] sm:$0xff] %v213_v29  ;;  %v215_v30 = vld [vmem:[%s1569_s23 + $0x1e0] sm:$0xff]  ;;  %v217_v31 = vld [vmem:[%s1569_s23 + $0x1e8] sm:$0xff] }
  0x21   : > { %216 = vst [vmem:[%s1574_s24 + $0xf0] sm:$0xff] %v215_v30  ;;  %218 = vst [vmem:[%s1574_s24 + $0xf8] sm:$0xff] %v217_v31 }
  0x22 PF: > { %p1146_p6 = scmp.ge.s32.totalorder %s1508_s13, 1  ;;  %p235_p7 = scmp.lt.s32.totalorder %s1508_s13, 3 }
  0x24   : > { %p236_p8 = pnand %p1146_p6, %p235_p7 }
  0x25   : > { %s242_s25 = sand.u32 (!%p236_p8), 1, %s1492_s9   ;;  %s1148_s26 = sshll.u32 (!%p236_p8), %s1500_s11, 6 }
  0x26   : > { %239 = sbr.rel (%p236_p8) target bundleno = 376 (0x178), region = 47  ;;  %s1147_s27 = sshll.u32 (!%p236_p8), %s242_s25, 8 }
  0x27   : > { %p277_p9 = scmp.lt.s32.totalorder (!%p236_p8), %s1148_s26, 127  ;;  %s1646_s4 = scalar_lea.vmem (!%p236_p8), [#allocation3], %s1147_s27 }
  0x28   : > { %p1150_p10 = scmp.ne.s32.totalorder (!%p236_p8), %s1500_s11, 0 }
  0x2d   : > { %s1787_s26 = smov (!%p277_p9, %s1148_s26), 127  ;;  %298 = sbr.rel (%p1150_p10) target bundleno = 55 (0x37), region = 55 }
  0x2e   : > { %s1149_s28 = sshll.u32 %s1787_s26, 2  ;;  %v1510_v32 = vmov (!%p1150_p10), 0.0  }
  0x2f   : > { %s1644_s3 = scalar_lea.vmem %s1778_s1, %s1149_s28  ;;  %299 = vst [vmem:[#allocation2] sm:$0xff] (!%p1150_p10), %v1510_v32  ;;  %300 = vst [vmem:[#allocation2 + $0x8] sm:$0xff] (!%p1150_p10), %v1510_v32 }
  0x30   : > { %301 = vst [vmem:[#allocation2 + $0x10] sm:$0xff] (!%p1150_p10), %v1510_v32  ;;  %302 = vst [vmem:[#allocation2 + $0x18] sm:$0xff] (!%p1150_p10), %v1510_v32 }
  0x31   : > { %303 = vst [vmem:[#allocation2 + $0x20] sm:$0xff] (!%p1150_p10), %v1510_v32  ;;  %304 = vst [vmem:[#allocation2 + $0x28] sm:$0xff] (!%p1150_p10), %v1510_v32 }
  0x32   : > { %305 = vst [vmem:[#allocation2 + $0x30] sm:$0xff] (!%p1150_p10), %v1510_v32  ;;  %306 = vst [vmem:[#allocation2 + $0x38] sm:$0xff] (!%p1150_p10), %v1510_v32 }
  0x33   : > { %307 = vst [vmem:[#allocation2 + $0x40] sm:$0xff] (!%p1150_p10), %v1510_v32  ;;  %308 = vst [vmem:[#allocation2 + $0x48] sm:$0xff] (!%p1150_p10), %v1510_v32 }
  0x34   : > { %309 = vst [vmem:[#allocation2 + $0x50] sm:$0xff] %v1510_v32  ;;  %310 = vst [vmem:[#allocation2 + $0x58] sm:$0xff] %v1510_v32 }
  0x35   : > { %311 = vst [vmem:[#allocation2 + $0x60] sm:$0xff] %v1510_v32  ;;  %312 = vst [vmem:[#allocation2 + $0x68] sm:$0xff] %v1510_v32 }
  0x36   : > { %313 = vst [vmem:[#allocation2 + $0x70] sm:$0xff] %v1510_v32  ;;  %314 = vst [vmem:[#allocation2 + $0x78] sm:$0xff] %v1510_v32 }
  0x37 PF: > { %v1390_v33 = vld [vmem:[%s1644_s3 + $0x40] sm:$0xff]   ;;  %v1394_v37 = vld [vmem:[%s1644_s3 + $0x48] sm:$0xff]   ;;  %v1398_v41 = vld [vmem:[%s1644_s3 + $0x50] sm:$0xff]   ;;  %p1215_p11 = scmp.ne.s32.totalorder %s1500_s11, 1 }
  0x38   : > { %v1391_v34 = vld [vmem:[%s1644_s3 + $0xc0] sm:$0xff]   ;;  %1221 = vmatprep.subr.bf16.mxu0 %v1390_v33  ;;  %v1395_v38 = vld [vmem:[%s1644_s3 + $0xc8] sm:$0xff]   ;;  %v1399_v42 = vld [vmem:[%s1644_s3 + $0xd0] sm:$0xff]  }
  0x39   : > { %v1392_v35 = vld [vmem:[%s1644_s3] sm:$0xff]   ;;  %1285 = vmatprep.subr.bf16.mxu1 %v1391_v34  ;;  %v1396_v39 = vld [vmem:[%s1644_s3 + $0x8] sm:$0xff]   ;;  %v1400_v43 = vld [vmem:[%s1644_s3 + $0x10] sm:$0xff]  }
  0x3a   : > { %v1393_v36 = vld [vmem:[%s1644_s3 + $0x80] sm:$0xff]   ;;  %1222 = vmatpush3.bf16.msra.mxu0 %v1392_v35  ;;  %v1397_v40 = vld [vmem:[%s1644_s3 + $0x88] sm:$0xff]   ;;  %v1401_v44 = vld [vmem:[%s1644_s3 + $0x90] sm:$0xff]  }
  0x3b   : > { %1286 = vmatpush3.bf16.msra.mxu1 %v1393_v36  ;;  %1223 = vmatprep.subr.bf16.mxu0 %v1394_v37  ;;  %v1402_v45 = vld [vmem:[%s1644_s3 + $0x58] sm:$0xff]   ;;  %v1406_v49 = vld [vmem:[%s1644_s3 + $0x60] sm:$0xff]   ;;  %v1410_v53 = vld [vmem:[%s1644_s3 + $0x68] sm:$0xff]  }
  0x3c   : > { %1287 = vmatprep.subr.bf16.mxu1 %v1395_v38  ;;  %v1403_v46 = vld [vmem:[%s1644_s3 + $0xd8] sm:$0xff]   ;;  %v1407_v50 = vld [vmem:[%s1644_s3 + $0xe0] sm:$0xff]   ;;  %v1411_v54 = vld [vmem:[%s1644_s3 + $0xe8] sm:$0xff]  }
  0x3d   : > { %v1404_v47 = vld [vmem:[%s1644_s3 + $0x18] sm:$0xff]   ;;  %v1408_v51 = vld [vmem:[%s1644_s3 + $0x20] sm:$0xff]   ;;  %v1412_v55 = vld [vmem:[%s1644_s3 + $0x28] sm:$0xff]  }
  0x3e   : > { %1224 = vmatpush3.bf16.msra.mxu0 %v1396_v39  ;;  %v1405_v48 = vld [vmem:[%s1644_s3 + $0x98] sm:$0xff]   ;;  %v1409_v52 = vld [vmem:[%s1644_s3 + $0xa0] sm:$0xff]   ;;  %v1413_v56 = vld [vmem:[%s1644_s3 + $0xa8] sm:$0xff]  }
  0x3f   : > { %1288 = vmatpush3.bf16.msra.mxu1 %v1397_v40  ;;  %1225 = vmatprep.subr.bf16.mxu0 %v1398_v41  ;;  %v1414_v57 = vld [vmem:[%s1644_s3 + $0x70] sm:$0xff]   ;;  %v1418_v61 = vld [vmem:[%s1644_s3 + $0x78] sm:$0xff]  }
  0x40   : > { %1289 = vmatprep.subr.bf16.mxu1 %v1399_v42  ;;  %v1415_v58 = vld [vmem:[%s1644_s3 + $0xf0] sm:$0xff]   ;;  %v1419_v62 = vld [vmem:[%s1644_s3 + $0xf8] sm:$0xff]   ;;  %v315_v42 = vld [vmem:[#allocation2] sm:$0xff] }
  0x41   : > { %v1416_v59 = vld [vmem:[%s1644_s3 + $0x30] sm:$0xff]   ;;  %v1420_v63 = vld [vmem:[%s1644_s3 + $0x38] sm:$0xff]  }
  0x42   : > { %1226 = vmatpush3.bf16.msra.mxu0 %v1400_v43  ;;  %v1417_v60 = vld [vmem:[%s1644_s3 + $0xb0] sm:$0xff]   ;;  %v1421_v0 = vld [vmem:[%s1644_s3 + $0xb8] sm:$0xff]  }
  0x43   : > { %1290 = vmatpush3.bf16.msra.mxu1 %v1401_v44  ;;  %1227 = vmatprep.subr.bf16.mxu0 %v1402_v45  ;;  %v1422_v1 = vld [vmem:[%s1646_s4] ss:$16 sps:$4 sm:$0xff]   ;;  %v1424_v2 = vld [vmem:[%s1646_s4 + $0x4] ss:$16 sps:$4 sm:$0xff]   ;;  %v1425_v3 = vld [vmem:[%s1646_s4 + $0x8] ss:$16 sps:$4 sm:$0xff]  }
  0x44   : > { %1291 = vmatprep.subr.bf16.mxu1 %v1403_v46  ;;  %v1427_v4 = vld [vmem:[%s1646_s4 + $0xc] ss:$16 sps:$4 sm:$0xff]   ;;  %811 = vmatprep.mubr.bf16.mxu0 %v1424_v2  ;;  %v1428_v5 = vld [vmem:[%s1646_s4 + $0x24] ss:$16 sps:$4 sm:$0xff]   ;;  %v1432_v7 = vld [vmem:[%s1646_s4 + $0x20] ss:$16 sps:$4 sm:$0xff]  }
  0x45   : > { %908 = vmatprep.mubr.bf16.mxu1 %v1427_v4  ;;  %v1430_v6 = vld [vmem:[%s1646_s4 + $0x2c] ss:$16 sps:$4 sm:$0xff]   ;;  %v1433_v8 = vld [vmem:[%s1646_s4 + $0x28] ss:$16 sps:$4 sm:$0xff]   ;;  %v1434_v9 = vld [vmem:[%s1646_s4 + $0x44] ss:$16 sps:$4 sm:$0xff]  }
  0x46   : > { %1228 = vmatpush3.bf16.msra.mxu0 %v1404_v47  ;;  %v1436_v10 = vld [vmem:[%s1646_s4 + $0x4c] ss:$16 sps:$4 sm:$0xff]   ;;  %v1438_v11 = vld [vmem:[%s1646_s4 + $0x40] ss:$16 sps:$4 sm:$0xff]   ;;  %v1439_v12 = vld [vmem:[%s1646_s4 + $0x48] ss:$16 sps:$4 sm:$0xff]  }
  0x47   : > { %1292 = vmatpush3.bf16.msra.mxu1 %v1405_v48  ;;  %1229 = vmatprep.subr.bf16.mxu0 %v1406_v49  ;;  %v1440_v13 = vld [vmem:[%s1646_s4 + $0x64] ss:$16 sps:$4 sm:$0xff]   ;;  %v1442_v14 = vld [vmem:[%s1646_s4 + $0x6c] ss:$16 sps:$4 sm:$0xff]   ;;  %v1444_v15 = vld [vmem:[%s1646_s4 + $0x60] ss:$16 sps:$4 sm:$0xff]  }
  0x48   : > { %1293 = vmatprep.subr.bf16.mxu1 %v1407_v50  ;;  %v1445_v16 = vld [vmem:[%s1646_s4 + $0x68] ss:$16 sps:$4 sm:$0xff]   ;;  %v1446_v17 = vld [vmem:[%s1646_s4 + $0x84] ss:$16 sps:$4 sm:$0xff]   ;;  %v1448_v18 = vld [vmem:[%s1646_s4 + $0x8c] ss:$16 sps:$4 sm:$0xff]  }
  0x49   : > { %v1450_v19 = vld [vmem:[%s1646_s4 + $0x80] ss:$16 sps:$4 sm:$0xff]   ;;  %v1451_v20 = vld [vmem:[%s1646_s4 + $0x88] ss:$16 sps:$4 sm:$0xff]   ;;  %v1452_v21 = vld [vmem:[%s1646_s4 + $0xa4] ss:$16 sps:$4 sm:$0xff]  }
  0x4a   : > { %1230 = vmatpush3.bf16.msra.mxu0 %v1408_v51  ;;  %v1454_v22 = vld [vmem:[%s1646_s4 + $0xac] ss:$16 sps:$4 sm:$0xff]   ;;  %v1456_v23 = vld [vmem:[%s1646_s4 + $0xa0] ss:$16 sps:$4 sm:$0xff]   ;;  %v1457_v24 = vld [vmem:[%s1646_s4 + $0xa8] ss:$16 sps:$4 sm:$0xff]  }
  0x4b   : > { %1294 = vmatpush3.bf16.msra.mxu1 %v1409_v52  ;;  %1231 = vmatprep.subr.bf16.mxu0 %v1410_v53  ;;  %v1458_v25 = vld [vmem:[%s1646_s4 + $0xc4] ss:$16 sps:$4 sm:$0xff]   ;;  %v1460_v26 = vld [vmem:[%s1646_s4 + $0xcc] ss:$16 sps:$4 sm:$0xff]   ;;  %v1462_v27 = vld [vmem:[%s1646_s4 + $0xc0] ss:$16 sps:$4 sm:$0xff]  }
  0x4c   : > { %1295 = vmatprep.subr.bf16.mxu1 %v1411_v54  ;;  %v1463_v28 = vld [vmem:[%s1646_s4 + $0xc8] ss:$16 sps:$4 sm:$0xff]   ;;  %v1464_v29 = vld [vmem:[%s1646_s4 + $0xe4] ss:$16 sps:$4 sm:$0xff]   ;;  %v1466_v30 = vld [vmem:[%s1646_s4 + $0xec] ss:$16 sps:$4 sm:$0xff]  }
  0x4d   : > { %v1468_v31 = vld [vmem:[%s1646_s4 + $0xe0] ss:$16 sps:$4 sm:$0xff]   ;;  %v1469_v32 = vld [vmem:[%s1646_s4 + $0xe8] ss:$16 sps:$4 sm:$0xff]  }
  0x4e   : > { %1232 = vmatpush3.bf16.msra.mxu0 %v1412_v55  ;;  %v316_v47 = vld [vmem:[#allocation2 + $0x8] sm:$0xff] }
  0x4f   : > { %1296 = vmatpush3.bf16.msra.mxu1 %v1413_v56  ;;  %1233 = vmatprep.subr.bf16.mxu0 %v1414_v57 }
  0x50   : > { %1297 = vmatprep.subr.bf16.mxu1 %v1415_v58 }
  0x52   : > { %1234 = vmatpush3.bf16.msra.mxu0 %v1416_v59 }
  0x53   : > { %1298 = vmatpush3.bf16.msra.mxu1 %v1417_v60  ;;  %1235 = vmatprep.subr.bf16.mxu0 %v1418_v61  ;;  %v317_v60 = vld [vmem:[#allocation2 + $0x10] sm:$0xff] }
  0x54   : > { %1299 = vmatprep.subr.bf16.mxu1 %v1419_v62 }
  0x56   : > { %1236 = vmatpush3.bf16.msra.mxu0 %v1420_v63 }
  0x57   : > { %1300 = vmatpush3.bf16.msra.mxu1 %v1421_v0 }
  0x59   : > { %812 = vmatmul.mubr.bf16.vlgmr.msra.gmra.mrb[0].mxu0 %v1422_v1  ;;  %v318_v1 = vld [vmem:[#allocation2 + $0x18] sm:$0xff] }
  0x5a   : > { %909 = vmatmul.mubr.bf16.vlgmr.msra.gmra.mrb[0].mxu1 %v1425_v3  ;;  %819 = vmatprep.mubr.bf16.mxu0 %v1428_v5 }
  0x5b   : > { %916 = vmatprep.mubr.bf16.mxu1 %v1430_v6 }
  0x61   : > { %820 = vmatmul.mubr.bf16.gmra.mrb[4].mxu0 %v1432_v7 }
  0x62   : > { %917 = vmatmul.mubr.bf16.gmra.mrb[4].mxu1 %v1433_v8  ;;  %827 = vmatprep.mubr.bf16.mxu0 %v1434_v9 }
  0x63   : > { %924 = vmatprep.mubr.bf16.mxu1 %v1436_v10 }
  0x69   : > { %828 = vmatmul.mubr.bf16.gmra.mrb[8].mxu0 %v1438_v11 }
  0x6a   : > { %925 = vmatmul.mubr.bf16.gmra.mrb[8].mxu1 %v1439_v12  ;;  %835 = vmatprep.mubr.bf16.mxu0 %v1440_v13 }
  0x6b   : > { %932 = vmatprep.mubr.bf16.mxu1 %v1442_v14  ;;  %v319_v14 = vld [vmem:[#allocation2 + $0x20] sm:$0xff] }
  0x71   : > { %836 = vmatmul.mubr.bf16.gmra.mrb[12].mxu0 %v1444_v15 }
  0x72   : > { %933 = vmatmul.mubr.bf16.gmra.mrb[12].mxu1 %v1445_v16  ;;  %843 = vmatprep.mubr.bf16.mxu0 %v1446_v17 }
  0x73   : > { %940 = vmatprep.mubr.bf16.mxu1 %v1448_v18 }
  0x79   : > { %844 = vmatmul.mubr.bf16.gmra.mrb[16].mxu0 %v1450_v19  ;;  %v320_v19 = vld [vmem:[#allocation2 + $0x28] sm:$0xff] }
  0x7a   : > { %941 = vmatmul.mubr.bf16.gmra.mrb[16].mxu1 %v1451_v20  ;;  %851 = vmatprep.mubr.bf16.mxu0 %v1452_v21 }
  0x7b   : > { %948 = vmatprep.mubr.bf16.mxu1 %v1454_v22 }
  0x81   : > { %852 = vmatmul.mubr.bf16.gmra.mrb[20].mxu0 %v1456_v23 }
  0x82   : > { %949 = vmatmul.mubr.bf16.gmra.mrb[20].mxu1 %v1457_v24  ;;  %859 = vmatprep.mubr.bf16.mxu0 %v1458_v25 }
  0x83   : > { %956 = vmatprep.mubr.bf16.mxu1 %v1460_v26 }
  0x89   : > { %860 = vmatmul.mubr.bf16.gmra.mrb[24].mxu0 %v1462_v27 }
  0x8a   : > { %957 = vmatmul.mubr.bf16.gmra.mrb[24].mxu1 %v1463_v28  ;;  %867 = vmatprep.mubr.bf16.mxu0 %v1464_v29 }
  0x8b   : > { %964 = vmatprep.mubr.bf16.mxu1 %v1466_v30 }
  0x91   : > { %868 = vmatmul.mubr.bf16.gmra.mrb[28].mxu0 %v1468_v31 }
  0x92   : > { %965 = vmatmul.mubr.bf16.gmra.mrb[28].mxu1 %v1469_v32  ;;  %v321_v32 = vld [vmem:[#allocation2 + $0x30] sm:$0xff] }
 0x12c   : > { %v1237_v33 = vpop.f32.mrb[0].mxu0 }
 0x12d   : > { %v1301_v34 = vpop.f32.mrb[0].mxu1  ;;  %v1238_v35 = vpop.f32.mrb[1].mxu0 }
 0x12e   : > { %v1239_v36 = vadd.f32 %v1238_v35, %v1237_v33  ;;  %v1302_v37 = vpop.f32.mrb[1].mxu1  ;;  %v1240_v38 = vpop.f32.mrb[2].mxu0 }
 0x12f   : > { %v1303_v39 = vadd.f32 %v1302_v37, %v1301_v34  ;;  %v1304_v40 = vpop.f32.mrb[2].mxu1  ;;  %v1241_v41 = vpop.f32.mrb[3].mxu0  ;;  %v322_v37 = vld [vmem:[#allocation2 + $0x38] sm:$0xff] }
 0x130   : > { %v1242_v43 = vadd.f32 %v1241_v41, %v1240_v38  ;;  %v1305_v44 = vpop.f32.mrb[3].mxu1 }
 0x131   : > { %v911_v45 = vadd.f32 %v1303_v39, %v1239_v36  ;;  %v1306_v46 = vadd.f32 %v1305_v44, %v1304_v40 }
 0x133   : > { %v973_v48 = vadd.f32 %v911_v45, %v315_v42  ;;  %v914_v49 = vadd.f32 %v1306_v46, %v1242_v43 }
 0x134   : > { %v1243_v50 = vpop.f32.mrb[4].mxu0 }
 0x135   : > { %989 = vst [vmem:[#allocation2] sm:$0xff] %v973_v48  ;;  %v974_v51 = vadd.f32 %v914_v49, %v316_v47  ;;  %v1307_v52 = vpop.f32.mrb[4].mxu1  ;;  %v1244_v53 = vpop.f32.mrb[5].mxu0 }
 0x136   : > { %v1245_v54 = vadd.f32 %v1244_v53, %v1243_v50  ;;  %v1308_v55 = vpop.f32.mrb[5].mxu1  ;;  %v1246_v56 = vpop.f32.mrb[6].mxu0  ;;  %v323_v50 = vld [vmem:[#allocation2 + $0x40] sm:$0xff] }
 0x137   : > { %990 = vst [vmem:[#allocation2 + $0x8] sm:$0xff] %v974_v51  ;;  %v1309_v57 = vadd.f32 %v1308_v55, %v1307_v52  ;;  %v1310_v58 = vpop.f32.mrb[6].mxu1  ;;  %v1247_v59 = vpop.f32.mrb[7].mxu0  ;;  %v324_v55 = vld [vmem:[#allocation2 + $0x48] sm:$0xff] }
 0x138   : > { %v1248_v61 = vadd.f32 %v1247_v59, %v1246_v56  ;;  %v1311_v62 = vpop.f32.mrb[7].mxu1 }
 0x139   : > { %v919_v63 = vadd.f32 %v1309_v57, %v1245_v54  ;;  %v1312_v0 = vadd.f32 %v1311_v62, %v1310_v58 }
 0x13b   : > { %v975_v2 = vadd.f32 %v919_v63, %v317_v60  ;;  %v922_v3 = vadd.f32 %v1312_v0, %v1248_v61 }
 0x13c   : > { %v1249_v4 = vpop.f32.mrb[8].mxu0 }
 0x13d   : > { %991 = vst [vmem:[#allocation2 + $0x10] sm:$0xff] %v975_v2  ;;  %v976_v5 = vadd.f32 %v922_v3, %v318_v1  ;;  %v1313_v6 = vpop.f32.mrb[8].mxu1  ;;  %v1250_v7 = vpop.f32.mrb[9].mxu0 }
 0x13e   : > { %v1251_v8 = vadd.f32 %v1250_v7, %v1249_v4  ;;  %v1314_v9 = vpop.f32.mrb[9].mxu1  ;;  %v1252_v10 = vpop.f32.mrb[10].mxu0  ;;  %v325_v4 = vld [vmem:[#allocation2 + $0x50] sm:$0xff] }
 0x13f   : > { %992 = vst [vmem:[#allocation2 + $0x18] sm:$0xff] %v976_v5  ;;  %v1315_v11 = vadd.f32 %v1314_v9, %v1313_v6  ;;  %v1316_v12 = vpop.f32.mrb[10].mxu1  ;;  %v1253_v13 = vpop.f32.mrb[11].mxu0  ;;  %v326_v9 = vld [vmem:[#allocation2 + $0x58] sm:$0xff] }
 0x140   : > { %v1254_v15 = vadd.f32 %v1253_v13, %v1252_v10  ;;  %v1317_v16 = vpop.f32.mrb[11].mxu1 }
 0x141   : > { %v927_v17 = vadd.f32 %v1315_v11, %v1251_v8  ;;  %v1318_v18 = vadd.f32 %v1317_v16, %v1316_v12 }
 0x143   : > { %v977_v20 = vadd.f32 %v927_v17, %v319_v14  ;;  %v930_v21 = vadd.f32 %v1318_v18, %v1254_v15 }
 0x144   : > { %v1255_v22 = vpop.f32.mrb[12].mxu0 }
 0x145   : > { %993 = vst [vmem:[#allocation2 + $0x20] sm:$0xff] %v977_v20  ;;  %v978_v23 = vadd.f32 %v930_v21, %v320_v19  ;;  %v1319_v24 = vpop.f32.mrb[12].mxu1  ;;  %v1256_v25 = vpop.f32.mrb[13].mxu0 }
 0x146   : > { %v1257_v26 = vadd.f32 %v1256_v25, %v1255_v22  ;;  %v1320_v27 = vpop.f32.mrb[13].mxu1  ;;  %v1258_v28 = vpop.f32.mrb[14].mxu0  ;;  %v327_v22 = vld [vmem:[#allocation2 + $0x60] sm:$0xff] }
 0x147   : > { %994 = vst [vmem:[#allocation2 + $0x28] sm:$0xff] %v978_v23  ;;  %v1321_v29 = vadd.f32 %v1320_v27, %v1319_v24  ;;  %v1322_v30 = vpop.f32.mrb[14].mxu1  ;;  %v1259_v31 = vpop.f32.mrb[15].mxu0  ;;  %v328_v27 = vld [vmem:[#allocation2 + $0x68] sm:$0xff] }
 0x148   : > { %v1260_v33 = vadd.f32 %v1259_v31, %v1258_v28  ;;  %v1323_v34 = vpop.f32.mrb[15].mxu1 }
 0x149   : > { %v935_v35 = vadd.f32 %v1321_v29, %v1257_v26  ;;  %v1324_v36 = vadd.f32 %v1323_v34, %v1322_v30 }
 0x14b   : > { %v979_v38 = vadd.f32 %v935_v35, %v321_v32  ;;  %v938_v39 = vadd.f32 %v1324_v36, %v1260_v33 }
 0x14c   : > { %v1261_v40 = vpop.f32.mrb[16].mxu0 }
 0x14d   : > { %995 = vst [vmem:[#allocation2 + $0x30] sm:$0xff] %v979_v38  ;;  %v980_v41 = vadd.f32 %v938_v39, %v322_v37  ;;  %v1325_v42 = vpop.f32.mrb[16].mxu1  ;;  %v1262_v43 = vpop.f32.mrb[17].mxu0 }
 0x14e   : > { %v1263_v44 = vadd.f32 %v1262_v43, %v1261_v40  ;;  %v1326_v45 = vpop.f32.mrb[17].mxu1  ;;  %v1264_v46 = vpop.f32.mrb[18].mxu0  ;;  %v329_v40 = vld [vmem:[#allocation2 + $0x70] sm:$0xff] }
 0x14f   : > { %996 = vst [vmem:[#allocation2 + $0x38] sm:$0xff] %v980_v41  ;;  %v1327_v47 = vadd.f32 %v1326_v45, %v1325_v42  ;;  %v1328_v48 = vpop.f32.mrb[18].mxu1  ;;  %v1265_v49 = vpop.f32.mrb[19].mxu0  ;;  %v330_v45 = vld [vmem:[#allocation2 + $0x78] sm:$0xff] }
 0x150   : > { %v1266_v51 = vadd.f32 %v1265_v49, %v1264_v46  ;;  %v1329_v52 = vpop.f32.mrb[19].mxu1  ;;  %v1009_v49 = vld [vmem:[#allocation2] sm:$0xff] (!%p1215_p11) }
 0x151   : > { %v943_v53 = vadd.f32 %v1327_v47, %v1263_v44  ;;  %v1330_v54 = vadd.f32 %v1329_v52, %v1328_v48  ;;  %1025 = vst [vmem:[%s1779_s2] sm:$0xff] (!%p1215_p11), %v1009_v49  ;;  %v1012_v52 = vld [vmem:[#allocation2 + $0x18] sm:$0xff] (!%p1215_p11) }
 0x152   : > { %1028 = vst [vmem:[%s1779_s2 + $0x18] sm:$0xff] (!%p1215_p11), %v1012_v52 }
 0x153   : > { %v981_v56 = vadd.f32 %v943_v53, %v323_v50  ;;  %v946_v57 = vadd.f32 %v1330_v54, %v1266_v51  ;;  %v1010_v50 = vld [vmem:[#allocation2 + $0x8] sm:$0xff] (!%p1215_p11)  ;;  %v1011_v51 = vld [vmem:[#allocation2 + $0x10] sm:$0xff] (!%p1215_p11)  ;;  %v1013_v53 = vld [vmem:[#allocation2 + $0x20] sm:$0xff] (!%p1215_p11) }
 0x154   : > { %v1267_v58 = vpop.f32.mrb[20].mxu0  ;;  %1026 = vst [vmem:[%s1779_s2 + $0x8] sm:$0xff] (!%p1215_p11), %v1010_v50  ;;  %1027 = vst [vmem:[%s1779_s2 + $0x10] sm:$0xff] (!%p1215_p11), %v1011_v51  ;;  %v1014_v54 = vld [vmem:[#allocation2 + $0x28] sm:$0xff] (!%p1215_p11) }
 0x155   : > { %997 = vst [vmem:[#allocation2 + $0x40] sm:$0xff] %v981_v56  ;;  %v982_v59 = vadd.f32 %v946_v57, %v324_v55  ;;  %v1331_v60 = vpop.f32.mrb[20].mxu1  ;;  %v1268_v61 = vpop.f32.mrb[21].mxu0  ;;  %1029 = vst [vmem:[%s1779_s2 + $0x20] sm:$0xff] (!%p1215_p11), %v1013_v53  ;;  %v1015_v55 = vld [vmem:[#allocation2 + $0x30] sm:$0xff] (!%p1215_p11) }
 0x156   : > { %v1269_v62 = vadd.f32 %v1268_v61, %v1267_v58  ;;  %v1332_v63 = vpop.f32.mrb[21].mxu1  ;;  %v1270_v0 = vpop.f32.mrb[22].mxu0  ;;  %1030 = vst [vmem:[%s1779_s2 + $0x28] sm:$0xff] (!%p1215_p11), %v1014_v54  ;;  %v1016_v56 = vld [vmem:[#allocation2 + $0x38] sm:$0xff] (!%p1215_p11)  ;;  %1031 = vst [vmem:[%s1779_s2 + $0x30] sm:$0xff] (!%p1215_p11), %v1015_v55 }
 0x157   : > { %998 = vst [vmem:[#allocation2 + $0x48] sm:$0xff] %v982_v59  ;;  %v1333_v1 = vadd.f32 %v1332_v63, %v1331_v60  ;;  %v1334_v2 = vpop.f32.mrb[22].mxu1  ;;  %v1271_v3 = vpop.f32.mrb[23].mxu0  ;;  %1032 = vst [vmem:[%s1779_s2 + $0x38] sm:$0xff] (!%p1215_p11), %v1016_v56 }
 0x158   : > { %v1272_v5 = vadd.f32 %v1271_v3, %v1270_v0  ;;  %v1335_v6 = vpop.f32.mrb[23].mxu1 }
 0x159   : > { %v951_v7 = vadd.f32 %v1333_v1, %v1269_v62  ;;  %v1336_v8 = vadd.f32 %v1335_v6, %v1334_v2 }
 0x15b   : > { %v983_v10 = vadd.f32 %v951_v7, %v325_v4  ;;  %v954_v11 = vadd.f32 %v1336_v8, %v1272_v5 }
 0x15c   : > { %v1273_v12 = vpop.f32.mrb[24].mxu0  ;;  %v1017_v57 = vld [vmem:[#allocation2 + $0x40] sm:$0xff] (!%p1215_p11) }
 0x15d   : > { %999 = vst [vmem:[#allocation2 + $0x50] sm:$0xff] %v983_v10  ;;  %v984_v13 = vadd.f32 %v954_v11, %v326_v9  ;;  %v1337_v14 = vpop.f32.mrb[24].mxu1  ;;  %v1274_v15 = vpop.f32.mrb[25].mxu0  ;;  %1033 = vst [vmem:[%s1779_s2 + $0x40] sm:$0xff] (!%p1215_p11), %v1017_v57 }
 0x15e   : > { %v1275_v16 = vadd.f32 %v1274_v15, %v1273_v12  ;;  %v1338_v17 = vpop.f32.mrb[25].mxu1  ;;  %v1276_v18 = vpop.f32.mrb[26].mxu0  ;;  %v1018_v58 = vld [vmem:[#allocation2 + $0x48] sm:$0xff] (!%p1215_p11) }
 0x15f   : > { %1000 = vst [vmem:[#allocation2 + $0x58] sm:$0xff] %v984_v13  ;;  %v1339_v19 = vadd.f32 %v1338_v17, %v1337_v14  ;;  %v1340_v20 = vpop.f32.mrb[26].mxu1  ;;  %v1277_v21 = vpop.f32.mrb[27].mxu0  ;;  %1034 = vst [vmem:[%s1779_s2 + $0x48] sm:$0xff] (!%p1215_p11), %v1018_v58 }
 0x160   : > { %v1278_v23 = vadd.f32 %v1277_v21, %v1276_v18  ;;  %v1341_v24 = vpop.f32.mrb[27].mxu1 }
 0x161   : > { %v959_v25 = vadd.f32 %v1339_v19, %v1275_v16  ;;  %v1342_v26 = vadd.f32 %v1341_v24, %v1340_v20 }
 0x163   : > { %v985_v28 = vadd.f32 %v959_v25, %v327_v22  ;;  %v962_v29 = vadd.f32 %v1342_v26, %v1278_v23 }
 0x164   : > { %v1279_v30 = vpop.f32.mrb[28].mxu0  ;;  %v1019_v59 = vld [vmem:[#allocation2 + $0x50] sm:$0xff] (!%p1215_p11) }
 0x165   : > { %1001 = vst [vmem:[#allocation2 + $0x60] sm:$0xff] %v985_v28  ;;  %v986_v31 = vadd.f32 %v962_v29, %v328_v27  ;;  %v1343_v32 = vpop.f32.mrb[28].mxu1  ;;  %v1280_v33 = vpop.f32.mrb[29].mxu0  ;;  %1035 = vst [vmem:[%s1779_s2 + $0x50] sm:$0xff] (!%p1215_p11), %v1019_v59 }
 0x166   : > { %v1281_v34 = vadd.f32 %v1280_v33, %v1279_v30  ;;  %v1344_v35 = vpop.f32.mrb[29].mxu1  ;;  %v1282_v36 = vpop.f32.mrb[30].mxu0  ;;  %v1020_v60 = vld [vmem:[#allocation2 + $0x58] sm:$0xff] (!%p1215_p11) }
 0x167   : > { %1002 = vst [vmem:[#allocation2 + $0x68] sm:$0xff] %v986_v31  ;;  %v1345_v37 = vadd.f32 %v1344_v35, %v1343_v32  ;;  %v1346_v38 = vpop.f32.mrb[30].mxu1  ;;  %v1283_v39 = vpop.f32.mrb[31].mxu0  ;;  %1036 = vst [vmem:[%s1779_s2 + $0x58] sm:$0xff] (!%p1215_p11), %v1020_v60 }
 0x168   : > { %v1284_v41 = vadd.f32 %v1283_v39, %v1282_v36  ;;  %v1347_v42 = vpop.f32.mrb[31].mxu1 }
 0x169   : > { %v967_v43 = vadd.f32 %v1345_v37, %v1281_v34  ;;  %v1348_v44 = vadd.f32 %v1347_v42, %v1346_v38  ;;  %1008 = sbr.rel (%p1215_p11) target bundleno = 376 (0x178), region = 59 }
 0x16b   : > { %v987_v46 = vadd.f32 %v967_v43, %v329_v40  ;;  %v970_v47 = vadd.f32 %v1348_v44, %v1284_v41 }
 0x16c   : > { %v1021_v61 = vld [vmem:[#allocation2 + $0x60] sm:$0xff] (!%p1215_p11) }
 0x16d   : > { %1003 = vst [vmem:[#allocation2 + $0x70] sm:$0xff] %v987_v46  ;;  %v988_v48 = vadd.f32 %v970_v47, %v330_v45  ;;  %1037 = vst [vmem:[%s1779_s2 + $0x60] sm:$0xff] (!%p1215_p11), %v1021_v61 }
 0x16e   : > { %v1022_v62 = vld [vmem:[#allocation2 + $0x68] sm:$0xff] (!%p1215_p11) }
 0x16f   : > { %1004 = vst [vmem:[#allocation2 + $0x78] sm:$0xff] %v988_v48  ;;  %1038 = vst [vmem:[%s1779_s2 + $0x68] sm:$0xff] (!%p1215_p11), %v1022_v62 }
 0x174   : > { %v1023_v63 = vld [vmem:[#allocation2 + $0x70] sm:$0xff] }
 0x175   : > { %1039 = vst [vmem:[%s1779_s2 + $0x70] sm:$0xff] %v1023_v63 }
 0x176   : > { %v1024_v0 = vld [vmem:[#allocation2 + $0x78] sm:$0xff] }
 0x177   : > { %1040 = vst [vmem:[%s1779_s2 + $0x78] sm:$0xff] %v1024_v0 }
 0x178 PF: > { %s12_s13 = sadd.s32 1, %s1508_s13   ;;  %s1780_s9 = smov %s1496_s10 }
 0x179   : > { %p9_p12 = scmp.ge.s32.totalorder %s12_s13, 4   ;;  %s1781_s10 = smov %s1561_s17 }
 0x17a   : > { %s1782_s11 = smov %s1504_s12  ;;  %s1783_s12 = smov %s1785_s14 }
 0x17b   :  { %11 = sbr.rel (!%p9_p12) target bundleno = 3 (0x3), region = 97 }

// kernel: discriminator_forward.11
= control target key start
LH: loop header
LB: loop body
LE: loop exit
PB: predicated region body
PF: predicated region fallthrough
CT: control target
= control target key end

     0   :  { %s1268_s9 = smov 0   ;;  %s1270_s10 = smov 0   ;;  %s1435_s0 = inlined_call_operand.vmem [shape: bf16[32,2048], index: 0, kind: input, shape index: {}]   ;;  %s1436_s1 = inlined_call_operand.vmem [shape: bf16[2048,256], index: 1, kind: input, shape index: {}]   ;;  %s1437_s2 = inlined_call_operand.vmem [shape: f32[32,256], index: 2, kind: output, shape index: {}]  }
   0x1   :  { %s1272_s11 = smov 0   ;;  %s1274_s12 = smov 0  }
   0x2   :  { %s1276_s13 = smov 0  }
   0x3 LB: > { %s24_s14 = sadd.s32 1, %s1246_s12  ;;  %p47_p1 = scmp.ne.s32.totalorder %s1238_s10, %s1234_s9  ;;  %s1250_s13 = sphi %s1276_s13, %s12_s13   ;;  %s1246_s12 = sphi %s1274_s12, %s1441_s12   ;;  %s1242_s11 = sphi %s1272_s11, %s1440_s11   ;;  %s1238_s10 = sphi %s1270_s10, %s1439_s10   ;;  %s1234_s9 = sphi %s1268_s9, %s1438_s9  }
   0x4   : > { %p25_p0 = scmp.ge.s32.totalorder %s24_s14, 4  ;;  %p48_p2 = scmp.eq.s32.totalorder %s1250_s13, 0 }
   0x5   : > { %s40_s16 = sadd.s32 1, %s1238_s10  ;;  %p966_p5 = scmp.ge.s32.totalorder %s1250_s13, 4 }
   0x6   : > { %s1443_s14 = smov (%p25_p0, %s24_s14), 0  ;;  %p49_p3 = por %p48_p2, %p47_p1 }
   0x7   : > { %s36_s15 = ssub.s32 %s1246_s12, %s1443_s14  ;;  %129 = sbr.rel (%p966_p5) target bundleno = 22 (0x16), region = 16 }
   0x8   : > { %p38_p4 = scmp.eq.s32.totalorder %s36_s15, 0 }
   0xa   : > { %s1303_s17 = scalar_select %p38_p4, %s1238_s10, %s40_s16  }
   0xe   : > { %132 = sbr.rel (!%p49_p3) target bundleno = 22 (0x16), region = 20  ;;  %s134_s18 = sand.u32 (%p49_p3), 1, %s1238_s10  }
   0xf   : > { %s1053_s19 = sshll.u32 (%p49_p3), %s1246_s12, 4  ;;  %s967_s20 = sshll.u32 (%p49_p3), %s134_s18, 6 }
  0x10   : > { %s142_s23 = scalar_lea.vmem (%p49_p3), %s1435_s0, %s1053_s19  ;;  %s136_s24 = scalar_lea.vmem (%p49_p3), [#allocation3], %s967_s20 }
  0x11   : > { %v155_v0 = vld [vmem:[%s142_s23] sm:$0xff] (%p49_p3)  ;;  %v157_v1 = vld [vmem:[%s142_s23 + $0x8] sm:$0xff] (%p49_p3) }
  0x12   : > { %v159_v2 = vld [vmem:[%s142_s23 + $0x40] sm:$0xff] (%p49_p3)  ;;  %156 = vst [vmem:[%s136_s24] sm:$0xff] (%p49_p3), %v155_v0  ;;  %158 = vst [vmem:[%s136_s24 + $0x8] sm:$0xff] (%p49_p3), %v157_v1  ;;  %v161_v3 = vld [vmem:[%s142_s23 + $0x48] sm:$0xff] (%p49_p3) }
  0x13   : > { %160 = vst [vmem:[%s136_s24 + $0x10] sm:$0xff] (%p49_p3), %v159_v2  ;;  %v163_v4 = vld [vmem:[%s142_s23 + $0x80] sm:$0xff] (%p49_p3)  ;;  %v165_v5 = vld [vmem:[%s142_s23 + $0x88] sm:$0xff] (%p49_p3)  ;;  %162 = vst [vmem:[%s136_s24 + $0x18] sm:$0xff] (%p49_p3), %v161_v3 }
  0x14   : > { %164 = vst [vmem:[%s136_s24 + $0x20] sm:$0xff] (%p49_p3), %v163_v4  ;;  %166 = vst [vmem:[%s136_s24 + $0x28] sm:$0xff] (%p49_p3), %v165_v5  ;;  %v167_v6 = vld [vmem:[%s142_s23 + $0xc0] sm:$0xff] (%p49_p3)  ;;  %v169_v7 = vld [vmem:[%s142_s23 + $0xc8] sm:$0xff] (%p49_p3) }
  0x15   : > { %168 = vst [vmem:[%s136_s24 + $0x30] sm:$0xff] %v167_v6  ;;  %170 = vst [vmem:[%s136_s24 + $0x38] sm:$0xff] %v169_v7 }
  0x16 PF: > { %p970_p6 = scmp.ge.s32.totalorder %s1250_s13, 1  ;;  %p190_p7 = scmp.lt.s32.totalorder %s1250_s13, 5 }
  0x18   : > { %p191_p8 = pnand %p970_p6, %p190_p7 }
  0x19   : > { %s197_s25 = sand.u32 (!%p191_p8), 1, %s1234_s9   ;;  %s972_s26 = sshll.u32 (!%p191_p8), %s1242_s11, 6 }
  0x1a   : > { %194 = sbr.rel (%p191_p8) target bundleno = 342 (0x156), region = 47  ;;  %s971_s27 = sshll.u32 (!%p191_p8), %s197_s25, 6 }
  0x1b   : > { %p237_p9 = scmp.lt.s32.totalorder (!%p191_p8), %s972_s26, 255  ;;  %s1320_s4 = scalar_lea.vmem (!%p191_p8), [#allocation3], %s971_s27 }
  0x1c   : > { %p975_p10 = scmp.ne.s32.totalorder (!%p191_p8), %s1242_s11, 0 }
  0x21   : > { %s1445_s26 = smov (!%p237_p9, %s972_s26), 255  ;;  %262 = sbr.rel (%p975_p10) target bundleno = 40 (0x28), region = 55 }
  0x22   : > { %s1054_s28 = sshll.u32 %s1445_s26, 3  ;;  %v1252_v8 = vmov (!%p975_p10), 0.0  }
  0x23   : > { %s1318_s3 = scalar_lea.vmem %s1436_s1, %s1054_s28  ;;  %263 = vst [vmem:[#allocation2] sm:$0xff] (!%p975_p10), %v1252_v8  ;;  %264 = vst [vmem:[#allocation2 + $0x8] sm:$0xff] (!%p975_p10), %v1252_v8 }
  0x24   : > { %265 = vst [vmem:[#allocation2 + $0x10] sm:$0xff] (!%p975_p10), %v1252_v8  ;;  %266 = vst [vmem:[#allocation2 + $0x18] sm:$0xff] (!%p975_p10), %v1252_v8 }
  0x25   : > { %267 = vst [vmem:[#allocation2 + $0x20] sm:$0xff] (!%p975_p10), %v1252_v8  ;;  %268 = vst [vmem:[#allocation2 + $0x28] sm:$0xff] (!%p975_p10), %v1252_v8 }
  0x26   : > { %269 = vst [vmem:[#allocation2 + $0x30] sm:$0xff] (!%p975_p10), %v1252_v8  ;;  %270 = vst [vmem:[#allocation2 + $0x38] sm:$0xff] (!%p975_p10), %v1252_v8 }
  0x28 PF: > { %v1104_v9 = vld [vmem:[%s1318_s3 + $0x4] ss:$8 sps:$4 sm:$0xff]   ;;  %v1108_v11 = vld [vmem:[%s1318_s3] ss:$8 sps:$4 sm:$0xff]   ;;  %v1110_v13 = vld [vmem:[%s1318_s3 + $0x14] ss:$8 sps:$4 sm:$0xff]  }
  0x29   : > { %v1106_v10 = vld [vmem:[%s1318_s3 + $0x104] ss:$8 sps:$4 sm:$0xff]   ;;  %711 = vmatprep.subr.bf16.mxu1 %v1104_v9  ;;  %v1109_v12 = vld [vmem:[%s1318_s3 + $0x100] ss:$8 sps:$4 sm:$0xff]   ;;  %v1112_v14 = vld [vmem:[%s1318_s3 + $0x114] ss:$8 sps:$4 sm:$0xff]  }
  0x2a   : > { %764 = vmatprep.subr.bf16.mxu0 %v1106_v10  ;;  %712 = vmatpush1.bf16.msra.mxu1 %v1108_v11  ;;  %v1114_v15 = vld [vmem:[%s1318_s3 + $0x10] ss:$8 sps:$4 sm:$0xff]   ;;  %v1116_v17 = vld [vmem:[%s1318_s3 + $0x24] ss:$8 sps:$4 sm:$0xff]   ;;  %v1120_v19 = vld [vmem:[%s1318_s3 + $0x20] ss:$8 sps:$4 sm:$0xff]  }
  0x2b   : > { %765 = vmatpush1.bf16.msra.mxu0 %v1109_v12  ;;  %713 = vmatprep.subr.bf16.mxu1 %v1110_v13  ;;  %v1115_v16 = vld [vmem:[%s1318_s3 + $0x110] ss:$8 sps:$4 sm:$0xff]   ;;  %v1118_v18 = vld [vmem:[%s1318_s3 + $0x124] ss:$8 sps:$4 sm:$0xff]   ;;  %v1121_v20 = vld [vmem:[%s1318_s3 + $0x120] ss:$8 sps:$4 sm:$0xff]  }
  0x2c   : > { %766 = vmatprep.subr.bf16.mxu0 %v1112_v14  ;;  %v1122_v21 = vld [vmem:[%s1318_s3 + $0x34] ss:$8 sps:$4 sm:$0xff]   ;;  %v1126_v23 = vld [vmem:[%s1318_s3 + $0x30] ss:$8 sps:$4 sm:$0xff]   ;;  %v1128_v25 = vld [vmem:[%s1318_s3 + $0x44] ss:$8 sps:$4 sm:$0xff]  }
  0x2d   : > { %v1124_v22 = vld [vmem:[%s1318_s3 + $0x134] ss:$8 sps:$4 sm:$0xff]   ;;  %v1127_v24 = vld [vmem:[%s1318_s3 + $0x130] ss:$8 sps:$4 sm:$0xff]   ;;  %v1130_v26 = vld [vmem:[%s1318_s3 + $0x144] ss:$8 sps:$4 sm:$0xff]  }
  0x2e   : > { %714 = vmatpush1.bf16.msra.mxu1 %v1114_v15  ;;  %v1132_v27 = vld [vmem:[%s1318_s3 + $0x40] ss:$8 sps:$4 sm:$0xff]   ;;  %v1134_v29 = vld [vmem:[%s1318_s3 + $0x54] ss:$8 sps:$4 sm:$0xff]   ;;  %v1138_v31 = vld [vmem:[%s1318_s3 + $0x50] ss:$8 sps:$4 sm:$0xff]  }
  0x2f   : > { %767 = vmatpush1.bf16.msra.mxu0 %v1115_v16  ;;  %715 = vmatprep.subr.bf16.mxu1 %v1116_v17  ;;  %v1133_v28 = vld [vmem:[%s1318_s3 + $0x140] ss:$8 sps:$4 sm:$0xff]   ;;  %v1136_v30 = vld [vmem:[%s1318_s3 + $0x154] ss:$8 sps:$4 sm:$0xff]   ;;  %v1139_v32 = vld [vmem:[%s1318_s3 + $0x150] ss:$8 sps:$4 sm:$0xff]  }
  0x30   : > { %768 = vmatprep.subr.bf16.mxu0 %v1118_v18  ;;  %v1140_v33 = vld [vmem:[%s1318_s3 + $0x64] ss:$8 sps:$4 sm:$0xff]   ;;  %v1144_v35 = vld [vmem:[%s1318_s3 + $0x60] ss:$8 sps:$4 sm:$0xff]   ;;  %v1146_v37 = vld [vmem:[%s1318_s3 + $0x74] ss:$8 sps:$4 sm:$0xff]  }
  0x31   : > { %v1142_v34 = vld [vmem:[%s1318_s3 + $0x164] ss:$8 sps:$4 sm:$0xff]   ;;  %v1145_v36 = vld [vmem:[%s1318_s3 + $0x160] ss:$8 sps:$4 sm:$0xff]   ;;  %v1148_v38 = vld [vmem:[%s1318_s3 + $0x174] ss:$8 sps:$4 sm:$0xff]  }
  0x32   : > { %716 = vmatpush1.bf16.msra.mxu1 %v1120_v19  ;;  %v1150_v39 = vld [vmem:[%s1318_s3 + $0x70] ss:$8 sps:$4 sm:$0xff]   ;;  %v1152_v41 = vld [vmem:[%s1318_s3 + $0x84] ss:$8 sps:$4 sm:$0xff]   ;;  %v1156_v43 = vld [vmem:[%s1318_s3 + $0x80] ss:$8 sps:$4 sm:$0xff]  }
  0x33   : > { %769 = vmatpush1.bf16.msra.mxu0 %v1121_v20  ;;  %717 = vmatprep.subr.bf16.mxu1 %v1122_v21  ;;  %v1151_v40 = vld [vmem:[%s1318_s3 + $0x170] ss:$8 sps:$4 sm:$0xff]   ;;  %v1154_v42 = vld [vmem:[%s1318_s3 + $0x184] ss:$8 sps:$4 sm:$0xff]   ;;  %v1157_v44 = vld [vmem:[%s1318_s3 + $0x180] ss:$8 sps:$4 sm:$0xff]  }
  0x34   : > { %770 = vmatprep.subr.bf16.mxu0 %v1124_v22  ;;  %v1158_v45 = vld [vmem:[%s1318_s3 + $0x94] ss:$8 sps:$4 sm:$0xff]   ;;  %v1162_v47 = vld [vmem:[%s1318_s3 + $0x90] ss:$8 sps:$4 sm:$0xff]   ;;  %v1164_v49 = vld [vmem:[%s1318_s3 + $0xa4] ss:$8 sps:$4 sm:$0xff]  }
  0x35   : > { %v1160_v46 = vld [vmem:[%s1318_s3 + $0x194] ss:$8 sps:$4 sm:$0xff]   ;;  %v1163_v48 = vld [vmem:[%s1318_s3 + $0x190] ss:$8 sps:$4 sm:$0xff]   ;;  %v1166_v50 = vld [vmem:[%s1318_s3 + $0x1a4] ss:$8 sps:$4 sm:$0xff]  }
  0x36   : > { %718 = vmatpush1.bf16.msra.mxu1 %v1126_v23  ;;  %v1168_v51 = vld [vmem:[%s1318_s3 + $0xa0] ss:$8 sps:$4 sm:$0xff]   ;;  %v1170_v53 = vld [vmem:[%s1318_s3 + $0xb4] ss:$8 sps:$4 sm:$0xff]   ;;  %v1174_v55 = vld [vmem:[%s1318_s3 + $0xb0] ss:$8 sps:$4 sm:$0xff]  }
  0x37   : > { %771 = vmatpush1.bf16.msra.mxu0 %v1127_v24  ;;  %719 = vmatprep.subr.bf16.mxu1 %v1128_v25  ;;  %v1169_v52 = vld [vmem:[%s1318_s3 + $0x1a0] ss:$8 sps:$4 sm:$0xff]   ;;  %v1172_v54 = vld [vmem:[%s1318_s3 + $0x1b4] ss:$8 sps:$4 sm:$0xff]   ;;  %v1175_v56 = vld [vmem:[%s1318_s3 + $0x1b0] ss:$8 sps:$4 sm:$0xff]  }
  0x38   : > { %772 = vmatprep.subr.bf16.mxu0 %v1130_v26  ;;  %v1176_v57 = vld [vmem:[%s1318_s3 + $0xc4] ss:$8 sps:$4 sm:$0xff]   ;;  %v1180_v61 = vld [vmem:[%s1318_s3 + $0xc0] ss:$8 sps:$4 sm:$0xff]   ;;  %v1182_v63 = vld [vmem:[%s1318_s3 + $0xd4] ss:$8 sps:$4 sm:$0xff]  }
  0x39   : > { %v1202_v58 = vld [vmem:[%s1320_s4 + $0x4] ss:$16 sps:$4 sm:$0xff]   ;;  %v1205_v60 = vld [vmem:[%s1320_s4 + $0xc] ss:$16 sps:$4 sm:$0xff]   ;;  %v1181_v62 = vld [vmem:[%s1318_s3 + $0x1c0] ss:$8 sps:$4 sm:$0xff]  }
  0x3a   : > { %720 = vmatpush1.bf16.msra.mxu1 %v1132_v27  ;;  %v1178_v59 = vld [vmem:[%s1318_s3 + $0x1c4] ss:$8 sps:$4 sm:$0xff]   ;;  %743 = vmatprep.mubr.bf16.mxu1 %v1202_v58  ;;  %v1184_v0 = vld [vmem:[%s1318_s3 + $0x1d4] ss:$8 sps:$4 sm:$0xff]   ;;  %v1186_v1 = vld [vmem:[%s1318_s3 + $0xd0] ss:$8 sps:$4 sm:$0xff]  }
  0x3b   : > { %773 = vmatpush1.bf16.msra.mxu0 %v1133_v28  ;;  %721 = vmatprep.subr.bf16.mxu1 %v1134_v29  ;;  %v1187_v2 = vld [vmem:[%s1318_s3 + $0x1d0] ss:$8 sps:$4 sm:$0xff]   ;;  %v1188_v3 = vld [vmem:[%s1318_s3 + $0xe4] ss:$8 sps:$4 sm:$0xff]   ;;  %v1192_v5 = vld [vmem:[%s1318_s3 + $0xe0] ss:$8 sps:$4 sm:$0xff]  }
  0x3c   : > { %774 = vmatprep.subr.bf16.mxu0 %v1136_v30  ;;  %796 = vmatprep.mubr.bf16.mxu0 %v1205_v60  ;;  %v1190_v4 = vld [vmem:[%s1318_s3 + $0x1e4] ss:$8 sps:$4 sm:$0xff]   ;;  %v1193_v6 = vld [vmem:[%s1318_s3 + $0x1e0] ss:$8 sps:$4 sm:$0xff]   ;;  %v1194_v7 = vld [vmem:[%s1318_s3 + $0xf4] ss:$8 sps:$4 sm:$0xff]  }
  0x3d   : > { %v1196_v8 = vld [vmem:[%s1318_s3 + $0x1f4] ss:$8 sps:$4 sm:$0xff]   ;;  %v1198_v9 = vld [vmem:[%s1318_s3 + $0xf0] ss:$8 sps:$4 sm:$0xff]   ;;  %v271_v18 = vld [vmem:[#allocation2] sm:$0xff]  ;;  %p1048_p11 = scmp.ne.s32.totalorder %s1242_s11, 3 }
  0x3e   : > { %722 = vmatpush1.bf16.msra.mxu1 %v1138_v31  ;;  %v1199_v10 = vld [vmem:[%s1318_s3 + $0x1f0] ss:$8 sps:$4 sm:$0xff]   ;;  %v1206_v13 = vld [vmem:[%s1320_s4 + $0x24] ss:$16 sps:$4 sm:$0xff]   ;;  %v1208_v14 = vld [vmem:[%s1320_s4 + $0x2c] ss:$16 sps:$4 sm:$0xff]  }
  0x3f   : > { %775 = vmatpush1.bf16.msra.mxu0 %v1139_v32  ;;  %723 = vmatprep.subr.bf16.mxu1 %v1140_v33  ;;  %v1200_v11 = vld [vmem:[%s1320_s4] ss:$16 sps:$4 sm:$0xff]   ;;  %v1203_v12 = vld [vmem:[%s1320_s4 + $0x8] ss:$16 sps:$4 sm:$0xff]  }
  0x40   : > { %776 = vmatprep.subr.bf16.mxu0 %v1142_v34  ;;  %v1210_v15 = vld [vmem:[%s1320_s4 + $0x20] ss:$16 sps:$4 sm:$0xff]   ;;  %v1211_v16 = vld [vmem:[%s1320_s4 + $0x28] ss:$16 sps:$4 sm:$0xff]  }
  0x41   : > { %v272_v22 = vld [vmem:[#allocation2 + $0x8] sm:$0xff]  ;;  %v273_v26 = vld [vmem:[#allocation2 + $0x10] sm:$0xff]  ;;  %v274_v31 = vld [vmem:[#allocation2 + $0x18] sm:$0xff] }
  0x42   : > { %724 = vmatpush1.bf16.msra.mxu1 %v1144_v35 }
  0x43   : > { %777 = vmatpush1.bf16.msra.mxu0 %v1145_v36  ;;  %725 = vmatprep.subr.bf16.mxu1 %v1146_v37 }
  0x44   : > { %778 = vmatprep.subr.bf16.mxu0 %v1148_v38  ;;  %v275_v38 = vld [vmem:[#allocation2 + $0x20] sm:$0xff] }
  0x46   : > { %726 = vmatpush1.bf16.msra.mxu1 %v1150_v39 }
  0x47   : > { %779 = vmatpush1.bf16.msra.mxu0 %v1151_v40  ;;  %727 = vmatprep.subr.bf16.mxu1 %v1152_v41 }
  0x48   : > { %780 = vmatprep.subr.bf16.mxu0 %v1154_v42  ;;  %v276_v42 = vld [vmem:[#allocation2 + $0x28] sm:$0xff] }
  0x4a   : > { %728 = vmatpush1.bf16.msra.mxu1 %v1156_v43 }
  0x4b   : > { %781 = vmatpush1.bf16.msra.mxu0 %v1157_v44  ;;  %729 = vmatprep.subr.bf16.mxu1 %v1158_v45 }
  0x4c   : > { %782 = vmatprep.subr.bf16.mxu0 %v1160_v46  ;;  %v277_v46 = vld [vmem:[#allocation2 + $0x30] sm:$0xff] }
  0x4e   : > { %730 = vmatpush1.bf16.msra.mxu1 %v1162_v47 }
  0x4f   : > { %783 = vmatpush1.bf16.msra.mxu0 %v1163_v48  ;;  %731 = vmatprep.subr.bf16.mxu1 %v1164_v49 }
  0x50   : > { %784 = vmatprep.subr.bf16.mxu0 %v1166_v50 }
  0x52   : > { %732 = vmatpush1.bf16.msra.mxu1 %v1168_v51  ;;  %v278_v51 = vld [vmem:[#allocation2 + $0x38] sm:$0xff] }
  0x53   : > { %785 = vmatpush1.bf16.msra.mxu0 %v1169_v52  ;;  %733 = vmatprep.subr.bf16.mxu1 %v1170_v53 }
  0x54   : > { %786 = vmatprep.subr.bf16.mxu0 %v1172_v54 }
  0x56   : > { %734 = vmatpush1.bf16.msra.mxu1 %v1174_v55 }
  0x57   : > { %787 = vmatpush1.bf16.msra.mxu0 %v1175_v56  ;;  %735 = vmatprep.subr.bf16.mxu1 %v1176_v57 }
  0x58   : > { %788 = vmatprep.subr.bf16.mxu0 %v1178_v59 }
  0x5a   : > { %736 = vmatpush1.bf16.msra.mxu1 %v1180_v61 }
  0x5b   : > { %789 = vmatpush1.bf16.msra.mxu0 %v1181_v62  ;;  %737 = vmatprep.subr.bf16.mxu1 %v1182_v63 }
  0x5c   : > { %790 = vmatprep.subr.bf16.mxu0 %v1184_v0 }
  0x5e   : > { %738 = vmatpush1.bf16.msra.mxu1 %v1186_v1 }
  0x5f   : > { %791 = vmatpush1.bf16.msra.mxu0 %v1187_v2  ;;  %739 = vmatprep.subr.bf16.mxu1 %v1188_v3 }
  0x60   : > { %792 = vmatprep.subr.bf16.mxu0 %v1190_v4 }
  0x62   : > { %740 = vmatpush1.bf16.msra.mxu1 %v1192_v5 }
  0x63   : > { %793 = vmatpush1.bf16.msra.mxu0 %v1193_v6  ;;  %741 = vmatprep.subr.bf16.mxu1 %v1194_v7 }
  0x64   : > { %794 = vmatprep.subr.bf16.mxu0 %v1196_v8 }
  0x66   : > { %742 = vmatpush1.bf16.msra.mxu1 %v1198_v9 }
  0x67   : > { %795 = vmatpush1.bf16.msra.mxu0 %v1199_v10 }
  0x69   : > { %744 = vmatmul.mubr.bf16.vlgmr.msra.gmra.mrb[0].mxu1 %v1200_v11 }
  0x6a   : > { %797 = vmatmul.mubr.bf16.vlgmr.msra.gmra.mrb[0].mxu0 %v1203_v12  ;;  %753 = vmatprep.mubr.bf16.mxu1 %v1206_v13 }
  0x6b   : > { %806 = vmatprep.mubr.bf16.mxu0 %v1208_v14 }
  0x71   : > { %754 = vmatmul.mubr.bf16.gmra.mrb[4].mxu1 %v1210_v15 }
  0x72   : > { %807 = vmatmul.mubr.bf16.gmra.mrb[4].mxu0 %v1211_v16 }
 0x13c   : > { %v745_v17 = vpop.f32.mrb[0].mxu1 }
 0x13d   : > { %v798_v19 = vpop.f32.mrb[0].mxu0  ;;  %v747_v21 = vpop.f32.mrb[1].mxu1 }
 0x13e   : > { %v799_v20 = vadd.f32 %v798_v19, %v745_v17  ;;  %v800_v23 = vpop.f32.mrb[1].mxu0  ;;  %v749_v25 = vpop.f32.mrb[2].mxu1 }
 0x13f   : > { %v801_v24 = vadd.f32 %v800_v23, %v747_v21  ;;  %v802_v27 = vpop.f32.mrb[2].mxu0  ;;  %v751_v30 = vpop.f32.mrb[3].mxu1 }
 0x140   : > { %v817_v28 = vadd.f32 %v799_v20, %v271_v18  ;;  %v803_v29 = vadd.f32 %v802_v27, %v749_v25  ;;  %v804_v32 = vpop.f32.mrb[3].mxu0 }
 0x141   : > { %v818_v33 = vadd.f32 %v801_v24, %v272_v22  ;;  %v805_v34 = vadd.f32 %v804_v32, %v751_v30 }
 0x142   : > { %825 = vst [vmem:[#allocation2] sm:$0xff] %v817_v28  ;;  %v819_v35 = vadd.f32 %v803_v29, %v273_v26 }
 0x143   : > { %826 = vst [vmem:[#allocation2 + $0x8] sm:$0xff] %v818_v33  ;;  %v820_v36 = vadd.f32 %v805_v34, %v274_v31 }
 0x144   : > { %827 = vst [vmem:[#allocation2 + $0x10] sm:$0xff] %v819_v35  ;;  %v755_v37 = vpop.f32.mrb[4].mxu1 }
 0x145   : > { %828 = vst [vmem:[#allocation2 + $0x18] sm:$0xff] %v820_v36  ;;  %v808_v39 = vpop.f32.mrb[4].mxu0  ;;  %v757_v41 = vpop.f32.mrb[5].mxu1 }
 0x146   : > { %v809_v40 = vadd.f32 %v808_v39, %v755_v37  ;;  %v810_v43 = vpop.f32.mrb[5].mxu0  ;;  %v759_v45 = vpop.f32.mrb[6].mxu1 }
 0x147   : > { %v811_v44 = vadd.f32 %v810_v43, %v757_v41  ;;  %v812_v47 = vpop.f32.mrb[6].mxu0  ;;  %v761_v50 = vpop.f32.mrb[7].mxu1  ;;  %836 = sbr.rel (%p1048_p11) target bundleno = 342 (0x156), region = 59 }
 0x148   : > { %v821_v48 = vadd.f32 %v809_v40, %v275_v38  ;;  %v813_v49 = vadd.f32 %v812_v47, %v759_v45  ;;  %v814_v52 = vpop.f32.mrb[7].mxu0 }
 0x149   : > { %v822_v53 = vadd.f32 %v811_v44, %v276_v42  ;;  %v815_v54 = vadd.f32 %v814_v52, %v761_v50  ;;  %v837_v57 = vld [vmem:[#allocation2] sm:$0xff] (!%p1048_p11) }
 0x14a   : > { %829 = vst [vmem:[#allocation2 + $0x20] sm:$0xff] %v821_v48  ;;  %v823_v55 = vadd.f32 %v813_v49, %v277_v46  ;;  %v838_v58 = vld [vmem:[#allocation2 + $0x8] sm:$0xff] (!%p1048_p11)  ;;  %845 = vst [vmem:[%s1437_s2] sm:$0xff] (!%p1048_p11), %v837_v57 }
 0x14b   : > { %830 = vst [vmem:[#allocation2 + $0x28] sm:$0xff] %v822_v53  ;;  %v824_v56 = vadd.f32 %v815_v54, %v278_v51  ;;  %v839_v59 = vld [vmem:[#allocation2 + $0x10] sm:$0xff] (!%p1048_p11)  ;;  %846 = vst [vmem:[%s1437_s2 + $0x8] sm:$0xff] (!%p1048_p11), %v838_v58 }
 0x14c   : > { %831 = vst [vmem:[#allocation2 + $0x30] sm:$0xff] %v823_v55  ;;  %847 = vst [vmem:[%s1437_s2 + $0x10] sm:$0xff] (!%p1048_p11), %v839_v59  ;;  %v840_v60 = vld [vmem:[#allocation2 + $0x18] sm:$0xff] (!%p1048_p11) }
 0x14d   : > { %832 = vst [vmem:[#allocation2 + $0x38] sm:$0xff] %v824_v56  ;;  %848 = vst [vmem:[%s1437_s2 + $0x18] sm:$0xff] (!%p1048_p11), %v840_v60 }
 0x151   : > { %v841_v61 = vld [vmem:[#allocation2 + $0x20] sm:$0xff] }
 0x152   : > { %v842_v62 = vld [vmem:[#allocation2 + $0x28] sm:$0xff]  ;;  %849 = vst [vmem:[%s1437_s2 + $0x20] sm:$0xff] %v841_v61 }
 0x153   : > { %850 = vst [vmem:[%s1437_s2 + $0x28] sm:$0xff] %v842_v62  ;;  %v843_v63 = vld [vmem:[#allocation2 + $0x30] sm:$0xff] }
 0x154   : > { %v844_v0 = vld [vmem:[#allocation2 + $0x38] sm:$0xff]  ;;  %851 = vst [vmem:[%s1437_s2 + $0x30] sm:$0xff] %v843_v63 }
 0x155   : > { %852 = vst [vmem:[%s1437_s2 + $0x38] sm:$0xff] %v844_v0 }
 0x156 PF: > { %s12_s13 = sadd.s32 1, %s1250_s13   ;;  %s1438_s9 = smov %s1238_s10 }
 0x157   : > { %p9_p12 = scmp.ge.s32.totalorder %s12_s13, 6   ;;  %s1439_s10 = smov %s1303_s17 }
 0x158   : > { %s1440_s11 = smov %s1246_s12  ;;  %s1441_s12 = smov %s1443_s14 }
 0x159   :  { %11 = sbr.rel (!%p9_p12) target bundleno = 3 (0x3), region = 97 }

// kernel: discriminator_forward.12
= control target key start
LH: loop header
LB: loop body
LE: loop exit
PB: predicated region body
PF: predicated region fallthrough
CT: control target
= control target key end

     0   :  { %s462_s6 = smov 0   ;;  %s464_s7 = smov 0   ;;  %s562_s0 = inlined_call_operand.vmem [shape: f32[2,16,256], index: 0, kind: input, shape index: {}]   ;;  %s563_s1 = inlined_call_operand.vmem [shape: f32[2,16,256], index: 1, kind: output, shape index: {}]  }
   0x1   :  { %s466_s8 = smov 0   ;;  %s468_s9 = smov 0  }
   0x2   :  { %s470_s10 = smov 0   ;;  %s472_s11 = smov 0  }
   0x3   :  { %s474_s12 = smov 0  }
   0x4 LB: > { %s20_s13 = sadd.s32 1, %s442_s10  ;;  %s23_s14 = sadd.s32 1, %s446_s11  ;;  %s450_s12 = sphi %s474_s12, %s11_s12   ;;  %s446_s11 = sphi %s472_s11, %s570_s11   ;;  %s442_s10 = sphi %s470_s10, %s569_s10   ;;  %s438_s9 = sphi %s468_s9, %s568_s9   ;;  %s434_s8 = sphi %s466_s8, %s567_s8   ;;  %s430_s7 = sphi %s464_s7, %s566_s7   ;;  %s426_s6 = sphi %s462_s6, %s565_s6  }
   0x5   : > { %p21_p0 = scmp.ge.s32.totalorder %s20_s13, 2  ;;  %s323_s15 = sadd.s32 4294967295, %s450_s12  }
   0x6   : > { %p39_p1 = scmp.ne.s32.totalorder %s430_s7, %s426_s6  ;;  %p40_p2 = scmp.eq.s32.totalorder %s450_s12, 0 }
   0x7   : > { %s572_s13 = smov (%p21_p0, %s20_s13), 0  ;;  %s574_s14 = smov (!%p21_p0, %s23_s14), %s446_s11 }
   0x8   : > { %p25_p3 = scmp.ge.s32.totalorder %s574_s14, 2  ;;  %p71_p4 = scmp.eq.s32.totalorder %s323_s15, 3 }
   0x9   : > { %s28_s16 = ssub.s32 %s442_s10, %s572_s13  ;;  %p41_p5 = por %p40_p2, %p39_p1 }
   0xa   : > { %s576_s14 = smov (%p25_p3, %s574_s14), 0  ;;  %p510_p6 = por %p71_p4, %p39_p1 }
   0xb   : > { %s27_s18 = ssub.s32 %s446_s11, %s576_s14  ;;  %s32_s20 = sadd.s32 1, %s430_s7 }
   0xc   : > { %s29_s19 = sor.u32 %s28_s16, %s27_s18  ;;  %p326_p8 = scmp.ge.s32.totalorder %s450_s12, 4 }
   0xd   : > { %p30_p7 = scmp.eq.s32.totalorder %s29_s19, 0 }
   0xe   : > { %93 = sbr.rel (%p326_p8) target bundleno = 28 (0x1c), region = 16 }
   0xf   : > { %s518_s21 = scalar_select %p30_p7, %s430_s7, %s32_s20  }
  0x15   : > { %96 = sbr.rel (!%p41_p5) target bundleno = 28 (0x1c), region = 20  ;;  %s98_s22 = sand.u32 (%p41_p5), 1, %s430_s7  }
  0x16   : > { %s328_s23 = sshll.u32 (%p41_p5), %s446_s11, 2  ;;  %s327_s24 = sshll.u32 (%p41_p5), %s98_s22, 4 }
  0x17   : > { %s102_s25 = sadd.s32 (%p41_p5), %s442_s10, %s328_s23  ;;  %s100_s30 = scalar_lea.vmem (%p41_p5), [#allocation2], %s327_s24 }
  0x18   : > { %s329_s26 = sshll.u32 (%p41_p5), %s102_s25, 3 }
  0x19   : > { %s104_s29 = scalar_lea.vmem (%p41_p5), %s562_s0, %s329_s26 }
  0x1a   : > { %v134_v0 = vld [vmem:[%s104_s29] sm:$0xff] (%p41_p5)  ;;  %v136_v1 = vld [vmem:[%s104_s29 + $0x10] sm:$0xff] (%p41_p5) }
  0x1b   : > { %135 = vst [vmem:[%s100_s30] sm:$0xff] (%p41_p5), %v134_v0  ;;  %137 = vst [vmem:[%s100_s30 + $0x8] sm:$0xff] (%p41_p5), %v136_v1 }
  0x1c PF: > { %p330_p9 = scmp.ge.s32.totalorder %s450_s12, 1  ;;  %p142_p10 = scmp.lt.s32.totalorder %s450_s12, 5 }
  0x1e   : > { %p143_p11 = pnand %p330_p9, %p142_p10 }
  0x1f   : > { %s149_s2 = sand.u32 (!%p143_p11), 1, %s426_s6  }
  0x20   : > { %146 = sbr.rel (%p143_p11) target bundleno = 84 (0x54), region = 58  ;;  %s530_s3 = sshll.u32 (!%p143_p11), %s149_s2, 4 }
  0x21   : > { %s151_s4 = scalar_lea.vmem (!%p143_p11), [#allocation2], %s530_s3  ;;  %s166_s5 = scalar_lea.vmem (!%p143_p11), [#allocation3], %s530_s3 }
  0x22   : > { %v167_v2 = vld [vmem:[%s151_s4] sm:$0xff] (!%p143_p11)  ;;  %v168_v3 = vld [vmem:[%s151_s4 + $0x8] sm:$0xff] (!%p143_p11) }
  0x23   : > { %v169_v4 = vadd.f32 (!%p143_p11), %v168_v3, %v167_v2  ;;  %v176_v5 = vmul.f32 (!%p143_p11), %v167_v2, %v167_v2  ;;  %v177_v6 = vmul.f32 (!%p143_p11), %v168_v3, %v168_v3 }
  0x25   : > { %v170_v7 = vrot.slane (!%p143_p11), %v169_v4, 4  ;;  %v178_v8 = vadd.f32 (!%p143_p11), %v177_v6, %v176_v5 }
  0x27   : > { %v171_v9 = vadd.f32 %v170_v7, %v169_v4  ;;  %v179_v10 = vrot.slane %v178_v8, 4  ;;  %s334_s6 = sshll.u32 (%p510_p6), %s438_s9, 2 }
  0x28   : > { %s212_s15 = sadd.s32 (%p510_p6), %s434_s8, %s334_s6 }
  0x29   : > { %v172_v11 = vrot.slane %v171_v9, 2  ;;  %v180_v12 = vadd.f32 %v179_v10, %v178_v8  ;;  %s335_s16 = sshll.u32 (%p510_p6), %s212_s15, 3 }
  0x2a   : > { %s214_s20 = scalar_lea.vmem (%p510_p6), %s563_s1, %s335_s16 }
  0x2b   : > { %v173_v13 = vadd.f32 %v172_v11, %v171_v9  ;;  %v181_v14 = vrot.slane %v180_v12, 2 }
  0x2d   : > { %v174_v15 = vrot.slane %v173_v13, 1  ;;  %v182_v16 = vadd.f32 %v181_v14, %v180_v12 }
  0x2f   : > { %v175_v17 = vadd.f32 %v174_v15, %v173_v13  ;;  %v183_v18 = vrot.slane %v182_v16, 1 }
  0x31   : > { %v184_v19 = vadd.f32 %v183_v18, %v182_v16  ;;  %v185_v20 = vmul.f32 0.0625, %v175_v17 }
  0x33   : > { %v186_v21 = vmul.f32 0.0625, %v184_v19  ;;  %v187_v22 = vmul.f32 %v185_v20, %v185_v20  ;;  %v190_v26 = vsub.f32 %v167_v2, %v185_v20  ;;  %v191_v27 = vsub.f32 %v168_v3, %v185_v20 }
  0x35   : > { %v188_v23 = vsub.f32 %v186_v21, %v187_v22 }
  0x37   : > { %v189_v24 = vmax.f32 %v188_v23, 0.0 }
  0x39   : > { %v192_v25 = vadd.f32 1e-05, %v189_v24 }
  0x3b   : > { %394 = vrsqrt.f32 %v192_v25 }
  0x45   : > { %v395_v28 = vpop.eup %394  ;;  %210 = sbr.rel (!%p510_p6) target bundleno = 84 (0x54), region = 66 }
  0x46   : > { %v194_v29 = vmul.f32 %v395_v28, %v190_v26  ;;  %v195_v30 = vmul.f32 %v395_v28, %v191_v27 }
  0x48   : > { %vm196_vm0 = vcmp.gt.f32.partialorder %v194_v29, 0.0  ;;  %v198_v31 = vmul.f32 0.2, %v194_v29  ;;  %vm197_vm1 = vcmp.gt.f32.partialorder %v195_v30, 0.0  ;;  %v199_v32 = vmul.f32 0.2, %v195_v30 }
  0x4a   : > { %v200_v33 = vsel %vm196_vm0, %v194_v29, %v198_v31  ;;  %v201_v34 = vsel %vm197_vm1, %v195_v30, %v199_v32 }
  0x4b   : > { %202 = vst [vmem:[%s166_s5] sm:$0xff] %v200_v33  ;;  %203 = vst [vmem:[%s166_s5 + $0x8] sm:$0xff] %v201_v34 }
  0x52   : > { %v244_v35 = vld [vmem:[%s166_s5] sm:$0xff]  ;;  %v246_v36 = vld [vmem:[%s166_s5 + $0x8] sm:$0xff] }
  0x53   : > { %245 = vst [vmem:[%s214_s20] sm:$0xff] %v244_v35  ;;  %247 = vst [vmem:[%s214_s20 + $0x10] sm:$0xff] %v246_v36 }
  0x54 PF: > { %s11_s12 = sadd.s32 1, %s450_s12   ;;  %s565_s6 = smov %s430_s7 }
  0x55   : > { %p8_p12 = scmp.ge.s32.totalorder %s11_s12, 6   ;;  %s566_s7 = smov %s518_s21 }
  0x56   : > { %s567_s8 = smov %s442_s10  ;;  %s568_s9 = smov %s446_s11 }
  0x57   : > { %s569_s10 = smov %s572_s13  ;;  %s570_s11 = smov %s576_s14 }
  0x58   :  { %10 = sbr.rel (!%p8_p12) target bundleno = 4 (0x4), region = 135 }

// kernel: discriminator_forward.14
= control target key start
LH: loop header
LB: loop body
LE: loop exit
PB: predicated region body
PF: predicated region fallthrough
CT: control target
= control target key end

     0   :  { %s367_s6 = smov 0   ;;  %s369_s7 = smov 0   ;;  %s425_s0 = inlined_call_operand.vmem [shape: f32[2,4,512], index: 0, kind: input, shape index: {}]   ;;  %s426_s1 = inlined_call_operand.vmem [shape: f32[2,4,512], index: 1, kind: output, shape index: {}]  }
   0x1   :  { %s371_s8 = smov 0   ;;  %s373_s9 = smov 0  }
   0x2   :  { %s375_s10 = smov 0  }
   0x3 LB: > { %s20_s11 = sadd.s32 1, %s347_s8  ;;  %s23_s12 = sadd.s32 1, %s351_s9  ;;  %s355_s10 = sphi %s375_s10, %s11_s10   ;;  %s351_s9 = sphi %s373_s9, %s430_s9   ;;  %s347_s8 = sphi %s371_s8, %s429_s8   ;;  %s343_s7 = sphi %s369_s7, %s428_s7   ;;  %s339_s6 = sphi %s367_s6, %s427_s6  }
   0x4   : > { %p21_p0 = scmp.ge.s32.totalorder %s20_s11, 4  ;;  %p268_p1 = scmp.ge.s32.totalorder %s355_s10, 1 }
   0x5   : > { %p106_p2 = scmp.lt.s32.totalorder %s355_s10, 9 }
   0x6   : > { %s432_s11 = smov (%p21_p0, %s20_s11), 0  ;;  %s434_s12 = smov (!%p21_p0, %s23_s12), %s351_s9 }
   0x7   : > { %p107_p3 = pnand %p268_p1, %p106_p2  ;;  %p25_p4 = scmp.ge.s32.totalorder %s434_s12, 2 }
   0x8   : > { %p132_p5 = scmp.lt.s32.totalorder (!%p107_p3), %s343_s7, 1  ;;  %p134_p6 = scmp.lt.s32.totalorder (!%p107_p3), %s339_s6, 3  ;;  %vm149_vm0 = vcmask (!%p107_p3), 1043456  }
   0x9   : > { %s436_s12 = smov (%p25_p4, %s434_s12), 0  ;;  %110 = sbr.rel (%p107_p3) target bundleno = 62 (0x3e), region = 24 }
  0x10   : > { %s438_s7 = smov (!%p132_p5, %s343_s7), 1  ;;  %s440_s6 = smov (!%p134_p6, %s339_s6), 3 }
  0x11   : > { %s269_s13 = sshll.u32 %s438_s7, 2 }
  0x12   : > { %s397_s14 = sadd.s32 %s269_s13, %s440_s6 }
  0x13   : > { %s270_s15 = sshll.u32 %s397_s14, 2 }
  0x14   : > { %s139_s18 = scalar_lea.vmem %s425_s0, %s270_s15  ;;  %s147_s21 = scalar_lea.vmem %s426_s1, %s270_s15 }
  0x15   : > { %v148_v0 = vld [vmem:[%s139_s18] sm:$0xf] }
  0x16   : > { %v150_v1 = vsel %vm149_vm0, %v148_v0, 0.0  ;;  %v157_v2 = vmul.f32 %v148_v0, %v148_v0 }
  0x17   : > { %v151_v3 = vrot.slane %v150_v1, 4 }
  0x18   : > { %v158_v4 = vsel %vm149_vm0, %v157_v2, 0.0 }
  0x19   : > { %v152_v5 = vadd.f32 %v151_v3, %v150_v1  ;;  %v159_v6 = vrot.slane %v158_v4, 4 }
  0x1b   : > { %v153_v7 = vrot.slane %v152_v5, 2  ;;  %v160_v8 = vadd.f32 %v159_v6, %v158_v4 }
  0x1d   : > { %v154_v9 = vadd.f32 %v153_v7, %v152_v5  ;;  %v161_v10 = vrot.slane %v160_v8, 2 }
  0x1f   : > { %v155_v11 = vrot.slane %v154_v9, 1  ;;  %v162_v12 = vadd.f32 %v161_v10, %v160_v8 }
  0x21   : > { %v156_v13 = vadd.f32 %v155_v11, %v154_v9  ;;  %v163_v14 = vrot.slane %v162_v12, 1 }
  0x23   : > { %v164_v15 = vadd.f32 %v163_v14, %v162_v12  ;;  %v165_v16 = vmul.f32 0.25, %v156_v13 }
  0x25   : > { %v166_v17 = vmul.f32 0.25, %v164_v15  ;;  %v167_v18 = vmul.f32 %v165_v16, %v165_v16  ;;  %v170_v22 = vsub.f32 %v148_v0, %v165_v16 }
  0x27   : > { %v168_v19 = vsub.f32 %v166_v17, %v167_v18 }
  0x29   : > { %v169_v20 = vmax.f32 %v168_v19, 0.0 }
  0x2b   : > { %v171_v21 = vadd.f32 1e-05, %v169_v20 }
  0x2d   : > { %315 = vrsqrt.f32 %v171_v21 }
  0x37   : > { %v316_v23 = vpop.eup %315 }
  0x38   : > { %v173_v24 = vmul.f32 %v316_v23, %v170_v22 }
  0x3a   : > { %vm174_vm1 = vcmp.gt.f32.partialorder %v173_v24, 0.0  ;;  %v175_v25 = vmul.f32 0.2, %v173_v24 }
  0x3c   : > { %v176_v26 = vsel %vm174_vm1, %v173_v24, %v175_v25 }
  0x3d   : > { %177 = vst [vmem:[%s147_s21] sm:$0xf] %v176_v26 }
  0x3e PF: > { %s11_s10 = sadd.s32 1, %s355_s10   ;;  %s427_s6 = smov %s347_s8 }
  0x3f   : > { %p8_p7 = scmp.ge.s32.totalorder %s11_s10, 10   ;;  %s428_s7 = smov %s351_s9 }
  0x40   : > { %s429_s8 = smov %s432_s11  ;;  %s430_s9 = smov %s436_s12 }
  0x41   :  { %10 = sbr.rel (!%p8_p7) target bundleno = 3 (0x3), region = 54 }

// kernel: discriminator_forward.13
= control target key start
LH: loop header
LB: loop body
LE: loop exit
PB: predicated region body
PF: predicated region fallthrough
CT: control target
= control target key end

     0   :  { %s1437_s9 = smov 0   ;;  %s1439_s10 = smov 0   ;;  %s1737_s0 = inlined_call_operand.vmem [shape: bf16[8,4096], index: 0, kind: input, shape index: {}]   ;;  %s1738_s1 = inlined_call_operand.vmem [shape: bf16[4096,512], index: 1, kind: input, shape index: {}]   ;;  %s1739_s2 = inlined_call_operand.vmem [shape: f32[8,512], index: 2, kind: output, shape index: {}]  }
   0x1   :  { %s1441_s11 = smov 0   ;;  %s1443_s12 = smov 0  }
   0x2   :  { %s1445_s13 = smov 0   ;;  %s1447_s14 = smov 0  }
   0x3   :  { %s1449_s15 = smov 0  }
   0x4 LB: > { %s24_s16 = sadd.s32 1, %s1411_s13  ;;  %s27_s17 = sadd.s32 1, %s1415_s14  ;;  %s1419_s15 = sphi %s1449_s15, %s12_s15   ;;  %s1415_s14 = sphi %s1447_s14, %s1745_s14   ;;  %s1411_s13 = sphi %s1445_s13, %s1744_s13   ;;  %s1407_s12 = sphi %s1443_s12, %s1743_s12   ;;  %s1403_s11 = sphi %s1441_s11, %s1742_s11   ;;  %s1399_s10 = sphi %s1439_s10, %s1741_s10   ;;  %s1395_s9 = sphi %s1437_s9, %s1740_s9  }
   0x5   : > { %p25_p0 = scmp.ge.s32.totalorder %s24_s16, 8  ;;  %p75_p1 = scmp.ne.s32.totalorder %s1399_s10, %s1395_s9 }
   0x6   : > { %p76_p2 = scmp.eq.s32.totalorder %s1419_s15, 0  ;;  %s68_s21 = sadd.s32 1, %s1399_s10 }
   0x7   : > { %s1747_s16 = smov (%p25_p0, %s24_s16), 0  ;;  %s1749_s17 = smov (!%p25_p0, %s27_s17), %s1415_s14 }
   0x8   : > { %p77_p3 = por %p76_p2, %p75_p1  ;;  %p29_p4 = scmp.ge.s32.totalorder %s1749_s17, 2 }
   0x9   : > { %s63_s18 = ssub.s32 %s1411_s13, %s1747_s16  ;;  %p1123_p6 = scmp.ge.s32.totalorder %s1419_s15, 16 }
   0xa   : > { %s1751_s17 = smov (%p29_p4, %s1749_s17), 0 }
   0xb   : > { %s64_s19 = ssub.s32 %s1415_s14, %s1751_s17  ;;  %129 = sbr.rel (%p1123_p6) target bundleno = 57 (0x39), region = 16 }
   0xc   : > { %s65_s20 = sor.u32 %s64_s19, %s63_s18 }
   0xd   : > { %p66_p5 = scmp.eq.s32.totalorder %s65_s20, 0 }
   0xf   : > { %s1488_s22 = scalar_select %p66_p5, %s1399_s10, %s68_s21  }
  0x12   : > { %145 = sbr.rel (!%p77_p3) target bundleno = 57 (0x39), region = 24  ;;  %s147_s23 = sand.u32 (%p77_p3), 1, %s1399_s10  }
  0x13   : > { %s1126_s24 = sshll.u32 (%p77_p3), %s1415_s14, 1  ;;  %s1124_s25 = sshll.u32 (%p77_p3), %s147_s23, 9 }
  0x14   : > { %s1207_s26 = sshll.u32 (%p77_p3), %s1411_s13, 8  ;;  %s1502_s4 = scalar_lea.vmem (%p77_p3), [#allocation3], %s1124_s25 }
  0x15   : > { %s153_s27 = sadd.s32 (%p77_p3), %s1207_s26, %s1126_s24 }
  0x16   : > { %s1128_s28 = sshll.u32 (%p77_p3), %s153_s27, 2 }
  0x17   : > { %s1497_s3 = scalar_lea.vmem (%p77_p3), %s1738_s1, %s1128_s28 }
  0x18   : > { %v309_v0 = vld [vmem:[%s1497_s3] sm:$0xff] (%p77_p3)  ;;  %v311_v1 = vld [vmem:[%s1497_s3 + $0x10] sm:$0xff] (%p77_p3) }
  0x19   : > { %v313_v2 = vld [vmem:[%s1497_s3 + $0x20] sm:$0xff]  ;;  %310 = vst [vmem:[%s1502_s4] sm:$0xff] %v309_v0  ;;  %312 = vst [vmem:[%s1502_s4 + $0x8] sm:$0xff] %v311_v1  ;;  %v315_v3 = vld [vmem:[%s1497_s3 + $0x30] sm:$0xff] }
  0x1a   : > { %314 = vst [vmem:[%s1502_s4 + $0x10] sm:$0xff] %v313_v2  ;;  %v317_v4 = vld [vmem:[%s1497_s3 + $0x40] sm:$0xff]  ;;  %v319_v5 = vld [vmem:[%s1497_s3 + $0x50] sm:$0xff]  ;;  %316 = vst [vmem:[%s1502_s4 + $0x18] sm:$0xff] %v315_v3 }
  0x1b   : > { %318 = vst [vmem:[%s1502_s4 + $0x20] sm:$0xff] %v317_v4  ;;  %320 = vst [vmem:[%s1502_s4 + $0x28] sm:$0xff] %v319_v5  ;;  %v321_v6 = vld [vmem:[%s1497_s3 + $0x60] sm:$0xff]  ;;  %v323_v7 = vld [vmem:[%s1497_s3 + $0x70] sm:$0xff] }
  0x1c   : > { %v325_v8 = vld [vmem:[%s1497_s3 + $0x80] sm:$0xff]  ;;  %322 = vst [vmem:[%s1502_s4 + $0x30] sm:$0xff] %v321_v6  ;;  %324 = vst [vmem:[%s1502_s4 + $0x38] sm:$0xff] %v323_v7  ;;  %v327_v9 = vld [vmem:[%s1497_s3 + $0x90] sm:$0xff] }
  0x1d   : > { %326 = vst [vmem:[%s1502_s4 + $0x40] sm:$0xff] %v325_v8  ;;  %v329_v10 = vld [vmem:[%s1497_s3 + $0xa0] sm:$0xff]  ;;  %v331_v11 = vld [vmem:[%s1497_s3 + $0xb0] sm:$0xff]  ;;  %328 = vst [vmem:[%s1502_s4 + $0x48] sm:$0xff] %v327_v9 }
  0x1e   : > { %330 = vst [vmem:[%s1502_s4 + $0x50] sm:$0xff] %v329_v10  ;;  %332 = vst [vmem:[%s1502_s4 + $0x58] sm:$0xff] %v331_v11  ;;  %v333_v12 = vld [vmem:[%s1497_s3 + $0xc0] sm:$0xff]  ;;  %v335_v13 = vld [vmem:[%s1497_s3 + $0xd0] sm:$0xff] }
  0x1f   : > { %v337_v14 = vld [vmem:[%s1497_s3 + $0xe0] sm:$0xff]  ;;  %334 = vst [vmem:[%s1502_s4 + $0x60] sm:$0xff] %v333_v12  ;;  %336 = vst [vmem:[%s1502_s4 + $0x68] sm:$0xff] %v335_v13  ;;  %v339_v15 = vld [vmem:[%s1497_s3 + $0xf0] sm:$0xff] }
  0x20   : > { %338 = vst [vmem:[%s1502_s4 + $0x70] sm:$0xff] %v337_v14  ;;  %v341_v16 = vld [vmem:[%s1497_s3 + $0x100] sm:$0xff]  ;;  %v343_v17 = vld [vmem:[%s1497_s3 + $0x110] sm:$0xff]  ;;  %340 = vst [vmem:[%s1502_s4 + $0x78] sm:$0xff] %v339_v15 }
  0x21   : > { %342 = vst [vmem:[%s1502_s4 + $0x80] sm:$0xff] %v341_v16  ;;  %344 = vst [vmem:[%s1502_s4 + $0x88] sm:$0xff] %v343_v17  ;;  %v345_v18 = vld [vmem:[%s1497_s3 + $0x120] sm:$0xff]  ;;  %v347_v19 = vld [vmem:[%s1497_s3 + $0x130] sm:$0xff] }
  0x22   : > { %v349_v20 = vld [vmem:[%s1497_s3 + $0x140] sm:$0xff]  ;;  %346 = vst [vmem:[%s1502_s4 + $0x90] sm:$0xff] %v345_v18  ;;  %348 = vst [vmem:[%s1502_s4 + $0x98] sm:$0xff] %v347_v19  ;;  %v351_v21 = vld [vmem:[%s1497_s3 + $0x150] sm:$0xff] }
  0x23   : > { %350 = vst [vmem:[%s1502_s4 + $0xa0] sm:$0xff] %v349_v20  ;;  %v353_v22 = vld [vmem:[%s1497_s3 + $0x160] sm:$0xff]  ;;  %v355_v23 = vld [vmem:[%s1497_s3 + $0x170] sm:$0xff]  ;;  %352 = vst [vmem:[%s1502_s4 + $0xa8] sm:$0xff] %v351_v21 }
  0x24   : > { %354 = vst [vmem:[%s1502_s4 + $0xb0] sm:$0xff] %v353_v22  ;;  %356 = vst [vmem:[%s1502_s4 + $0xb8] sm:$0xff] %v355_v23  ;;  %v357_v24 = vld [vmem:[%s1497_s3 + $0x180] sm:$0xff]  ;;  %v359_v25 = vld [vmem:[%s1497_s3 + $0x190] sm:$0xff] }
  0x25   : > { %v361_v26 = vld [vmem:[%s1497_s3 + $0x1a0] sm:$0xff]  ;;  %358 = vst [vmem:[%s1502_s4 + $0xc0] sm:$0xff] %v357_v24  ;;  %360 = vst [vmem:[%s1502_s4 + $0xc8] sm:$0xff] %v359_v25  ;;  %v363_v27 = vld [vmem:[%s1497_s3 + $0x1b0] sm:$0xff] }
  0x26   : > { %362 = vst [vmem:[%s1502_s4 + $0xd0] sm:$0xff] %v361_v26  ;;  %v365_v28 = vld [vmem:[%s1497_s3 + $0x1c0] sm:$0xff]  ;;  %v367_v29 = vld [vmem:[%s1497_s3 + $0x1d0] sm:$0xff]  ;;  %364 = vst [vmem:[%s1502_s4 + $0xd8] sm:$0xff] %v363_v27 }
  0x27   : > { %366 = vst [vmem:[%s1502_s4 + $0xe0] sm:$0xff] %v365_v28  ;;  %368 = vst [vmem:[%s1502_s4 + $0xe8] sm:$0xff] %v367_v29  ;;  %v369_v30 = vld [vmem:[%s1497_s3 + $0x1e0] sm:$0xff]  ;;  %v371_v31 = vld [vmem:[%s1497_s3 + $0x1f0] sm:$0xff] }
  0x28   : > { %v373_v32 = vld [vmem:[%s1497_s3 + $0x200] sm:$0xff]  ;;  %370 = vst [vmem:[%s1502_s4 + $0xf0] sm:$0xff] %v369_v30  ;;  %372 = vst [vmem:[%s1502_s4 + $0xf8] sm:$0xff] %v371_v31  ;;  %v375_v33 = vld [vmem:[%s1497_s3 + $0x210] sm:$0xff] }
  0x29   : > { %374 = vst [vmem:[%s1502_s4 + $0x100] sm:$0xff] %v373_v32  ;;  %v377_v34 = vld [vmem:[%s1497_s3 + $0x220] sm:$0xff]  ;;  %v379_v35 = vld [vmem:[%s1497_s3 + $0x230] sm:$0xff]  ;;  %376 = vst [vmem:[%s1502_s4 + $0x108] sm:$0xff] %v375_v33 }
  0x2a   : > { %378 = vst [vmem:[%s1502_s4 + $0x110] sm:$0xff] %v377_v34  ;;  %380 = vst [vmem:[%s1502_s4 + $0x118] sm:$0xff] %v379_v35  ;;  %v381_v36 = vld [vmem:[%s1497_s3 + $0x240] sm:$0xff]  ;;  %v383_v37 = vld [vmem:[%s1497_s3 + $0x250] sm:$0xff] }
  0x2b   : > { %v385_v38 = vld [vmem:[%s1497_s3 + $0x260] sm:$0xff]  ;;  %382 = vst [vmem:[%s1502_s4 + $0x120] sm:$0xff] %v381_v36  ;;  %384 = vst [vmem:[%s1502_s4 + $0x128] sm:$0xff] %v383_v37  ;;  %v387_v39 = vld [vmem:[%s1497_s3 + $0x270] sm:$0xff] }
  0x2c   : > { %386 = vst [vmem:[%s1502_s4 + $0x130] sm:$0xff] %v385_v38  ;;  %v389_v40 = vld [vmem:[%s1497_s3 + $0x280] sm:$0xff]  ;;  %v391_v41 = vld [vmem:[%s1497_s3 + $0x290] sm:$0xff]  ;;  %388 = vst [vmem:[%s1502_s4 + $0x138] sm:$0xff] %v387_v39 }
  0x2d   : > { %390 = vst [vmem:[%s1502_s4 + $0x140] sm:$0xff] %v389_v40  ;;  %392 = vst [vmem:[%s1502_s4 + $0x148] sm:$0xff] %v391_v41  ;;  %v393_v42 = vld [vmem:[%s1497_s3 + $0x2a0] sm:$0xff]  ;;  %v395_v43 = vld [vmem:[%s1497_s3 + $0x2b0] sm:$0xff] }
  0x2e   : > { %v397_v44 = vld [vmem:[%s1497_s3 + $0x2c0] sm:$0xff]  ;;  %394 = vst [vmem:[%s1502_s4 + $0x150] sm:$0xff] %v393_v42  ;;  %396 = vst [vmem:[%s1502_s4 + $0x158] sm:$0xff] %v395_v43  ;;  %v399_v45 = vld [vmem:[%s1497_s3 + $0x2d0] sm:$0xff] }
  0x2f   : > { %398 = vst [vmem:[%s1502_s4 + $0x160] sm:$0xff] %v397_v44  ;;  %v401_v46 = vld [vmem:[%s1497_s3 + $0x2e0] sm:$0xff]  ;;  %v403_v47 = vld [vmem:[%s1497_s3 + $0x2f0] sm:$0xff]  ;;  %400 = vst [vmem:[%s1502_s4 + $0x168] sm:$0xff] %v399_v45 }
  0x30   : > { %402 = vst [vmem:[%s1502_s4 + $0x170] sm:$0xff] %v401_v46  ;;  %404 = vst [vmem:[%s1502_s4 + $0x178] sm:$0xff] %v403_v47  ;;  %v405_v48 = vld [vmem:[%s1497_s3 + $0x300] sm:$0xff]  ;;  %v407_v49 = vld [vmem:[%s1497_s3 + $0x310] sm:$0xff] }
  0x31   : > { %v409_v50 = vld [vmem:[%s1497_s3 + $0x320] sm:$0xff]  ;;  %406 = vst [vmem:[%s1502_s4 + $0x180] sm:$0xff] %v405_v48  ;;  %408 = vst [vmem:[%s1502_s4 + $0x188] sm:$0xff] %v407_v49  ;;  %v411_v51 = vld [vmem:[%s1497_s3 + $0x330] sm:$0xff] }
  0x32   : > { %410 = vst [vmem:[%s1502_s4 + $0x190] sm:$0xff] %v409_v50  ;;  %v413_v52 = vld [vmem:[%s1497_s3 + $0x340] sm:$0xff]  ;;  %v415_v53 = vld [vmem:[%s1497_s3 + $0x350] sm:$0xff]  ;;  %412 = vst [vmem:[%s1502_s4 + $0x198] sm:$0xff] %v411_v51 }
  0x33   : > { %414 = vst [vmem:[%s1502_s4 + $0x1a0] sm:$0xff] %v413_v52  ;;  %416 = vst [vmem:[%s1502_s4 + $0x1a8] sm:$0xff] %v415_v53  ;;  %v417_v54 = vld [vmem:[%s1497_s3 + $0x360] sm:$0xff]  ;;  %v419_v55 = vld [vmem:[%s1497_s3 + $0x370] sm:$0xff] }
  0x34   : > { %v421_v56 = vld [vmem:[%s1497_s3 + $0x380] sm:$0xff]  ;;  %418 = vst [vmem:[%s1502_s4 + $0x1b0] sm:$0xff] %v417_v54  ;;  %420 = vst [vmem:[%s1502_s4 + $0x1b8] sm:$0xff] %v419_v55  ;;  %v423_v57 = vld [vmem:[%s1497_s3 + $0x390] sm:$0xff] }
  0x35   : > { %422 = vst [vmem:[%s1502_s4 + $0x1c0] sm:$0xff] %v421_v56  ;;  %v425_v58 = vld [vmem:[%s1497_s3 + $0x3a0] sm:$0xff]  ;;  %v427_v59 = vld [vmem:[%s1497_s3 + $0x3b0] sm:$0xff]  ;;  %424 = vst [vmem:[%s1502_s4 + $0x1c8] sm:$0xff] %v423_v57 }
  0x36   : > { %426 = vst [vmem:[%s1502_s4 + $0x1d0] sm:$0xff] %v425_v58  ;;  %428 = vst [vmem:[%s1502_s4 + $0x1d8] sm:$0xff] %v427_v59  ;;  %v429_v60 = vld [vmem:[%s1497_s3 + $0x3c0] sm:$0xff]  ;;  %v431_v61 = vld [vmem:[%s1497_s3 + $0x3d0] sm:$0xff] }
  0x37   : > { %v433_v62 = vld [vmem:[%s1497_s3 + $0x3e0] sm:$0xff]  ;;  %430 = vst [vmem:[%s1502_s4 + $0x1e0] sm:$0xff] %v429_v60  ;;  %432 = vst [vmem:[%s1502_s4 + $0x1e8] sm:$0xff] %v431_v61  ;;  %v435_v63 = vld [vmem:[%s1497_s3 + $0x3f0] sm:$0xff] }
  0x38   : > { %434 = vst [vmem:[%s1502_s4 + $0x1f0] sm:$0xff] %v433_v62  ;;  %436 = vst [vmem:[%s1502_s4 + $0x1f8] sm:$0xff] %v435_v63 }
  0x39 PF: > { %p1129_p7 = scmp.ge.s32.totalorder %s1419_s15, 1  ;;  %p441_p8 = scmp.lt.s32.totalorder %s1419_s15, 17 }
  0x3b   : > { %p442_p9 = pnand %p1129_p7, %p441_p8 }
  0x3c   : > { %s448_s5 = sand.u32 (!%p442_p9), 1, %s1395_s9   ;;  %s1131_s6 = sshll.u32 (!%p442_p9), %s1403_s11, 2 }
  0x3d   : > { %445 = sbr.rel (%p442_p9) target bundleno = 370 (0x172), region = 62  ;;  %s1130_s7 = sshll.u32 (!%p442_p9), %s448_s5, 9 }
  0x3e   : > { %p485_p10 = scmp.lt.s32.totalorder (!%p442_p9), %s1131_s6, 31  ;;  %s1133_s8 = sshll.u32 (!%p442_p9), %s1407_s12, 1 }
  0x3f   : > { %p497_p11 = scmp.lt.s32.totalorder (!%p442_p9), %s1133_s8, 3  ;;  %s1644_s9 = scalar_lea.vmem (!%p442_p9), [#allocation3], %s1130_s7 }
  0x40   : > { %p1135_p12 = scmp.ne.s32.totalorder (!%p442_p9), %s1403_s11, 0 }
  0x44   : > { %s1753_s6 = smov (!%p485_p10, %s1131_s6), 31  ;;  %s1755_s8 = smov (!%p497_p11, %s1133_s8), 3 }
  0x45   : > { %s1132_s18 = sshll.u32 %s1753_s6, 2  ;;  %s1134_s23 = sshll.u32 %s1755_s8, 3  ;;  %v1421_v0 = vmov (!%p1135_p12), 0.0  }
  0x46   : > { %s1637_s21 = scalar_lea.vmem %s1737_s0, %s1132_s18  ;;  %s1642_s26 = scalar_lea.vmem %s1739_s2, %s1134_s23  ;;  %508 = vst [vmem:[#allocation2] sm:$0xff] (!%p1135_p12), %v1421_v0  ;;  %509 = vst [vmem:[#allocation2 + $0x8] sm:$0xff] (!%p1135_p12), %v1421_v0 }
  0x47   : > { %507 = sbr.rel (%p1135_p12) target bundleno = 78 (0x4e), region = 70 }
  0x4e PF: > { %v1265_v1 = vld [vmem:[%s1644_s9 + $0x4] ss:$8 sps:$4 sm:$0xff]   ;;  %v1269_v3 = vld [vmem:[%s1644_s9] ss:$8 sps:$4 sm:$0xff]   ;;  %v1271_v5 = vld [vmem:[%s1644_s9 + $0x14] ss:$8 sps:$4 sm:$0xff]  }
  0x4f   : > { %v1267_v2 = vld [vmem:[%s1644_s9 + $0x104] ss:$8 sps:$4 sm:$0xff]   ;;  %912 = vmatprep.subr.bf16.mxu0 %v1265_v1  ;;  %v1270_v4 = vld [vmem:[%s1644_s9 + $0x100] ss:$8 sps:$4 sm:$0xff]   ;;  %v1273_v6 = vld [vmem:[%s1644_s9 + $0x114] ss:$8 sps:$4 sm:$0xff]  }
  0x50   : > { %953 = vmatprep.subr.bf16.mxu1 %v1267_v2  ;;  %913 = vmatpush1.bf16.msra.mxu0 %v1269_v3  ;;  %v1275_v7 = vld [vmem:[%s1644_s9 + $0x10] ss:$8 sps:$4 sm:$0xff]   ;;  %v1277_v9 = vld [vmem:[%s1644_s9 + $0x24] ss:$8 sps:$4 sm:$0xff]   ;;  %v1281_v11 = vld [vmem:[%s1644_s9 + $0x20] ss:$8 sps:$4 sm:$0xff]  }
  0x51   : > { %954 = vmatpush1.bf16.msra.mxu1 %v1270_v4  ;;  %914 = vmatprep.subr.bf16.mxu0 %v1271_v5  ;;  %v1276_v8 = vld [vmem:[%s1644_s9 + $0x110] ss:$8 sps:$4 sm:$0xff]   ;;  %v1279_v10 = vld [vmem:[%s1644_s9 + $0x124] ss:$8 sps:$4 sm:$0xff]   ;;  %v1282_v12 = vld [vmem:[%s1644_s9 + $0x120] ss:$8 sps:$4 sm:$0xff]  }
  0x52   : > { %955 = vmatprep.subr.bf16.mxu1 %v1273_v6  ;;  %v1283_v13 = vld [vmem:[%s1644_s9 + $0x34] ss:$8 sps:$4 sm:$0xff]   ;;  %v1287_v15 = vld [vmem:[%s1644_s9 + $0x30] ss:$8 sps:$4 sm:$0xff]   ;;  %v1289_v17 = vld [vmem:[%s1644_s9 + $0x44] ss:$8 sps:$4 sm:$0xff]  }
  0x53   : > { %v1285_v14 = vld [vmem:[%s1644_s9 + $0x134] ss:$8 sps:$4 sm:$0xff]   ;;  %v1288_v16 = vld [vmem:[%s1644_s9 + $0x130] ss:$8 sps:$4 sm:$0xff]   ;;  %v1291_v18 = vld [vmem:[%s1644_s9 + $0x144] ss:$8 sps:$4 sm:$0xff]  }
  0x54   : > { %915 = vmatpush1.bf16.msra.mxu0 %v1275_v7  ;;  %v1293_v19 = vld [vmem:[%s1644_s9 + $0x40] ss:$8 sps:$4 sm:$0xff]   ;;  %v1295_v21 = vld [vmem:[%s1644_s9 + $0x54] ss:$8 sps:$4 sm:$0xff]   ;;  %v1299_v23 = vld [vmem:[%s1644_s9 + $0x50] ss:$8 sps:$4 sm:$0xff]  }
  0x55   : > { %956 = vmatpush1.bf16.msra.mxu1 %v1276_v8  ;;  %916 = vmatprep.subr.bf16.mxu0 %v1277_v9  ;;  %v1294_v20 = vld [vmem:[%s1644_s9 + $0x140] ss:$8 sps:$4 sm:$0xff]   ;;  %v1297_v22 = vld [vmem:[%s1644_s9 + $0x154] ss:$8 sps:$4 sm:$0xff]   ;;  %v1300_v24 = vld [vmem:[%s1644_s9 + $0x150] ss:$8 sps:$4 sm:$0xff]  }
  0x56   : > { %957 = vmatprep.subr.bf16.mxu1 %v1279_v10  ;;  %v1301_v25 = vld [vmem:[%s1644_s9 + $0x64] ss:$8 sps:$4 sm:$0xff]   ;;  %v1305_v27 = vld [vmem:[%s1644_s9 + $0x60] ss:$8 sps:$4 sm:$0xff]   ;;  %v1307_v29 = vld [vmem:[%s1644_s9 + $0x74] ss:$8 sps:$4 sm:$0xff]  }
  0x57   : > { %v1303_v26 = vld [vmem:[%s1644_s9 + $0x164] ss:$8 sps:$4 sm:$0xff]   ;;  %v1306_v28 = vld [vmem:[%s1644_s9 + $0x160] ss:$8 sps:$4 sm:$0xff]   ;;  %v1309_v30 = vld [vmem:[%s1644_s9 + $0x174] ss:$8 sps:$4 sm:$0xff]  }
  0x58   : > { %917 = vmatpush1.bf16.msra.mxu0 %v1281_v11  ;;  %v1311_v31 = vld [vmem:[%s1644_s9 + $0x70] ss:$8 sps:$4 sm:$0xff]   ;;  %v1313_v33 = vld [vmem:[%s1644_s9 + $0x84] ss:$8 sps:$4 sm:$0xff]   ;;  %v1317_v35 = vld [vmem:[%s1644_s9 + $0x80] ss:$8 sps:$4 sm:$0xff]  }
  0x59   : > { %958 = vmatpush1.bf16.msra.mxu1 %v1282_v12  ;;  %918 = vmatprep.subr.bf16.mxu0 %v1283_v13  ;;  %v1312_v32 = vld [vmem:[%s1644_s9 + $0x170] ss:$8 sps:$4 sm:$0xff]   ;;  %v1315_v34 = vld [vmem:[%s1644_s9 + $0x184] ss:$8 sps:$4 sm:$0xff]   ;;  %v1318_v36 = vld [vmem:[%s1644_s9 + $0x180] ss:$8 sps:$4 sm:$0xff]  }
  0x5a   : > { %959 = vmatprep.subr.bf16.mxu1 %v1285_v14  ;;  %v1319_v37 = vld [vmem:[%s1644_s9 + $0x94] ss:$8 sps:$4 sm:$0xff]   ;;  %v1323_v39 = vld [vmem:[%s1644_s9 + $0x90] ss:$8 sps:$4 sm:$0xff]   ;;  %v1325_v41 = vld [vmem:[%s1644_s9 + $0xa4] ss:$8 sps:$4 sm:$0xff]  }
  0x5b   : > { %v1321_v38 = vld [vmem:[%s1644_s9 + $0x194] ss:$8 sps:$4 sm:$0xff]   ;;  %v1324_v40 = vld [vmem:[%s1644_s9 + $0x190] ss:$8 sps:$4 sm:$0xff]   ;;  %v1327_v42 = vld [vmem:[%s1644_s9 + $0x1a4] ss:$8 sps:$4 sm:$0xff]  }
  0x5c   : > { %919 = vmatpush1.bf16.msra.mxu0 %v1287_v15  ;;  %v1329_v43 = vld [vmem:[%s1644_s9 + $0xa0] ss:$8 sps:$4 sm:$0xff]   ;;  %v1331_v45 = vld [vmem:[%s1644_s9 + $0xb4] ss:$8 sps:$4 sm:$0xff]   ;;  %v1335_v50 = vld [vmem:[%s1644_s9 + $0xb0] ss:$8 sps:$4 sm:$0xff]  }
  0x5d   : > { %960 = vmatpush1.bf16.msra.mxu1 %v1288_v16  ;;  %920 = vmatprep.subr.bf16.mxu0 %v1289_v17  ;;  %v1330_v44 = vld [vmem:[%s1644_s9 + $0x1a0] ss:$8 sps:$4 sm:$0xff]   ;;  %v1333_v46 = vld [vmem:[%s1644_s9 + $0x1b4] ss:$8 sps:$4 sm:$0xff]   ;;  %v1336_v51 = vld [vmem:[%s1644_s9 + $0x1b0] ss:$8 sps:$4 sm:$0xff]  }
  0x5e   : > { %961 = vmatprep.subr.bf16.mxu1 %v1291_v18  ;;  %v512_v47 = vld [vmem:[%s1637_s21] sm:$0xff]  ;;  %v513_v49 = vld [vmem:[%s1637_s21 + $0x8] sm:$0xff]  ;;  %v1337_v53 = vld [vmem:[%s1644_s9 + $0xc4] ss:$8 sps:$4 sm:$0xff]   ;;  %p1204_p13 = scmp.ne.s32.totalorder %s1403_s11, 7 }
  0x5f   : > { %v1137_v48 = vcombine.high %v512_v47, %v512_v47  ;;  %v1139_v52 = vcombine.high %v513_v49, %v513_v49  ;;  %v1339_v54 = vld [vmem:[%s1644_s9 + $0x1c4] ss:$8 sps:$4 sm:$0xff]   ;;  %v1341_v55 = vld [vmem:[%s1644_s9 + $0xc0] ss:$8 sps:$4 sm:$0xff]   ;;  %v1343_v57 = vld [vmem:[%s1644_s9 + $0xd4] ss:$8 sps:$4 sm:$0xff]   ;;  %v1136_v5 = vcombine.low %v512_v47, %v512_v47  ;;  %v1138_v6 = vcombine.low %v513_v49, %v513_v49 }
  0x60   : > { %921 = vmatpush1.bf16.msra.mxu0 %v1293_v19  ;;  %v1342_v56 = vld [vmem:[%s1644_s9 + $0x1c0] ss:$8 sps:$4 sm:$0xff]   ;;  %v1345_v58 = vld [vmem:[%s1644_s9 + $0x1d4] ss:$8 sps:$4 sm:$0xff]   ;;  %v1347_v59 = vld [vmem:[%s1644_s9 + $0xd0] ss:$8 sps:$4 sm:$0xff]  }
  0x61   : > { %962 = vmatpush1.bf16.msra.mxu1 %v1294_v20  ;;  %922 = vmatprep.subr.bf16.mxu0 %v1295_v21  ;;  %v1348_v60 = vld [vmem:[%s1644_s9 + $0x1d0] ss:$8 sps:$4 sm:$0xff]   ;;  %v1349_v61 = vld [vmem:[%s1644_s9 + $0xe4] ss:$8 sps:$4 sm:$0xff]   ;;  %v1353_v63 = vld [vmem:[%s1644_s9 + $0xe0] ss:$8 sps:$4 sm:$0xff]  }
  0x62   : > { %963 = vmatprep.subr.bf16.mxu1 %v1297_v22  ;;  %944 = vmatprep.mubr.bf16.mxu0 %v1137_v48  ;;  %v1351_v62 = vld [vmem:[%s1644_s9 + $0x1e4] ss:$8 sps:$4 sm:$0xff]   ;;  %v1354_v0 = vld [vmem:[%s1644_s9 + $0x1e0] ss:$8 sps:$4 sm:$0xff]   ;;  %v1355_v1 = vld [vmem:[%s1644_s9 + $0xf4] ss:$8 sps:$4 sm:$0xff]  }
  0x63   : > { %985 = vmatprep.mubr.bf16.mxu1 %v1139_v52  ;;  %v1357_v2 = vld [vmem:[%s1644_s9 + $0x1f4] ss:$8 sps:$4 sm:$0xff]   ;;  %v1359_v3 = vld [vmem:[%s1644_s9 + $0xf0] ss:$8 sps:$4 sm:$0xff]  }
  0x64   : > { %923 = vmatpush1.bf16.msra.mxu0 %v1299_v23  ;;  %v1360_v4 = vld [vmem:[%s1644_s9 + $0x1f0] ss:$8 sps:$4 sm:$0xff]  }
  0x65   : > { %964 = vmatpush1.bf16.msra.mxu1 %v1300_v24  ;;  %924 = vmatprep.subr.bf16.mxu0 %v1301_v25  ;;  %v510_v8 = vld [vmem:[#allocation2] sm:$0xff]  ;;  %v511_v12 = vld [vmem:[#allocation2 + $0x8] sm:$0xff] }
  0x66   : > { %965 = vmatprep.subr.bf16.mxu1 %v1303_v26 }
  0x68   : > { %925 = vmatpush1.bf16.msra.mxu0 %v1305_v27 }
  0x69   : > { %966 = vmatpush1.bf16.msra.mxu1 %v1306_v28  ;;  %926 = vmatprep.subr.bf16.mxu0 %v1307_v29 }
  0x6a   : > { %967 = vmatprep.subr.bf16.mxu1 %v1309_v30 }
  0x6c   : > { %927 = vmatpush1.bf16.msra.mxu0 %v1311_v31 }
  0x6d   : > { %968 = vmatpush1.bf16.msra.mxu1 %v1312_v32  ;;  %928 = vmatprep.subr.bf16.mxu0 %v1313_v33 }
  0x6e   : > { %969 = vmatprep.subr.bf16.mxu1 %v1315_v34 }
  0x70   : > { %929 = vmatpush1.bf16.msra.mxu0 %v1317_v35 }
  0x71   : > { %970 = vmatpush1.bf16.msra.mxu1 %v1318_v36  ;;  %930 = vmatprep.subr.bf16.mxu0 %v1319_v37 }
  0x72   : > { %971 = vmatprep.subr.bf16.mxu1 %v1321_v38 }
  0x74   : > { %931 = vmatpush1.bf16.msra.mxu0 %v1323_v39 }
  0x75   : > { %972 = vmatpush1.bf16.msra.mxu1 %v1324_v40  ;;  %932 = vmatprep.subr.bf16.mxu0 %v1325_v41 }
  0x76   : > { %973 = vmatprep.subr.bf16.mxu1 %v1327_v42 }
  0x78   : > { %933 = vmatpush1.bf16.msra.mxu0 %v1329_v43 }
  0x79   : > { %974 = vmatpush1.bf16.msra.mxu1 %v1330_v44  ;;  %934 = vmatprep.subr.bf16.mxu0 %v1331_v45 }
  0x7a   : > { %975 = vmatprep.subr.bf16.mxu1 %v1333_v46 }
  0x7c   : > { %935 = vmatpush1.bf16.msra.mxu0 %v1335_v50 }
  0x7d   : > { %976 = vmatpush1.bf16.msra.mxu1 %v1336_v51  ;;  %936 = vmatprep.subr.bf16.mxu0 %v1337_v53 }
  0x7e   : > { %977 = vmatprep.subr.bf16.mxu1 %v1339_v54 }
  0x80   : > { %937 = vmatpush1.bf16.msra.mxu0 %v1341_v55 }
  0x81   : > { %978 = vmatpush1.bf16.msra.mxu1 %v1342_v56  ;;  %938 = vmatprep.subr.bf16.mxu0 %v1343_v57 }
  0x82   : > { %979 = vmatprep.subr.bf16.mxu1 %v1345_v58 }
  0x84   : > { %939 = vmatpush1.bf16.msra.mxu0 %v1347_v59 }
  0x85   : > { %980 = vmatpush1.bf16.msra.mxu1 %v1348_v60  ;;  %940 = vmatprep.subr.bf16.mxu0 %v1349_v61 }
  0x86   : > { %981 = vmatprep.subr.bf16.mxu1 %v1351_v62 }
  0x88   : > { %941 = vmatpush1.bf16.msra.mxu0 %v1353_v63 }
  0x89   : > { %982 = vmatpush1.bf16.msra.mxu1 %v1354_v0  ;;  %942 = vmatprep.subr.bf16.mxu0 %v1355_v1 }
  0x8a   : > { %983 = vmatprep.subr.bf16.mxu1 %v1357_v2 }
  0x8c   : > { %943 = vmatpush1.bf16.msra.mxu0 %v1359_v3 }
  0x8d   : > { %984 = vmatpush1.bf16.msra.mxu1 %v1360_v4 }
  0x8f   : > { %945 = vmatmul.mubr.bf16.vlgmr.msra.gmra.mrb[0].mxu0 %v1136_v5 }
  0x90   : > { %986 = vmatmul.mubr.bf16.vlgmr.msra.gmra.mrb[0].mxu1 %v1138_v6 }
 0x162   : > { %v946_v7 = vpop.f32.mrb[0].mxu0 }
 0x163   : > { %v987_v9 = vpop.f32.mrb[0].mxu1  ;;  %v948_v11 = vpop.f32.mrb[1].mxu0  ;;  %1001 = sbr.rel (%p1204_p13) target bundleno = 370 (0x172), region = 74 }
 0x164   : > { %v988_v10 = vadd.f32 %v987_v9, %v946_v7  ;;  %v989_v13 = vpop.f32.mrb[1].mxu1  ;;  %v950_v15 = vpop.f32.mrb[2].mxu0 }
 0x165   : > { %v990_v14 = vadd.f32 %v989_v13, %v948_v11  ;;  %v991_v16 = vpop.f32.mrb[2].mxu1  ;;  %v951_v18 = vpop.f32.mrb[3].mxu0 }
 0x166   : > { %v994_v17 = vadd.f32 %v988_v10, %v510_v8  ;;  %v992_v19 = vpop.f32.mrb[3].mxu1 }
 0x167   : > { %v995_v20 = vadd.f32 %v990_v14, %v511_v12 }
 0x168   : > { %996 = vst [vmem:[#allocation2] sm:$0xff] %v994_v17 }
 0x169   : > { %997 = vst [vmem:[#allocation2 + $0x8] sm:$0xff] %v995_v20 }
 0x16f   : > { %v1002_v21 = vld [vmem:[#allocation2] sm:$0xff] }
 0x170   : > { %v1003_v22 = vld [vmem:[#allocation2 + $0x8] sm:$0xff]  ;;  %1004 = vst [vmem:[%s1642_s26] sm:$0xff] %v1002_v21 }
 0x171   : > { %1005 = vst [vmem:[%s1642_s26 + $0x8] sm:$0xff] %v1003_v22 }
 0x172 PF: > { %s12_s15 = sadd.s32 1, %s1419_s15   ;;  %s1740_s9 = smov %s1399_s10 }
 0x173   : > { %p9_p0 = scmp.ge.s32.totalorder %s12_s15, 18   ;;  %s1741_s10 = smov %s1488_s22 }
 0x174   : > { %s1742_s11 = smov %s1411_s13  ;;  %s1743_s12 = smov %s1415_s14 }
 0x175   : > { %s1744_s13 = smov %s1747_s16  ;;  %s1745_s14 = smov %s1751_s17 }
 0x176   :  { %11 = sbr.rel (!%p9_p0) target bundleno = 4 (0x4), region = 112 }

// kernel: discriminator_forward.15
= control target key start
LH: loop header
LB: loop body
LE: loop exit
PB: predicated region body
PF: predicated region fallthrough
CT: control target
= control target key end

     0   :  { %s637_s1 = inlined_call_operand.vmem [shape: bf16[512,128], index: 1, kind: input, shape index: {}]   ;;  %s638_s0 = inlined_call_operand.vmem [shape: bf16[8,512], index: 0, kind: input, shape index: {}]   ;;  %s639_s2 = inlined_call_operand.vmem [shape: f32[1,128], index: 2, kind: input, shape index: {}]   ;;  %s640_s3 = inlined_call_operand.vmem [shape: f32[8,128], index: 3, kind: output, shape index: {}]  }
   0x1   :  { %v473_v0 = vld [vmem:[%s637_s1 + $0x40] sm:$0xff]   ;;  %v477_v4 = vld [vmem:[%s637_s1 + $0x48] sm:$0xff]   ;;  %v481_v8 = vld [vmem:[%s637_s1 + $0x50] sm:$0xff]  }
   0x2   :  { %v474_v1 = vld [vmem:[%s637_s1 + $0xc0] sm:$0xff]   ;;  %429 = vmatprep.subr.bf16.mxu0 %v473_v0  ;;  %v478_v5 = vld [vmem:[%s637_s1 + $0xc8] sm:$0xff]   ;;  %v482_v9 = vld [vmem:[%s637_s1 + $0xd0] sm:$0xff]  }
   0x3   :  { %v475_v2 = vld [vmem:[%s637_s1] sm:$0xff]   ;;  %451 = vmatprep.subr.bf16.mxu1 %v474_v1  ;;  %v479_v6 = vld [vmem:[%s637_s1 + $0x8] sm:$0xff]   ;;  %v483_v10 = vld [vmem:[%s637_s1 + $0x10] sm:$0xff]  }
   0x4   :  { %v476_v3 = vld [vmem:[%s637_s1 + $0x80] sm:$0xff]   ;;  %430 = vmatpush3.bf16.msra.mxu0 %v475_v2  ;;  %v480_v7 = vld [vmem:[%s637_s1 + $0x88] sm:$0xff]   ;;  %v484_v11 = vld [vmem:[%s637_s1 + $0x90] sm:$0xff]  }
   0x5   :  { %452 = vmatpush3.bf16.msra.mxu1 %v476_v3  ;;  %431 = vmatprep.subr.bf16.mxu0 %v477_v4  ;;  %v485_v12 = vld [vmem:[%s637_s1 + $0x58] sm:$0xff]   ;;  %v489_v16 = vld [vmem:[%s637_s1 + $0x60] sm:$0xff]   ;;  %v493_v20 = vld [vmem:[%s637_s1 + $0x68] sm:$0xff]  }
   0x6   :  { %453 = vmatprep.subr.bf16.mxu1 %v478_v5  ;;  %v486_v13 = vld [vmem:[%s637_s1 + $0xd8] sm:$0xff]   ;;  %v490_v17 = vld [vmem:[%s637_s1 + $0xe0] sm:$0xff]   ;;  %v494_v21 = vld [vmem:[%s637_s1 + $0xe8] sm:$0xff]  }
   0x7   :  { %v487_v14 = vld [vmem:[%s637_s1 + $0x18] sm:$0xff]   ;;  %v491_v18 = vld [vmem:[%s637_s1 + $0x20] sm:$0xff]   ;;  %v495_v22 = vld [vmem:[%s637_s1 + $0x28] sm:$0xff]  }
   0x8   :  { %432 = vmatpush3.bf16.msra.mxu0 %v479_v6  ;;  %v488_v15 = vld [vmem:[%s637_s1 + $0x98] sm:$0xff]   ;;  %v492_v19 = vld [vmem:[%s637_s1 + $0xa0] sm:$0xff]   ;;  %v496_v23 = vld [vmem:[%s637_s1 + $0xa8] sm:$0xff]  }
   0x9   :  { %454 = vmatpush3.bf16.msra.mxu1 %v480_v7  ;;  %433 = vmatprep.subr.bf16.mxu0 %v481_v8  ;;  %v497_v24 = vld [vmem:[%s637_s1 + $0x70] sm:$0xff]   ;;  %v501_v28 = vld [vmem:[%s637_s1 + $0x78] sm:$0xff]   ;;  %v21_v32 = vld [vmem:[%s638_s0] sm:$0xff] }
   0xa   :  { %455 = vmatprep.subr.bf16.mxu1 %v482_v9  ;;  %v498_v25 = vld [vmem:[%s637_s1 + $0xf0] sm:$0xff]   ;;  %v502_v29 = vld [vmem:[%s637_s1 + $0xf8] sm:$0xff]   ;;  %v22_v33 = vld [vmem:[%s638_s0 + $0x8] sm:$0xff]  ;;  %v392_v34 = vcombine.low %v21_v32, %v21_v32  ;;  %v393_v35 = vcombine.high %v21_v32, %v21_v32 }
   0xb   :  { %v499_v26 = vld [vmem:[%s637_s1 + $0x30] sm:$0xff]   ;;  %v503_v30 = vld [vmem:[%s637_s1 + $0x38] sm:$0xff]   ;;  %v394_v36 = vcombine.low %v22_v33, %v22_v33  ;;  %v395_v37 = vcombine.high %v22_v33, %v22_v33  ;;  %v428_v46 = vld [vmem:[%s639_s2] ss:$0 sm:$0xff] }
   0xc   :  { %434 = vmatpush3.bf16.msra.mxu0 %v483_v10  ;;  %v500_v27 = vld [vmem:[%s637_s1 + $0xb0] sm:$0xff]   ;;  %v504_v31 = vld [vmem:[%s637_s1 + $0xb8] sm:$0xff]   ;;  %325 = vmatprep.mubr.bf16.mxu0 %v393_v35 }
   0xd   :  { %456 = vmatpush3.bf16.msra.mxu1 %v484_v11  ;;  %435 = vmatprep.subr.bf16.mxu0 %v485_v12 }
   0xe   :  { %457 = vmatprep.subr.bf16.mxu1 %v486_v13  ;;  %365 = vmatprep.mubr.bf16.mxu1 %v395_v37 }
  0x10   :  { %436 = vmatpush3.bf16.msra.mxu0 %v487_v14 }
  0x11   :  { %458 = vmatpush3.bf16.msra.mxu1 %v488_v15  ;;  %437 = vmatprep.subr.bf16.mxu0 %v489_v16 }
  0x12   :  { %459 = vmatprep.subr.bf16.mxu1 %v490_v17 }
  0x14   :  { %438 = vmatpush3.bf16.msra.mxu0 %v491_v18 }
  0x15   :  { %460 = vmatpush3.bf16.msra.mxu1 %v492_v19  ;;  %439 = vmatprep.subr.bf16.mxu0 %v493_v20 }
  0x16   :  { %461 = vmatprep.subr.bf16.mxu1 %v494_v21 }
  0x18   :  { %440 = vmatpush3.bf16.msra.mxu0 %v495_v22 }
  0x19   :  { %462 = vmatpush3.bf16.msra.mxu1 %v496_v23  ;;  %441 = vmatprep.subr.bf16.mxu0 %v497_v24 }
  0x1a   :  { %463 = vmatprep.subr.bf16.mxu1 %v498_v25 }
  0x1c   :  { %442 = vmatpush3.bf16.msra.mxu0 %v499_v26 }
  0x1d   :  { %464 = vmatpush3.bf16.msra.mxu1 %v500_v27  ;;  %443 = vmatprep.subr.bf16.mxu0 %v501_v28 }
  0x1e   :  { %465 = vmatprep.subr.bf16.mxu1 %v502_v29 }
  0x20   :  { %444 = vmatpush3.bf16.msra.mxu0 %v503_v30 }
  0x21   :  { %466 = vmatpush3.bf16.msra.mxu1 %v504_v31 }
  0x23   :  { %326 = vmatmul.mubr.bf16.vlgmr.msra.gmra.mrb[0].mxu0 %v392_v34 }
  0x24   :  { %366 = vmatmul.mubr.bf16.vlgmr.msra.gmra.mrb[0].mxu1 %v394_v36 }
  0xf6   :  { %v445_v38 = vpop.f32.mrb[0].mxu0 }
  0xf7   :  { %v467_v39 = vpop.f32.mrb[0].mxu1  ;;  %v446_v40 = vpop.f32.mrb[1].mxu0 }
  0xf8   :  { %v468_v41 = vpop.f32.mrb[1].mxu1  ;;  %v447_v42 = vadd.f32 %v446_v40, %v445_v38  ;;  %v448_v44 = vpop.f32.mrb[2].mxu0 }
  0xf9   :  { %v469_v43 = vadd.f32 %v468_v41, %v467_v39  ;;  %v470_v45 = vpop.f32.mrb[2].mxu1  ;;  %v449_v47 = vpop.f32.mrb[3].mxu0 }
  0xfa   :  { %v471_v48 = vpop.f32.mrb[3].mxu1 }
  0xfb   :  { %v368_v49 = vadd.f32 %v469_v43, %v447_v42 }
  0xfd   :  { %v386_v50 = vadd.f32 %v428_v46, %v368_v49 }
  0xff   :  { %387 = vst [vmem:[%s640_s3] sm:$0xff] %v386_v50 }

</bundles_post_ra>
